<compile_context>
chip_gen: v5e
topology: v5e:2x2
jax: 0.10.0
libtpu: 0.0.40
codegen_flags: <defaults>
</compile_context>

<pallas_src>
import math

import jax
import jax.numpy as jnp
import numpy as np
from jax.experimental import pallas as pl
from jax.experimental.pallas import tpu as pltpu


# ----------------------------- chip introspection -----------------------------

def _device_kind():
    try:
        return (getattr(jax.devices()[0], "device_kind", "") or "").lower()
    except Exception:
        return ""


def _num_tensorcores():
    """TensorCores sharing a grid via dimension_semantics=('parallel',)."""
    kind = _device_kind()
    if "v7" in kind or "v4" in kind:   # v7x: 2 TC/chip; v4: megacore
        return 2
    return 1


def _default_compute_dtype():
    """bf16 MXU fast path only where the VPU/EUP speak bf16 (v6e/v7x)."""
    kind = _device_kind()
    if "v6" in kind or "v7" in kind:
        return jnp.bfloat16
    return jnp.float32


# --------------------------------- the kernel ---------------------------------

def _sab_kernel(*, num_heads, dim_V, bt, S, compute_dtype):
    d = dim_V // num_heads
    scale = 1.0 / math.sqrt(dim_V)   # PyTorch MAB scales by sqrt(dim_V) (intentional)
    R = bt * S
    approx_recip = jnp.dtype(compute_dtype) != jnp.dtype(jnp.float32)

    def kernel(x_ref, wqkvT_ref, bqkv_ref, woT_ref, bo_ref, out_ref, o_scratch):
        x = x_ref[...].astype(compute_dtype)                       # (R, dim_in)

        # Fused Q/K/V projection: one (R, dim_in) @ (dim_in, 3*dim_V) MXU matmul,
        # f32 accumulation, f32 bias add.
        qkv = jnp.dot(x, wqkvT_ref[...].astype(compute_dtype),
                      preferred_element_type=jnp.float32) + bqkv_ref[...]
        q = qkv[:, :dim_V]                       # f32 (kept for the residual add)
        k = qkv[:, dim_V:2 * dim_V]
        v = qkv[:, 2 * dim_V:]

        # Cast MXU operands once (hoisted out of the per-head loop).
        q_c = q.astype(compute_dtype)
        k_c = k.astype(compute_dtype)
        v_c = v.astype(compute_dtype)

        # Per-head attention, batched over the bt sequences of this slab.  Head
        # outputs go straight into lane slices of an f32 VMEM scratch (no concat).
        for h in range(num_heads):
            sl = slice(h * d, (h + 1) * d)
            qh = q_c[:, sl].reshape(bt, S, d)
            kh = k_c[:, sl].reshape(bt, S, d)
            vh = v_c[:, sl].reshape(bt, S, d)

            s = jnp.einsum('bqd,bkd->bqk', qh, kh,
                           preferred_element_type=jnp.float32) * scale
            s = s - jnp.max(s, axis=-1, keepdims=True)             # f32 softmax math
            p = jnp.exp(s)
            p = p * pl.reciprocal(jnp.sum(p, axis=-1, keepdims=True),
                                  approx=approx_recip)

            av = jnp.einsum('bqk,bkd->bqd', p.astype(compute_dtype), vh,
                            preferred_element_type=jnp.float32)
            o_scratch[:, sl] = q[:, sl] + av.reshape(R, d)

        o = o_scratch[...]                                         # (R, dim_V), f32
        oo = jnp.dot(o.astype(compute_dtype), woT_ref[...].astype(compute_dtype),
                     preferred_element_type=jnp.float32) + bo_ref[...]
        out_ref[...] = (o + jnp.maximum(oo, 0.0)).astype(out_ref.dtype)

    return kernel


# --------------------------------- the wrapper ---------------------------------

def _pick_bt(B, S, num_tc, max_rows=4096):
    """Sequences per grid step.

    Single-TC chips (v5e/v6e): the grid is a serial loop, so take the whole batch
    in one step (up to the `max_rows` activation cap).  Multi-TC chips (v7x): keep
    >= num_tc 'parallel' steps so every core gets work.
    """
    cap = max(1, max_rows // max(S, 1))
    if num_tc >= 2 and B >= num_tc:
        cap = min(cap, max(1, B // num_tc))
    bt = 1
    for c in range(min(B, cap), 0, -1):
        if B % c == 0:
            bt = c
            break
    return bt


def sab_forward(x, params, num_heads, *, compute_dtype=None, block_batch=None):
    """x: (B, S, dim_in) float32.  params: PyTorch-style Linear weights (out, in)."""
    B, S, dim_in = x.shape
    dim_V = params["wq"].shape[0]
    assert dim_V % num_heads == 0

    if compute_dtype is None:
        compute_dtype = _default_compute_dtype()

    num_tc = _num_tensorcores()
    bt = block_batch if block_batch is not None else _pick_bt(B, S, num_tc)
    assert B % bt == 0
    R = bt * S
    if R % 8 != 0 and R != B * S:
        raise ValueError(f"bt*S={R} must be a multiple of 8 (TPU sublane tiling)")

    # Fuse + pre-transpose the Q/K/V projection once in XLA; pre-transpose Wo.
    wqkvT = jnp.concatenate(
        [params["wq"].T, params["wk"].T, params["wv"].T], axis=1)     # (dim_in, 3*dim_V)
    bqkv = jnp.concatenate(
        [params["bq"], params["bk"], params["bv"]]).reshape(1, 3 * dim_V)
    woT = params["wo"].T                                              # (dim_V, dim_V)
    bo = params["bo"].reshape(1, dim_V)

    # Flatten so each grid step gets a dense (bt*S, dim_in) row slab = bt whole
    # sequences, and the output store is one dense 2-D slab.
    xf = x.reshape(B * S, dim_in)

    out_flat = pl.pallas_call(
        _sab_kernel(num_heads=num_heads, dim_V=dim_V, bt=bt, S=S,
                    compute_dtype=compute_dtype),
        out_shape=jax.ShapeDtypeStruct((B * S, dim_V), jnp.float32),
        grid_spec=pltpu.PrefetchScalarGridSpec(
            num_scalar_prefetch=0,
            grid=(B // bt,),
            in_specs=[
                pl.BlockSpec((R, dim_in), lambda i: (i, 0)),            # X row slab
                pl.BlockSpec((dim_in, 3 * dim_V), lambda i: (0, 0)),    # fused WqkvT
                pl.BlockSpec((1, 3 * dim_V), lambda i: (0, 0)),         # fused bias
                pl.BlockSpec((dim_V, dim_V), lambda i: (0, 0)),         # WoT
                pl.BlockSpec((1, dim_V), lambda i: (0, 0)),             # bo
            ],
            out_specs=pl.BlockSpec((R, dim_V), lambda i: (i, 0)),
            scratch_shapes=[pltpu.VMEM((R, dim_V), jnp.float32)],
        ),
        compiler_params=pltpu.CompilerParams(dimension_semantics=("parallel",)),
    )(xf, wqkvT, bqkv, woT, bo)

    return out_flat.reshape(B, S, dim_V)


# ------------------------------ pure-JAX reference ------------------------------

def sab_reference(x, params, num_heads):
    """Pure-JAX reference mirroring the PyTorch MAB forward exactly (ln=False)."""
    dim_V = params["wq"].shape[0]
    ds = dim_V // num_heads
    q = jnp.einsum("bsi,vi->bsv", x, params["wq"]) + params["bq"]
    k = jnp.einsum("bsi,vi->bsv", x, params["wk"]) + params["bk"]
    v = jnp.einsum("bsi,vi->bsv", x, params["wv"]) + params["bv"]
    outs = []
    for h in range(num_heads):
        sl = slice(h * ds, (h + 1) * ds)
        qh, kh, vh = q[..., sl], k[..., sl], v[..., sl]
        a = jax.nn.softmax(jnp.einsum("bqd,bkd->bqk", qh, kh) / math.sqrt(dim_V), axis=-1)
        outs.append(qh + jnp.einsum("bqk,bkd->bqd", a, vh))
    o = jnp.concatenate(outs, axis=-1)
    return o + jax.nn.relu(jnp.einsum("bsv,wv->bsw", o, params["wo"]) + params["bo"])


if __name__ == "__main__":
    B, S = 16, 8
    dim_in, dim_out, num_heads = 32, 32, 4

    key = jax.random.PRNGKey(0)
    ks = jax.random.split(key, 9)
    bound_in = 1.0 / math.sqrt(dim_in)
    bound_v = 1.0 / math.sqrt(dim_out)
    params = {
        "wq": jax.random.uniform(ks[0], (dim_out, dim_in), jnp.float32, -bound_in, bound_in),
        "bq": jax.random.uniform(ks[1], (dim_out,), jnp.float32, -bound_in, bound_in),
        "wk": jax.random.uniform(ks[2], (dim_out, dim_in), jnp.float32, -bound_in, bound_in),
        "bk": jax.random.uniform(ks[3], (dim_out,), jnp.float32, -bound_in, bound_in),
        "wv": jax.random.uniform(ks[4], (dim_out, dim_in), jnp.float32, -bound_in, bound_in),
        "bv": jax.random.uniform(ks[5], (dim_out,), jnp.float32, -bound_in, bound_in),
        "wo": jax.random.uniform(ks[6], (dim_out, dim_out), jnp.float32, -bound_v, bound_v),
        "bo": jax.random.uniform(ks[7], (dim_out,), jnp.float32, -bound_v, bound_v),
    }
    x = jax.random.normal(ks[8], (B, S, dim_in), jnp.float32)

    ref = jax.block_until_ready(sab_reference(x, params, num_heads))

    # f32 MXU operands: tight check against the pure-JAX reference.
    out = jax.block_until_ready(
        sab_forward(x, params, num_heads, compute_dtype=jnp.float32))
    np.testing.assert_allclose(np.asarray(out), np.asarray(ref), rtol=2e-5, atol=2e-5)

    # Chip-default path (bf16 operands + f32 accumulation on v6e/v7x, f32 on v5e):
    # loosened tolerance covers the bf16 / approx-reciprocal case.
    out_auto = jax.block_until_ready(sab_forward(x, params, num_heads))
    np.testing.assert_allclose(np.asarray(out_auto), np.asarray(ref), rtol=5e-2, atol=5e-2)

    print("KERNEL_OK")
</pallas_src>

<mosaic_0001>
module attributes {stable_mosaic.version = 11 : i64} {
  func.func @kernel(%arg0: i32, %arg1: memref<128x32xf32, #tpu.memory_space<vmem>>, %arg2: memref<32x96xf32, #tpu.memory_space<vmem>>, %arg3: memref<1x96xf32, #tpu.memory_space<vmem>>, %arg4: memref<32x32xf32, #tpu.memory_space<vmem>>, %arg5: memref<1x32xf32, #tpu.memory_space<vmem>>, %arg6: memref<128x32xf32, #tpu.memory_space<vmem>>, %arg7: memref<128x32xf32, #tpu.memory_space<vmem>>) attributes {dimension_semantics = [#tpu.dimension_semantics<parallel>], iteration_bounds = array<i64: 1>, scalar_prefetch = 0 : i64, scratch_operands = 1 : i64, tpu.core_type = #tpu.core_type<tc>, window_params = [{transform_indices = @transform_0, window_bounds = array<i64: 128, 32>}, {pipeline_mode = #tpu.pipeline_mode<synchronous>, transform_indices = @transform_1, window_bounds = array<i64: 32, 96>}, {pipeline_mode = #tpu.pipeline_mode<synchronous>, transform_indices = @transform_2, window_bounds = array<i64: 1, 96>}, {pipeline_mode = #tpu.pipeline_mode<synchronous>, transform_indices = @transform_3, window_bounds = array<i64: 32, 32>}, {pipeline_mode = #tpu.pipeline_mode<synchronous>, transform_indices = @transform_4, window_bounds = array<i64: 1, 32>}, {transform_indices = @transform_5, window_bounds = array<i64: 128, 32>}]} {
    %c0 = arith.constant 0 : index
    %c0_0 = arith.constant 0 : index
    %0 = vector.load %arg1[%c0, %c0_0] : memref<128x32xf32, #tpu.memory_space<vmem>>, vector<128x32xf32>
    %c0_1 = arith.constant 0 : index
    %c0_2 = arith.constant 0 : index
    %1 = vector.load %arg2[%c0_1, %c0_2] : memref<32x96xf32, #tpu.memory_space<vmem>>, vector<32x96xf32>
    %cst = arith.constant dense<0.000000e+00> : vector<128x96xf32>
    %2 = tpu.matmul %0, %1, %cst {dimension_numbers = #tpu.dot_dimension_numbers<[1], [0], [0], [1], [0, 0, 1, 1], [], []>} : vector<128x32xf32>, vector<32x96xf32>, vector<128x96xf32> -> vector<128x96xf32>
    %c0_3 = arith.constant 0 : index
    %c0_4 = arith.constant 0 : index
    %3 = vector.load %arg3[%c0_3, %c0_4] : memref<1x96xf32, #tpu.memory_space<vmem>>, vector<1x96xf32>
    %4 = vector.broadcast %3 : vector<1x96xf32> to vector<128x96xf32>
    %5 = arith.addf %2, %4 : vector<128x96xf32>
    %6 = vector.extract_strided_slice %5 {offsets = [0, 0], sizes = [128, 32], strides = [1, 1]} : vector<128x96xf32> to vector<128x32xf32>
    %7 = vector.extract_strided_slice %5 {offsets = [0, 32], sizes = [128, 32], strides = [1, 1]} : vector<128x96xf32> to vector<128x32xf32>
    %8 = vector.extract_strided_slice %5 {offsets = [0, 64], sizes = [128, 32], strides = [1, 1]} : vector<128x96xf32> to vector<128x32xf32>
    %9 = vector.extract_strided_slice %6 {offsets = [0, 0], sizes = [128, 8], strides = [1, 1]} : vector<128x32xf32> to vector<128x8xf32>
    %10 = vector.shape_cast %9 : vector<128x8xf32> to vector<16x8x8xf32>
    %11 = vector.extract_strided_slice %7 {offsets = [0, 0], sizes = [128, 8], strides = [1, 1]} : vector<128x32xf32> to vector<128x8xf32>
    %12 = vector.shape_cast %11 : vector<128x8xf32> to vector<16x8x8xf32>
    %13 = vector.extract_strided_slice %8 {offsets = [0, 0], sizes = [128, 8], strides = [1, 1]} : vector<128x32xf32> to vector<128x8xf32>
    %14 = vector.shape_cast %13 : vector<128x8xf32> to vector<16x8x8xf32>
    "tpu.trace_start"() <{level = 10 : i32, message = "bqd,bkd->bqk"}> : () -> ()
    %cst_5 = arith.constant dense<0.000000e+00> : vector<16x8x8xf32>
    %15 = tpu.matmul %10, %12, %cst_5 {dimension_numbers = #tpu.dot_dimension_numbers<[2], [2], [1], [1], [0, 0, 0, 1, 1, 1], [0], [0]>} : vector<16x8x8xf32>, vector<16x8x8xf32>, vector<16x8x8xf32> -> vector<16x8x8xf32>
    "tpu.trace_stop"() : () -> ()
    %cst_6 = arith.constant 0.176776692 : f32
    %16 = vector.broadcast %cst_6 : f32 to vector<16x8x8xf32>
    %17 = arith.mulf %15, %16 : vector<16x8x8xf32>
    %cst_7 = arith.constant dense<0xFF800000> : vector<16x8xf32>
    %18 = vector.multi_reduction <maximumf>, %17, %cst_7 [2] : vector<16x8x8xf32> to vector<16x8xf32>
    %19 = vector.shape_cast %18 : vector<16x8xf32> to vector<16x8x1xf32>
    %20 = vector.broadcast %19 : vector<16x8x1xf32> to vector<16x8x8xf32>
    %21 = arith.subf %17, %20 : vector<16x8x8xf32>
    %22 = math.exp %21 : vector<16x8x8xf32>
    %cst_8 = arith.constant dense<0.000000e+00> : vector<16x8xf32>
    %23 = vector.multi_reduction <add>, %22, %cst_8 [2] : vector<16x8x8xf32> to vector<16x8xf32>
    %24 = vector.shape_cast %23 : vector<16x8xf32> to vector<16x8x1xf32>
    %25 = tpu.reciprocal %24 : vector<16x8x1xf32> -> vector<16x8x1xf32>
    %26 = vector.broadcast %25 : vector<16x8x1xf32> to vector<16x8x8xf32>
    %27 = arith.mulf %22, %26 : vector<16x8x8xf32>
    "tpu.trace_start"() <{level = 10 : i32, message = "bqk,bkd->bqd"}> : () -> ()
    %cst_9 = arith.constant dense<0.000000e+00> : vector<16x8x8xf32>
    %28 = tpu.matmul %27, %14, %cst_9 {dimension_numbers = #tpu.dot_dimension_numbers<[2], [1], [1], [2], [0, 0, 0, 1, 1, 2], [0], [0]>} : vector<16x8x8xf32>, vector<16x8x8xf32>, vector<16x8x8xf32> -> vector<16x8x8xf32>
    "tpu.trace_stop"() : () -> ()
    %29 = vector.extract_strided_slice %6 {offsets = [0, 0], sizes = [128, 8], strides = [1, 1]} : vector<128x32xf32> to vector<128x8xf32>
    %30 = vector.shape_cast %28 : vector<16x8x8xf32> to vector<128x8xf32>
    %31 = arith.addf %29, %30 : vector<128x8xf32>
    %c0_10 = arith.constant 0 : index
    %c0_11 = arith.constant 0 : index
    %32 = vector.load %arg7[%c0_10, %c0_11] : memref<128x32xf32, #tpu.memory_space<vmem>>, vector<128x8xf32>
    tpu.vector_store %arg7[%c0_10, %c0_11], %31 {strides = array<i32>} : memref<128x32xf32, #tpu.memory_space<vmem>>, vector<128x8xf32>,
    %33 = vector.extract_strided_slice %6 {offsets = [0, 8], sizes = [128, 8], strides = [1, 1]} : vector<128x32xf32> to vector<128x8xf32>
    %34 = vector.shape_cast %33 : vector<128x8xf32> to vector<16x8x8xf32>
    %35 = vector.extract_strided_slice %7 {offsets = [0, 8], sizes = [128, 8], strides = [1, 1]} : vector<128x32xf32> to vector<128x8xf32>
    %36 = vector.shape_cast %35 : vector<128x8xf32> to vector<16x8x8xf32>
    %37 = vector.extract_strided_slice %8 {offsets = [0, 8], sizes = [128, 8], strides = [1, 1]} : vector<128x32xf32> to vector<128x8xf32>
    %38 = vector.shape_cast %37 : vector<128x8xf32> to vector<16x8x8xf32>
    "tpu.trace_start"() <{level = 10 : i32, message = "bqd,bkd->bqk"}> : () -> ()
    %cst_12 = arith.constant dense<0.000000e+00> : vector<16x8x8xf32>
    %39 = tpu.matmul %34, %36, %cst_12 {dimension_numbers = #tpu.dot_dimension_numbers<[2], [2], [1], [1], [0, 0, 0, 1, 1, 1], [0], [0]>} : vector<16x8x8xf32>, vector<16x8x8xf32>, vector<16x8x8xf32> -> vector<16x8x8xf32>
    "tpu.trace_stop"() : () -> ()
    %cst_13 = arith.constant 0.176776692 : f32
    %40 = vector.broadcast %cst_13 : f32 to vector<16x8x8xf32>
    %41 = arith.mulf %39, %40 : vector<16x8x8xf32>
    %cst_14 = arith.constant dense<0xFF800000> : vector<16x8xf32>
    %42 = vector.multi_reduction <maximumf>, %41, %cst_14 [2] : vector<16x8x8xf32> to vector<16x8xf32>
    %43 = vector.shape_cast %42 : vector<16x8xf32> to vector<16x8x1xf32>
    %44 = vector.broadcast %43 : vector<16x8x1xf32> to vector<16x8x8xf32>
    %45 = arith.subf %41, %44 : vector<16x8x8xf32>
    %46 = math.exp %45 : vector<16x8x8xf32>
    %cst_15 = arith.constant dense<0.000000e+00> : vector<16x8xf32>
    %47 = vector.multi_reduction <add>, %46, %cst_15 [2] : vector<16x8x8xf32> to vector<16x8xf32>
    %48 = vector.shape_cast %47 : vector<16x8xf32> to vector<16x8x1xf32>
    %49 = tpu.reciprocal %48 : vector<16x8x1xf32> -> vector<16x8x1xf32>
    %50 = vector.broadcast %49 : vector<16x8x1xf32> to vector<16x8x8xf32>
    %51 = arith.mulf %46, %50 : vector<16x8x8xf32>
    "tpu.trace_start"() <{level = 10 : i32, message = "bqk,bkd->bqd"}> : () -> ()
    %cst_16 = arith.constant dense<0.000000e+00> : vector<16x8x8xf32>
    %52 = tpu.matmul %51, %38, %cst_16 {dimension_numbers = #tpu.dot_dimension_numbers<[2], [1], [1], [2], [0, 0, 0, 1, 1, 2], [0], [0]>} : vector<16x8x8xf32>, vector<16x8x8xf32>, vector<16x8x8xf32> -> vector<16x8x8xf32>
    "tpu.trace_stop"() : () -> ()
    %53 = vector.extract_strided_slice %6 {offsets = [0, 8], sizes = [128, 8], strides = [1, 1]} : vector<128x32xf32> to vector<128x8xf32>
    %54 = vector.shape_cast %52 : vector<16x8x8xf32> to vector<128x8xf32>
    %55 = arith.addf %53, %54 : vector<128x8xf32>
    %c0_17 = arith.constant 0 : index
    %c8 = arith.constant 8 : index
    %56 = vector.load %arg7[%c0_17, %c8] : memref<128x32xf32, #tpu.memory_space<vmem>>, vector<128x8xf32>
    tpu.vector_store %arg7[%c0_17, %c8], %55 {strides = array<i32>} : memref<128x32xf32, #tpu.memory_space<vmem>>, vector<128x8xf32>,
    %57 = vector.extract_strided_slice %6 {offsets = [0, 16], sizes = [128, 8], strides = [1, 1]} : vector<128x32xf32> to vector<128x8xf32>
    %58 = vector.shape_cast %57 : vector<128x8xf32> to vector<16x8x8xf32>
    %59 = vector.extract_strided_slice %7 {offsets = [0, 16], sizes = [128, 8], strides = [1, 1]} : vector<128x32xf32> to vector<128x8xf32>
    %60 = vector.shape_cast %59 : vector<128x8xf32> to vector<16x8x8xf32>
    %61 = vector.extract_strided_slice %8 {offsets = [0, 16], sizes = [128, 8], strides = [1, 1]} : vector<128x32xf32> to vector<128x8xf32>
    %62 = vector.shape_cast %61 : vector<128x8xf32> to vector<16x8x8xf32>
    "tpu.trace_start"() <{level = 10 : i32, message = "bqd,bkd->bqk"}> : () -> ()
    %cst_18 = arith.constant dense<0.000000e+00> : vector<16x8x8xf32>
    %63 = tpu.matmul %58, %60, %cst_18 {dimension_numbers = #tpu.dot_dimension_numbers<[2], [2], [1], [1], [0, 0, 0, 1, 1, 1], [0], [0]>} : vector<16x8x8xf32>, vector<16x8x8xf32>, vector<16x8x8xf32> -> vector<16x8x8xf32>
    "tpu.trace_stop"() : () -> ()
    %cst_19 = arith.constant 0.176776692 : f32
    %64 = vector.broadcast %cst_19 : f32 to vector<16x8x8xf32>
    %65 = arith.mulf %63, %64 : vector<16x8x8xf32>
    %cst_20 = arith.constant dense<0xFF800000> : vector<16x8xf32>
    %66 = vector.multi_reduction <maximumf>, %65, %cst_20 [2] : vector<16x8x8xf32> to vector<16x8xf32>
    %67 = vector.shape_cast %66 : vector<16x8xf32> to vector<16x8x1xf32>
    %68 = vector.broadcast %67 : vector<16x8x1xf32> to vector<16x8x8xf32>
    %69 = arith.subf %65, %68 : vector<16x8x8xf32>
    %70 = math.exp %69 : vector<16x8x8xf32>
    %cst_21 = arith.constant dense<0.000000e+00> : vector<16x8xf32>
    %71 = vector.multi_reduction <add>, %70, %cst_21 [2] : vector<16x8x8xf32> to vector<16x8xf32>
    %72 = vector.shape_cast %71 : vector<16x8xf32> to vector<16x8x1xf32>
    %73 = tpu.reciprocal %72 : vector<16x8x1xf32> -> vector<16x8x1xf32>
    %74 = vector.broadcast %73 : vector<16x8x1xf32> to vector<16x8x8xf32>
    %75 = arith.mulf %70, %74 : vector<16x8x8xf32>
    "tpu.trace_start"() <{level = 10 : i32, message = "bqk,bkd->bqd"}> : () -> ()
    %cst_22 = arith.constant dense<0.000000e+00> : vector<16x8x8xf32>
    %76 = tpu.matmul %75, %62, %cst_22 {dimension_numbers = #tpu.dot_dimension_numbers<[2], [1], [1], [2], [0, 0, 0, 1, 1, 2], [0], [0]>} : vector<16x8x8xf32>, vector<16x8x8xf32>, vector<16x8x8xf32> -> vector<16x8x8xf32>
    "tpu.trace_stop"() : () -> ()
    %77 = vector.extract_strided_slice %6 {offsets = [0, 16], sizes = [128, 8], strides = [1, 1]} : vector<128x32xf32> to vector<128x8xf32>
    %78 = vector.shape_cast %76 : vector<16x8x8xf32> to vector<128x8xf32>
    %79 = arith.addf %77, %78 : vector<128x8xf32>
    %c0_23 = arith.constant 0 : index
    %c16 = arith.constant 16 : index
    %80 = vector.load %arg7[%c0_23, %c16] : memref<128x32xf32, #tpu.memory_space<vmem>>, vector<128x8xf32>
    tpu.vector_store %arg7[%c0_23, %c16], %79 {strides = array<i32>} : memref<128x32xf32, #tpu.memory_space<vmem>>, vector<128x8xf32>,
    %81 = vector.extract_strided_slice %6 {offsets = [0, 24], sizes = [128, 8], strides = [1, 1]} : vector<128x32xf32> to vector<128x8xf32>
    %82 = vector.shape_cast %81 : vector<128x8xf32> to vector<16x8x8xf32>
    %83 = vector.extract_strided_slice %7 {offsets = [0, 24], sizes = [128, 8], strides = [1, 1]} : vector<128x32xf32> to vector<128x8xf32>
    %84 = vector.shape_cast %83 : vector<128x8xf32> to vector<16x8x8xf32>
    %85 = vector.extract_strided_slice %8 {offsets = [0, 24], sizes = [128, 8], strides = [1, 1]} : vector<128x32xf32> to vector<128x8xf32>
    %86 = vector.shape_cast %85 : vector<128x8xf32> to vector<16x8x8xf32>
    "tpu.trace_start"() <{level = 10 : i32, message = "bqd,bkd->bqk"}> : () -> ()
    %cst_24 = arith.constant dense<0.000000e+00> : vector<16x8x8xf32>
    %87 = tpu.matmul %82, %84, %cst_24 {dimension_numbers = #tpu.dot_dimension_numbers<[2], [2], [1], [1], [0, 0, 0, 1, 1, 1], [0], [0]>} : vector<16x8x8xf32>, vector<16x8x8xf32>, vector<16x8x8xf32> -> vector<16x8x8xf32>
    "tpu.trace_stop"() : () -> ()
    %cst_25 = arith.constant 0.176776692 : f32
    %88 = vector.broadcast %cst_25 : f32 to vector<16x8x8xf32>
    %89 = arith.mulf %87, %88 : vector<16x8x8xf32>
    %cst_26 = arith.constant dense<0xFF800000> : vector<16x8xf32>
    %90 = vector.multi_reduction <maximumf>, %89, %cst_26 [2] : vector<16x8x8xf32> to vector<16x8xf32>
    %91 = vector.shape_cast %90 : vector<16x8xf32> to vector<16x8x1xf32>
    %92 = vector.broadcast %91 : vector<16x8x1xf32> to vector<16x8x8xf32>
    %93 = arith.subf %89, %92 : vector<16x8x8xf32>
    %94 = math.exp %93 : vector<16x8x8xf32>
    %cst_27 = arith.constant dense<0.000000e+00> : vector<16x8xf32>
    %95 = vector.multi_reduction <add>, %94, %cst_27 [2] : vector<16x8x8xf32> to vector<16x8xf32>
    %96 = vector.shape_cast %95 : vector<16x8xf32> to vector<16x8x1xf32>
    %97 = tpu.reciprocal %96 : vector<16x8x1xf32> -> vector<16x8x1xf32>
    %98 = vector.broadcast %97 : vector<16x8x1xf32> to vector<16x8x8xf32>
    %99 = arith.mulf %94, %98 : vector<16x8x8xf32>
    "tpu.trace_start"() <{level = 10 : i32, message = "bqk,bkd->bqd"}> : () -> ()
    %cst_28 = arith.constant dense<0.000000e+00> : vector<16x8x8xf32>
    %100 = tpu.matmul %99, %86, %cst_28 {dimension_numbers = #tpu.dot_dimension_numbers<[2], [1], [1], [2], [0, 0, 0, 1, 1, 2], [0], [0]>} : vector<16x8x8xf32>, vector<16x8x8xf32>, vector<16x8x8xf32> -> vector<16x8x8xf32>
    "tpu.trace_stop"() : () -> ()
    %101 = vector.extract_strided_slice %6 {offsets = [0, 24], sizes = [128, 8], strides = [1, 1]} : vector<128x32xf32> to vector<128x8xf32>
    %102 = vector.shape_cast %100 : vector<16x8x8xf32> to vector<128x8xf32>
    %103 = arith.addf %101, %102 : vector<128x8xf32>
    %c0_29 = arith.constant 0 : index
    %c24 = arith.constant 24 : index
    %104 = vector.load %arg7[%c0_29, %c24] : memref<128x32xf32, #tpu.memory_space<vmem>>, vector<128x8xf32>
    tpu.vector_store %arg7[%c0_29, %c24], %103 {strides = array<i32>} : memref<128x32xf32, #tpu.memory_space<vmem>>, vector<128x8xf32>,
    %c0_30 = arith.constant 0 : index
    %c0_31 = arith.constant 0 : index
    %105 = vector.load %arg7[%c0_30, %c0_31] : memref<128x32xf32, #tpu.memory_space<vmem>>, vector<128x32xf32>
    %c0_32 = arith.constant 0 : index
    %c0_33 = arith.constant 0 : index
    %106 = vector.load %arg4[%c0_32, %c0_33] : memref<32x32xf32, #tpu.memory_space<vmem>>, vector<32x32xf32>
    %cst_34 = arith.constant dense<0.000000e+00> : vector<128x32xf32>
    %107 = tpu.matmul %105, %106, %cst_34 {dimension_numbers = #tpu.dot_dimension_numbers<[1], [0], [0], [1], [0, 0, 1, 1], [], []>} : vector<128x32xf32>, vector<32x32xf32>, vector<128x32xf32> -> vector<128x32xf32>
    %c0_35 = arith.constant 0 : index
    %c0_36 = arith.constant 0 : index
    %108 = vector.load %arg5[%c0_35, %c0_36] : memref<1x32xf32, #tpu.memory_space<vmem>>, vector<1x32xf32>
    %109 = vector.broadcast %108 : vector<1x32xf32> to vector<128x32xf32>
    %110 = arith.addf %107, %109 : vector<128x32xf32>
    %cst_37 = arith.constant 0.000000e+00 : f32
    %111 = vector.broadcast %cst_37 : f32 to vector<128x32xf32>
    %112 = arith.maximumf %110, %111 : vector<128x32xf32>
    %113 = arith.addf %105, %112 : vector<128x32xf32>
    %c0_38 = arith.constant 0 : index
    %c0_39 = arith.constant 0 : index
    %114 = vector.load %arg6[%c0_38, %c0_39] : memref<128x32xf32, #tpu.memory_space<vmem>>, vector<128x32xf32>
    tpu.vector_store %arg6[%c0_38, %c0_39], %113 {strides = array<i32>} : memref<128x32xf32, #tpu.memory_space<vmem>>, vector<128x32xf32>,
    return
  }
  func.func @transform_0(%arg0: i32) -> (i32, i32) {
    %c0_i32 = arith.constant 0 : i32
    %c0_i32_0 = arith.constant 0 : i32
    return %arg0, %c0_i32 : i32, i32
  }
  func.func @transform_1(%arg0: i32) -> (i32, i32) {
    %c0_i32 = arith.constant 0 : i32
    %c0_i32_0 = arith.constant 0 : i32
    %c0_i32_1 = arith.constant 0 : i32
    return %c0_i32, %c0_i32_0 : i32, i32
  }
  func.func @transform_2(%arg0: i32) -> (i32, i32) {
    %c0_i32 = arith.constant 0 : i32
    %c0_i32_0 = arith.constant 0 : i32
    %c0_i32_1 = arith.constant 0 : i32
    return %c0_i32, %c0_i32_0 : i32, i32
  }
  func.func @transform_3(%arg0: i32) -> (i32, i32) {
    %c0_i32 = arith.constant 0 : i32
    %c0_i32_0 = arith.constant 0 : i32
    %c0_i32_1 = arith.constant 0 : i32
    return %c0_i32, %c0_i32_0 : i32, i32
  }
  func.func @transform_4(%arg0: i32) -> (i32, i32) {
    %c0_i32 = arith.constant 0 : i32
    %c0_i32_0 = arith.constant 0 : i32
    %c0_i32_1 = arith.constant 0 : i32
    return %c0_i32, %c0_i32_0 : i32, i32
  }
  func.func @transform_5(%arg0: i32) -> (i32, i32) {
    %c0_i32 = arith.constant 0 : i32
    %c0_i32_0 = arith.constant 0 : i32
    return %arg0, %c0_i32 : i32, i32
  }
}

</mosaic_0001>

<bundles_post_ra>
// kernel: tpu_custom_call.1
= control target key start
LH: loop header
LB: loop body
LE: loop exit
PB: predicated region body
PF: predicated region fallthrough
CT: control target
= control target key end

     0   :  { %vm44_vm0 = vcmask 261120   ;;  %s6370_s8 = smov 96   ;;  %vm161_vm1 = vcmask 64512   ;;  %s6373_s9 = smov 120   ;;  %s8838_s1 = inlined_call_operand.vmem [shape: f32[32,96], index: 1, kind: input, shape index: {}]   ;;  %s8839_s0 = inlined_call_operand.vmem [shape: f32[128,32], index: 0, kind: input, shape index: {}]   ;;  %s8840_s2 = inlined_call_operand.vmem [shape: f32[1,96], index: 2, kind: input, shape index: {}]   ;;  %s8841_s3 = inlined_call_operand.vmem [shape: f32[32,32], index: 3, kind: input, shape index: {}]   ;;  %s8842_s4 = inlined_call_operand.vmem [shape: f32[1,32], index: 4, kind: input, shape index: {}]   ;;  %s8843_s5 = inlined_call_operand.vmem [shape: f32[128,32], index: 5, kind: output, shape index: {}]  }
   0x1   :  { %v39_v0 = vld [vmem:[%s8838_s1 + $0x18] sm:$0xff]  ;;  %v38_v1 = vld [vmem:[%s8838_s1 + $0x10] sm:$0xff]  ;;  %v37_v2 = vld [vmem:[%s8838_s1 + $0x8] sm:$0xff]  ;;  %s6374_s10 = smov 56   ;;  %s6375_s11 = smov 112  }
   0x2   :  { %105 = vmatpush.msra.mxu0 %v39_v0  ;;  %v36_v3 = vld [vmem:[%s8838_s1] sm:$0xff]  ;;  %v21_v5 = vld [vmem:[%s8839_s0 + $0x8] sm:$0xff]  ;;  %v22_v6 = vld [vmem:[%s8839_s0 + $0x10] sm:$0xff]  ;;  %s6376_s12 = smov 80   ;;  %s6377_s13 = smov 48  }
   0x3   :  { %v20_v4 = vld [vmem:[%s8839_s0] sm:$0xff]  ;;  %v23_v7 = vld [vmem:[%s8839_s0 + $0x18] sm:$0xff]  ;;  %v25_v9 = vld [vmem:[%s8839_s0 + $0x28] sm:$0xff]  ;;  %s6378_s14 = smov 72   ;;  %s6379_s15 = smov 104  }
   0x4   :  { %106 = vmatpush.msra.mxu0 %v38_v1  ;;  %v24_v8 = vld [vmem:[%s8839_s0 + $0x20] sm:$0xff]  ;;  %v26_v10 = vld [vmem:[%s8839_s0 + $0x30] sm:$0xff]  ;;  %v27_v11 = vld [vmem:[%s8839_s0 + $0x38] sm:$0xff]  ;;  %s6380_s16 = smov 40   ;;  %s6381_s17 = smov 8  }
   0x5   :  { %v28_v12 = vld [vmem:[%s8839_s0 + $0x40] sm:$0xff]  ;;  %v29_v13 = vld [vmem:[%s8839_s0 + $0x48] sm:$0xff]  ;;  %v30_v14 = vld [vmem:[%s8839_s0 + $0x50] sm:$0xff]  ;;  %s6382_s18 = smov 16   ;;  %s6383_s19 = smov 24  }
   0x6   :  { %107 = vmatpush.msra.mxu0 %v37_v2  ;;  %v31_v15 = vld [vmem:[%s8839_s0 + $0x58] sm:$0xff]  ;;  %v32_v16 = vld [vmem:[%s8839_s0 + $0x60] sm:$0xff]  ;;  %v33_v17 = vld [vmem:[%s8839_s0 + $0x68] sm:$0xff] }
   0x7   :  { %v34_v18 = vld [vmem:[%s8839_s0 + $0x70] sm:$0xff]  ;;  %v35_v19 = vld [vmem:[%s8839_s0 + $0x78] sm:$0xff]  ;;  %v6112_v20 = vld [vmem:[%s8840_s2] ss:$0 sm:$0xff]  ;;  %s6371_s0 = smov 64   ;;  %s6372_s2 = smov 88  }
   0x8   :  { %108 = vmatpush.msra.mxu0 %v36_v3 }
   0x9   :  { %5711 = vmatmul.msk.f32.vlgmr.msra.gmra.mxu0 %vm44_vm0, %v20_v4 }
  0x11   :  { %5712 = vmatmul.msk.f32.gmra.mxu0 %vm44_vm0, %v21_v5 }
  0x19   :  { %5713 = vmatmul.msk.f32.gmra.mxu0 %vm44_vm0, %v22_v6 }
  0x21   :  { %5714 = vmatmul.msk.f32.gmra.mxu0 %vm44_vm0, %v23_v7 }
  0x29   :  { %5715 = vmatmul.msk.f32.gmra.mxu0 %vm44_vm0, %v24_v8 }
  0x31   :  { %5716 = vmatmul.msk.f32.gmra.mxu0 %vm44_vm0, %v25_v9 }
  0x39   :  { %5717 = vmatmul.msk.f32.gmra.mxu0 %vm44_vm0, %v26_v10 }
  0x41   :  { %5718 = vmatmul.msk.f32.gmra.mxu0 %vm44_vm0, %v27_v11 }
  0x49   :  { %5719 = vmatmul.msk.f32.gmra.mxu0 %vm44_vm0, %v28_v12 }
  0x51   :  { %5720 = vmatmul.msk.f32.gmra.mxu0 %vm44_vm0, %v29_v13 }
  0x59   :  { %5721 = vmatmul.msk.f32.gmra.mxu0 %vm44_vm0, %v30_v14 }
  0x61   :  { %5722 = vmatmul.msk.f32.gmra.mxu0 %vm44_vm0, %v31_v15 }
  0x69   :  { %5723 = vmatmul.msk.f32.gmra.mxu0 %vm44_vm0, %v32_v16 }
  0x71   :  { %5724 = vmatmul.msk.f32.gmra.mxu0 %vm44_vm0, %v33_v17 }
  0x79   :  { %5725 = vmatmul.msk.f32.gmra.mxu0 %vm44_vm0, %v34_v18 }
  0x81   :  { %5726 = vmatmul.msk.f32.gmra.mxu0 %vm44_vm0, %v35_v19 }
  0x86   :  { %v110_v21 = vpop.f32.mrf.mxu0 }
  0x87   :  { %v6493_v22 = vadd.f32 %v6112_v20, %v110_v21 }
  0x89   :  { %8873 = vst [vmem:[#allocation3_spill] sm:$0xff] %v6493_v22  ;;  %159 = vrot.lane.b32.xlu0 %v6493_v22, %s6370_s8 }
  0x8e   :  { %v113_v23 = vpop.f32.mrf.mxu0 }
  0x8f   :  { %v6497_v24 = vadd.f32 %v6112_v20, %v113_v23 }
  0x91   :  { %8874 = vst [vmem:[#allocation4_spill] sm:$0xff] %v6497_v24  ;;  %187 = vrot.lane.b32.xlu0 %v6497_v24, %s6370_s8  ;;  %v5957_v51 = vpack.i.bf16 %v6497_v24, %v6493_v22 }
  0x96   :  { %v116_v25 = vpop.f32.mrf.mxu0 }
  0x97   :  { %v6501_v26 = vadd.f32 %v6112_v20, %v116_v25 }
  0x99   :  { %8875 = vst [vmem:[#allocation5_spill] sm:$0xff] %v6501_v26  ;;  %214 = vrot.lane.b32.xlu2 %v6501_v26, %s6370_s8 }
  0x9e   :  { %v119_v27 = vpop.f32.mrf.mxu0 }
  0x9f   :  { %v6505_v28 = vadd.f32 %v6112_v20, %v119_v27 }
  0xa1   :  { %8876 = vst [vmem:[#allocation6_spill] sm:$0xff] %v6505_v28  ;;  %241 = vrot.lane.b32.xlu1 %v6505_v28, %s6370_s8  ;;  %v5962_v60 = vpack.i.bf16 %v6501_v26, %v6505_v28 }
  0xa6   :  { %v122_v29 = vpop.f32.mrf.mxu0 }
  0xa7   :  { %v6509_v30 = vadd.f32 %v6112_v20, %v122_v29 }
  0xa9   :  { %8877 = vst [vmem:[#allocation7_spill] sm:$0xff] %v6509_v30  ;;  %268 = vrot.lane.b32.xlu1 %v6509_v30, %s6370_s8 }
  0xae   :  { %v125_v31 = vpop.f32.mrf.mxu0 }
  0xaf   :  { %v6513_v32 = vadd.f32 %v6112_v20, %v125_v31 }
  0xb1   :  { %295 = vrot.lane.b32.xlu1 %v6513_v32, %s6370_s8 }
  0xb6   :  { %v128_v33 = vpop.f32.mrf.mxu0 }
  0xb7   :  { %v6517_v34 = vadd.f32 %v6112_v20, %v128_v33 }
  0xb9   :  { %8878 = vst [vmem:[#allocation8_spill] sm:$0xff] %v6517_v34  ;;  %322 = vrot.lane.b32.xlu2 %v6517_v34, %s6370_s8  ;;  %v5967_v61 = vpack.i.bf16 %v6517_v34, %v6509_v30 }
  0xbe   :  { %v131_v35 = vpop.f32.mrf.mxu0 }
  0xbf   :  { %v6521_v36 = vadd.f32 %v6112_v20, %v131_v35 }
  0xc1   :  { %8879 = vst [vmem:[#allocation9_spill] sm:$0xff] %v6521_v36  ;;  %349 = vrot.lane.b32.xlu0 %v6521_v36, %s6370_s8  ;;  %v5972_v55 = vpack.i.bf16 %v6521_v36, %v6513_v32 }
  0xc6   :  { %v134_v37 = vpop.f32.mrf.mxu0 }
  0xc7   :  { %v6525_v38 = vadd.f32 %v6112_v20, %v134_v37 }
  0xc9   :  { %376 = vrot.lane.b32.xlu2 %v6525_v38, %s6370_s8 }
  0xce   :  { %v137_v39 = vpop.f32.mrf.mxu0 }
  0xcf   :  { %v6529_v40 = vadd.f32 %v6112_v20, %v137_v39 }
  0xd1   :  { %403 = vrot.lane.b32.xlu0 %v6529_v40, %s6370_s8  ;;  %v6565_v56 = vpack.i.bf16 %v6525_v38, %v6529_v40 }
  0xd3   :  { %8885 = vst [vmem:[#allocation15_spill] sm:$0xff] %v6565_v56 }
  0xd6   :  { %v140_v41 = vpop.f32.mrf.mxu0 }
  0xd7   :  { %v6533_v42 = vadd.f32 %v6112_v20, %v140_v41 }
  0xd9   :  { %8880 = vst [vmem:[#allocation10_spill] sm:$0xff] %v6533_v42  ;;  %430 = vrot.lane.b32.xlu1 %v6533_v42, %s6370_s8 }
  0xde   :  { %v143_v43 = vpop.f32.mrf.mxu0 }
  0xdf   :  { %v6537_v44 = vadd.f32 %v6112_v20, %v143_v43 }
  0xe1   :  { %457 = vrot.lane.b32.xlu2 %v6537_v44, %s6370_s8 }
  0xe6   :  { %v146_v45 = vpop.f32.mrf.mxu0 }
  0xe7   :  { %v6541_v46 = vadd.f32 %v6112_v20, %v146_v45 }
  0xe9   :  { %8881 = vst [vmem:[#allocation11_spill] sm:$0xff] %v6541_v46  ;;  %484 = vrot.lane.b32.xlu0 %v6541_v46, %s6370_s8  ;;  %v5982_v0 = vpack.i.bf16 %v6541_v46, %v6533_v42 }
  0xee   :  { %v149_v47 = vpop.f32.mrf.mxu0 }
  0xef   :  { %v6545_v48 = vadd.f32 %v6112_v20, %v149_v47 }
  0xf1   :  { %8882 = vst [vmem:[#allocation12_spill] sm:$0xff] %v6545_v48  ;;  %511 = vrot.lane.b32.xlu1 %v6545_v48, %s6370_s8  ;;  %v6578_v59 = vpack.i.bf16 %v6545_v48, %v6537_v44 }
  0xf3   :  { %v215_v58 = vpop.permute.xlu2 %214  ;;  %8886 = vst [vmem:[#allocation16_spill] sm:$0xff] %v6578_v59 }
  0xf6   :  { %v152_v49 = vpop.f32.mrf.mxu0 }
  0xf7   :  { %v6549_v50 = vadd.f32 %v6112_v20, %v152_v49 }
  0xf9   :  { %8883 = vst [vmem:[#allocation13_spill] sm:$0xff] %v6549_v50  ;;  %538 = vrot.lane.b32.xlu2 %v6549_v50, %s6370_s8  ;;  %5958 = vrot.lane.b32.xlu1 %v5957_v51, %s6371_s0 }
  0xfb   :  { %v160_v52 = vpop.permute.xlu0 %159 }
  0xfc   :  { %5727 = vmatpush.xpose.msk.msrb.mxu0 %vm161_vm1, %v160_v52 }
  0xfe   :  { %v155_v53 = vpop.f32.mrf.mxu0 }
  0xff   :  { %v6557_v54 = vadd.f32 %v6112_v20, %v155_v53  ;;  %5728 = vmatmul.msk.f32.vlgmr.msrb.gmra.mxu0 %vm161_vm1, %v6493_v22 }
 0x101   :  { %8884 = vst [vmem:[#allocation14_spill] sm:$0xff] %v6557_v54  ;;  %5973 = vrot.lane.b32.xlu2 %v5972_v55, %s6371_s0  ;;  %5978 = vrot.lane.b32.xlu1 %v6565_v56, %s6371_s0  ;;  %v5992_v4 = vpack.i.bf16 %v6549_v50, %v6557_v54 }
 0x102   :  { %565 = vrot.lane.b32.xlu0 %v6557_v54, %s6370_s8 }
 0x103   :  { %v188_v57 = vpop.permute.xlu0 %187 }
 0x104   :  { %5729 = vmatpush.xpose.msk.msra.mxu0 %vm161_vm1, %v188_v57 }
 0x107   :  { %5730 = vmatmul.msk.f32.vlgmr.msra.gmra.mxu0 %vm161_vm1, %v6497_v24 }
 0x108   :  { %5731 = vmatpush.xpose.msk.msrb.mxu0 %vm161_vm1, %v215_v58 }
 0x109   :  { %1469 = vrot.lane.b32.xlu2 %v6497_v24, %s6372_s2  ;;  %5988 = vrot.lane.b32.xlu1 %v6578_v59, %s6371_s0 }
 0x10a   :  { %5963 = vrot.lane.b32.xlu0 %v5962_v60, %s6371_s0 }
 0x10f   :  { %5732 = vmatmul.msk.f32.vlgmr.msrb.gmra.mxu0 %vm161_vm1, %v6501_v26 }
 0x111   :  { %1497 = vrot.lane.b32.xlu1 %v6501_v26, %s6372_s2 }
 0x112   :  { %5968 = vrot.lane.b32.xlu0 %v5967_v61, %s6371_s0 }
 0x113   :  { %v242_v62 = vpop.permute.xlu1 %241  ;;  %v323_v63 = vpop.permute.xlu2 %322 }
 0x114   :  { %5733 = vmatpush.xpose.msk.msra.mxu1 %vm161_vm1, %v242_v62 }
 0x117   :  { %5734 = vmatmul.msk.f32.vlgmr.msra.gmra.mxu1 %vm161_vm1, %v6505_v28 }
 0x118   :  { %5739 = vmatpush.xpose.msk.msrb.mxu1 %vm161_vm1, %v323_v63 }
 0x119   :  { %1495 = vrot.lane.b32.xlu1 %v6501_v26, %s6373_s9 }
 0x11a   :  { %5983 = vrot.lane.b32.xlu0 %v5982_v0, %s6371_s0 }
 0x11b   :  { %v269_v1 = vpop.permute.xlu1 %268 }
 0x11c   :  { %5735 = vmatpush.xpose.msk.msra.mxu2 %vm161_vm1, %v269_v1 }
 0x11f   :  { %5736 = vmatmul.msk.f32.vlgmr.msra.gmra.mxu2 %vm161_vm1, %v6509_v30  ;;  %5740 = vmatmul.msk.f32.vlgmr.msrb.gmra.mxu1 %vm161_vm1, %v6517_v34 }
 0x121   :  { %1581 = vrot.lane.b32.xlu1 %v6513_v32, %s6372_s2 }
 0x122   :  { %1441 = vrot.lane.b32.xlu0 %v6493_v22, %s6372_s2 }
 0x123   :  { %v296_v2 = vpop.permute.xlu1 %295  ;;  %v377_v3 = vpop.permute.xlu2 %376 }
 0x124   :  { %5737 = vmatpush.xpose.msk.msra.mxu0 %vm161_vm1, %v296_v2  ;;  %5743 = vmatpush.xpose.msk.msra.mxu3 %vm161_vm1, %v377_v3 }
 0x127   :  { %5738 = vmatmul.msk.f32.vlgmr.msra.gmra.mxu0 %vm161_vm1, %v6513_v32  ;;  %5744 = vmatmul.msk.f32.vlgmr.msra.gmra.mxu3 %vm161_vm1, %v6525_v38 }
 0x129   :  { %1523 = vrot.lane.b32.xlu1 %v6505_v28, %s6373_s9 }
 0x12a   :  { %1439 = vrot.lane.b32.xlu0 %v6493_v22, %s6373_s9 }
 0x131   :  { %5993 = vrot.lane.b32.xlu1 %v5992_v4, %s6371_s0 }
 0x132   :  { %1525 = vrot.lane.b32.xlu0 %v6505_v28, %s6372_s2 }
 0x133   :  { %v350_v5 = vpop.permute.xlu0 %349 }
 0x134   :  { %5741 = vmatpush.xpose.msk.msrb.mxu2 %vm161_vm1, %v350_v5 }
 0x137   :  { %5742 = vmatmul.msk.f32.vlgmr.msrb.gmra.mxu2 %vm161_vm1, %v6521_v36 }
 0x13a   :  { %1467 = vrot.lane.b32.xlu0 %v6497_v24, %s6373_s9 }
 0x13b   :  { %v458_v6 = vpop.permute.xlu2 %457 }
 0x13c   :  { %5749 = vmatpush.xpose.msk.msrb.mxu3 %vm161_vm1, %v458_v6 }
 0x13f   :  { %5750 = vmatmul.msk.f32.vlgmr.msrb.gmra.mxu3 %vm161_vm1, %v6537_v44 }
 0x142   :  { %1579 = vrot.lane.b32.xlu0 %v6513_v32, %s6373_s9 }
 0x143   :  { %v404_v7 = vpop.permute.xlu0 %403 }
 0x144   :  { %5745 = vmatpush.xpose.msk.msra.mxu1 %vm161_vm1, %v404_v7 }
 0x147   :  { %5746 = vmatmul.msk.f32.vlgmr.msra.gmra.mxu1 %vm161_vm1, %v6529_v40 }
 0x14b   :  { %v431_v8 = vpop.permute.xlu1 %430 }
 0x14c   :  { %5747 = vmatpush.xpose.msk.msra.mxu2 %vm161_vm1, %v431_v8 }
 0x14f   :  { %5748 = vmatmul.msk.f32.vlgmr.msra.gmra.mxu2 %vm161_vm1, %v6533_v42 }
 0x153   :  { %v539_v9 = vpop.permute.xlu2 %538 }
 0x154   :  { %5755 = vmatpush.xpose.msk.msra.mxu3 %vm161_vm1, %v539_v9 }
 0x157   :  { %5756 = vmatmul.msk.f32.vlgmr.msra.gmra.mxu3 %vm161_vm1, %v6549_v50 }
 0x15b   :  { %v485_v10 = vpop.permute.xlu0 %484  ;;  %v6655_v16 = vpop.permute.xlu2 %5973 }
 0x15c   :  { %5751 = vmatpush.xpose.msk.msrb.mxu1 %vm161_vm1, %v485_v10  ;;  %v5975_v23 = vunpack.i.l.bf16 %v6655_v16 }
 0x15f   :  { %5752 = vmatmul.msk.f32.vlgmr.msrb.gmra.mxu1 %vm161_vm1, %v6541_v46 }
 0x163   :  { %v512_v11 = vpop.permute.xlu1 %511 }
 0x164   :  { %5753 = vmatpush.xpose.msk.msrb.mxu2 %vm161_vm1, %v512_v11 }
 0x167   :  { %5754 = vmatmul.msk.f32.vlgmr.msrb.gmra.mxu2 %vm161_vm1, %v6545_v48 }
 0x16b   :  { %v5959_v12 = vpop.permute.xlu1 %5958 }
 0x16c   :  { %v5961_v13 = vunpack.i.h.bf16 %v5959_v12  ;;  %v5960_v14 = vunpack.i.l.bf16 %v5959_v12 }
 0x16e   :  { %1012 = vmatpush.msra.mxu2 %v5960_v14  ;;  %1038 = vmatpush.msrb.mxu3 %v5961_v13 }
 0x173   :  { %v6691_v0 = vpop.permute.xlu1 %5978 }
 0x174   :  { %v566_v15 = vpop.permute.xlu0 %565 }
 0x175   :  { %5757 = vmatpush.xpose.msk.msra.mxu1 %vm161_vm1, %v566_v15 }
 0x178   :  { %5758 = vmatmul.msk.f32.vlgmr.msra.gmra.mxu1 %vm161_vm1, %v6557_v54 }
 0x17b   :  { %v6695_v2 = vpop.permute.xlu1 %5988 }
 0x17c   :  { %v5964_v17 = vpop.permute.xlu0 %5963  ;;  %v183_v18 = vpop.f32.mrf.mxu0 }
 0x17d   :  { %v5966_v19 = vunpack.i.h.bf16 %v5964_v17  ;;  %v5965_v20 = vunpack.i.l.bf16 %v5964_v17  ;;  %v6657_v21 = vmul.f32 0.17677669, %v183_v18 }
 0x17f   :  { %v607_v25 = vsel %vm161_vm1, %v6657_v21, -inf  ;;  %1064 = vmatpush.msrb.mxu1 %v5966_v19  ;;  %1090 = vmatpush.msrb.mxu2 %v5965_v20 }
 0x180   :  { %608 = vmax.xlane.f32.xlu1 %v607_v25 }
 0x181   :  { %1142 = vmatpush.msra.mxu1 %v5975_v23 }
 0x183   :  { %v6701_v7 = vpop.permute.xlu1 %1497 }
 0x184   :  { %v6662_v27 = vpop.permute.xlu0 %5968  ;;  %v210_v29 = vpop.f32.mrf.mxu0  ;;  %8887 = vst [vmem:[#allocation17_spill] sm:$0xff] %v6701_v7 }
 0x185   :  { %v5970_v31 = vunpack.i.l.bf16 %v6662_v27  ;;  %v6665_v33 = vmul.f32 0.17677669, %v210_v29 }
 0x187   :  { %v610_v35 = vsel %vm161_vm1, %v6665_v33, -inf  ;;  %1116 = vmatpush.msra.mxu3 %v5970_v31 }
 0x188   :  { %611 = vmax.xlane.f32.xlu2 %v610_v35 }
 0x18b   :  { %v6711_v13 = vpop.permute.xlu1 %1495 }
 0x18c   :  { %v237_v37 = vpop.f32.mrf.mxu0  ;;  %8888 = vst [vmem:[#allocation18_spill] sm:$0xff] %v6711_v13  ;;  %v6713_v14 = vpop.permute.xlu0 %5983 }
 0x18d   :  { %v6669_v39 = vmul.f32 0.17677669, %v237_v37 }
 0x18f   :  { %v613_v41 = vsel %vm161_vm1, %v6669_v39, -inf }
 0x190   :  { %614 = vmax.xlane.f32.xlu2 %v613_v41 }
 0x193   :  { %v6719_v19 = vpop.permute.xlu1 %1581 }
 0x194   :  { %v264_v43 = vpop.f32.mrf.mxu1  ;;  %8889 = vst [vmem:[#allocation19_spill] sm:$0xff] %v6719_v19  ;;  %v6721_v23 = vpop.permute.xlu0 %1441 }
 0x195   :  { %v6673_v45 = vmul.f32 0.17677669, %v264_v43 }
 0x197   :  { %v616_v47 = vsel %vm161_vm1, %v6673_v45, -inf }
 0x198   :  { %617 = vmax.xlane.f32.xlu0 %v616_v47 }
 0x19b   :  { %v6731_v41 = vpop.permute.xlu1 %1523 }
 0x19c   :  { %v345_v49 = vpop.f32.mrf.mxu1  ;;  %v6733_v43 = vpop.permute.xlu0 %1439 }
 0x19d   :  { %v6677_v51 = vmul.f32 0.17677669, %v345_v49 }
 0x19f   :  { %v625_v52 = vsel %vm161_vm1, %v6677_v51, -inf }
 0x1a0   :  { %626 = vmax.xlane.f32.xlu2 %v625_v52 }
 0x1a2   :  { %v291_v53 = vpop.f32.mrf.mxu2 }
 0x1a3   :  { %v6681_v55 = vmul.f32 0.17677669, %v291_v53  ;;  %v6737_v52 = vpop.permute.xlu1 %5993 }
 0x1a4   :  { %v318_v57 = vpop.f32.mrf.mxu0 }
 0x1a5   :  { %v6683_v58 = vmul.f32 0.17677669, %v318_v57  ;;  %v619_v60 = vsel %vm161_vm1, %v6681_v55, -inf  ;;  %v6741_v57 = vpop.permute.xlu0 %1525 }
 0x1a6   :  { %620 = vmax.xlane.f32.xlu1 %v619_v60  ;;  %v6743_v60 = vpop.permute.xlu2 %1469 }
 0x1a7   :  { %v622_v61 = vsel %vm161_vm1, %v6683_v58, -inf }
 0x1a8   :  { %623 = vmax.xlane.f32.xlu0 %v622_v61 }
 0x1aa   :  { %v399_v62 = vpop.f32.mrf.mxu3 }
 0x1ab   :  { %v6689_v63 = vmul.f32 0.17677669, %v399_v62 }
 0x1ad   :  { %v631_v1 = vsel %vm161_vm1, %v6689_v63, -inf }
 0x1b0   :  { %632 = vmax.xlane.f32.xlu0 %v631_v1 }
 0x1ba   :  { %v372_v3 = vpop.f32.mrf.mxu2 }
 0x1bb   :  { %v6697_v4 = vmul.f32 0.17677669, %v372_v3 }
 0x1bd   :  { %v628_v5 = vsel %vm161_vm1, %v6697_v4, -inf }
 0x1be   :  { %629 = vmax.xlane.f32.xlu1 %v628_v5 }
 0x1c2   :  { %v480_v6 = vpop.f32.mrf.mxu3 }
 0x1c3   :  { %v6703_v8 = vmul.f32 0.17677669, %v480_v6 }
 0x1c4   :  { %v426_v9 = vpop.f32.mrf.mxu1 }
 0x1c5   :  { %v6705_v10 = vmul.f32 0.17677669, %v426_v9  ;;  %v640_v11 = vsel %vm161_vm1, %v6703_v8, -inf  ;;  %v6750_v9 = vpop.permute.xlu0 %1467 }
 0x1c6   :  { %641 = vmax.xlane.f32.xlu0 %v640_v11  ;;  %8890 = vst [vmem:[#allocation20_spill] sm:$0xff] %v6750_v9  ;;  %v5971_v9 = vunpack.i.h.bf16 %v6662_v27 }
 0x1c7   :  { %v634_v12 = vsel %vm161_vm1, %v6705_v10, -inf }
 0x1c8   :  { %635 = vmax.xlane.f32.xlu2 %v634_v12 }
 0x1d2   :  { %v453_v15 = vpop.f32.mrf.mxu2 }
 0x1d3   :  { %v6715_v17 = vmul.f32 0.17677669, %v453_v15 }
 0x1d5   :  { %v637_v18 = vsel %vm161_vm1, %v6715_v17, -inf }
 0x1d6   :  { %638 = vmax.xlane.f32.xlu1 %v637_v18 }
 0x1da   :  { %v561_v20 = vpop.f32.mrf.mxu3 }
 0x1db   :  { %v6723_v25 = vmul.f32 0.17677669, %v561_v20  ;;  %v6757_v20 = vpop.permute.xlu0 %1579 }
 0x1dc   :  { %v507_v29 = vpop.f32.mrf.mxu1  ;;  %8891 = vst [vmem:[#allocation21_spill] sm:$0xff] %v6757_v20 }
 0x1dd   :  { %v6725_v31 = vmul.f32 0.17677669, %v507_v29  ;;  %v649_v35 = vsel %vm161_vm1, %v6723_v25, -inf }
 0x1de   :  { %650 = vmax.xlane.f32.xlu0 %v649_v35 }
 0x1df   :  { %v643_v37 = vsel %vm161_vm1, %v6725_v31, -inf }
 0x1e0   :  { %644 = vmax.xlane.f32.xlu2 %v643_v37 }
 0x1ea   :  { %v534_v47 = vpop.f32.mrf.mxu2 }
 0x1eb   :  { %v6735_v49 = vmul.f32 0.17677669, %v534_v47 }
 0x1ed   :  { %v646_v53 = vsel %vm161_vm1, %v6735_v49, -inf }
 0x1ee   :  { %647 = vmax.xlane.f32.xlu1 %v646_v53 }
 0x1f3   :  { %v609_v61 = vpop.xlane.xlu1 %608 }
 0x1f4   :  { %v655_v62 = vsub.f32 %v6657_v21, %v609_v61 }
 0x1f5   :  { %v588_v1 = vpop.f32.mrf.mxu1 }
 0x1f6   :  { %v671_v3 = vmul.f32 1.442695, %v655_v62  ;;  %v6746_v5 = vmul.f32 0.17677669, %v588_v1 }
 0x1f8   :  { %6114 = vpow2.f32 %v671_v3  ;;  %v652_v6 = vsel %vm161_vm1, %v6746_v5, -inf }
 0x1f9   :  { %653 = vmax.xlane.f32.xlu2 %v652_v6 }
 0x1fb   :  { %v612_v11 = vpop.xlane.xlu2 %611 }
 0x1fc   :  { %v656_v12 = vsub.f32 %v6665_v33, %v612_v11 }
 0x1fe   :  { %v6753_v15 = vpop.eup %6114  ;;  %v673_v18 = vmul.f32 1.442695, %v656_v12 }
 0x1ff   :  { %v703_v21 = vsel %vm161_vm1, %v6753_v15, 0.0 }
 0x200   :  { %6116 = vpow2.f32 %v673_v18  ;;  %704 = vadd.xlane.f32.xlu1 %v703_v21 }
 0x203   :  { %v615_v29 = vpop.xlane.xlu2 %614 }
 0x204   :  { %v657_v35 = vsub.f32 %v6669_v39, %v615_v29 }
 0x206   :  { %v6760_v37 = vpop.eup %6116  ;;  %v675_v47 = vmul.f32 1.442695, %v657_v35 }
 0x207   :  { %v706_v53 = vsel %vm161_vm1, %v6760_v37, 0.0 }
 0x208   :  { %6118 = vpow2.f32 %v675_v47  ;;  %707 = vadd.xlane.f32.xlu2 %v706_v53 }
 0x20b   :  { %v618_v33 = vpop.xlane.xlu0 %617 }
 0x20c   :  { %v658_v61 = vsub.f32 %v6673_v45, %v618_v33 }
 0x20e   :  { %v6765_v62 = vpop.eup %6118  ;;  %v677_v1 = vmul.f32 1.442695, %v658_v61 }
 0x20f   :  { %v709_v3 = vsel %vm161_vm1, %v6765_v62, 0.0 }
 0x210   :  { %6120 = vpow2.f32 %v677_v1  ;;  %710 = vadd.xlane.f32.xlu1 %v709_v3 }
 0x213   :  { %v627_v39 = vpop.xlane.xlu2 %626 }
 0x214   :  { %v661_v6 = vsub.f32 %v6677_v51, %v627_v39 }
 0x216   :  { %v6770_v11 = vpop.eup %6120  ;;  %v683_v12 = vmul.f32 1.442695, %v661_v6 }
 0x217   :  { %v712_v18 = vsel %vm161_vm1, %v6770_v11, 0.0 }
 0x218   :  { %6122 = vpow2.f32 %v683_v12  ;;  %713 = vadd.xlane.f32.xlu0 %v712_v18 }
 0x219   :  { %v621_v29 = vpop.xlane.xlu1 %620 }
 0x21a   :  { %v659_v53 = vsub.f32 %v6681_v55, %v621_v29 }
 0x21b   :  { %v624_v33 = vpop.xlane.xlu0 %623 }
 0x21c   :  { %v679_v61 = vmul.f32 1.442695, %v659_v53  ;;  %v660_v39 = vsub.f32 %v6683_v58, %v624_v33 }
 0x21e   :  { %v6774_v45 = vpop.eup %6122  ;;  %v681_v6 = vmul.f32 1.442695, %v660_v39 }
 0x21f   :  { %v721_v21 = vsel %vm161_vm1, %v6774_v45, 0.0 }
 0x220   :  { %1609 = vrot.lane.b32.xlu2 %v6517_v34, %s6372_s2  ;;  %722 = vadd.xlane.f32.xlu0 %v721_v21 }
 0x223   :  { %v633_v12 = vpop.xlane.xlu0 %632 }
 0x229   :  { %1553 = vrot.lane.b32.xlu1 %v6509_v30, %s6372_s2 }
 0x231   :  { %v630_v51 = vpop.xlane.xlu1 %629 }
 0x232   :  { %v662_v35 = vsub.f32 %v6697_v4, %v630_v51  ;;  %v663_v4 = vsub.f32 %v6689_v63, %v633_v12 }
 0x234   :  { %v685_v47 = vmul.f32 1.442695, %v662_v35  ;;  %v687_v51 = vmul.f32 1.442695, %v663_v4 }
 0x236   :  { %6124 = vpow2.f32 %v685_v47 }
 0x237   :  { %6126 = vpow2.f32 %v679_v61 }
 0x238   :  { %6128 = vpow2.f32 %v681_v6 }
 0x23b   :  { %v636_v35 = vpop.xlane.xlu2 %635 }
 0x23c   :  { %v6784_v1 = vpop.eup %6124  ;;  %v664_v58 = vsub.f32 %v6705_v10, %v636_v35 }
 0x23d   :  { %v724_v3 = vsel %vm161_vm1, %v6784_v1, 0.0  ;;  %v6789_v18 = vpop.eup %6126 }
 0x23e   :  { %725 = vadd.xlane.f32.xlu0 %v724_v3  ;;  %v715_v55 = vsel %vm161_vm1, %v6789_v18, 0.0  ;;  %v6795_v53 = vpop.eup %6128  ;;  %v689_v63 = vmul.f32 1.442695, %v664_v58 }
 0x23f   :  { %v718_v33 = vsel %vm161_vm1, %v6795_v53, 0.0 }
 0x249   :  { %v639_v21 = vpop.xlane.xlu1 %638  ;;  %716 = vadd.xlane.f32.xlu2 %v715_v55 }
 0x24a   :  { %v665_v29 = vsub.f32 %v6715_v17, %v639_v21 }
 0x24c   :  { %v691_v47 = vmul.f32 1.442695, %v665_v29 }
 0x24e   :  { %6130 = vpow2.f32 %v691_v47  ;;  %v6827_v47 = vpop.xlane.xlu0 %641 }
 0x24f   :  { %6132 = vpow2.f32 %v687_v51 }
 0x250   :  { %6134 = vpow2.f32 %v689_v63 }
 0x251   :  { %719 = vadd.xlane.f32.xlu2 %v718_v33 }
 0x252   :  { %1665 = vrot.lane.b32.xlu0 %v6525_v38, %s6372_s2 }
 0x253   :  { %v6815_v55 = vpop.xlane.xlu2 %644 }
 0x254   :  { %v6802_v61 = vpop.eup %6130 }
 0x255   :  { %v6804_v17 = vpop.eup %6132  ;;  %v733_v3 = vsel %vm161_vm1, %v6802_v61, 0.0 }
 0x256   :  { %734 = vadd.xlane.f32.xlu1 %v733_v3  ;;  %v727_v10 = vsel %vm161_vm1, %v6804_v17, 0.0  ;;  %v6810_v39 = vpop.eup %6134  ;;  %v6833_v56 = vpop.xlane.xlu0 %650 }
 0x257   :  { %v730_v6 = vsel %vm161_vm1, %v6810_v39, 0.0 }
 0x259   :  { %728 = vadd.xlane.f32.xlu2 %v727_v10 }
 0x261   :  { %731 = vadd.xlane.f32.xlu2 %v730_v6  ;;  %v648_v12 = vpop.xlane.xlu1 %647 }
 0x262   :  { %v668_v4 = vsub.f32 %v6735_v49, %v648_v12 }
 0x264   :  { %v697_v21 = vmul.f32 1.442695, %v668_v4 }
 0x266   :  { %6136 = vpow2.f32 %v697_v21 }
 0x26c   :  { %v6819_v29 = vpop.xlane.xlu2 %653  ;;  %v6823_v35 = vpop.eup %6136 }
 0x26d   :  { %v742_v63 = vsel %vm161_vm1, %v6823_v35, 0.0 }
 0x26f   :  { %1551 = vrot.lane.b32.xlu1 %v6509_v30, %s6373_s9 }
 0x273   :  { %v705_v51 = vpop.xlane.xlu1 %704 }
 0x274   :  { %6138 = vrcp.f32 %v705_v51  ;;  %v762_v6 = vand.u32 2147483648, %v705_v51  ;;  %v760_v12 = vand.u32 2147483647, %v705_v51  ;;  %vm756_vm3 = vweird.f32 %v705_v51 }
 0x276   :  { %v763_v20 = vor.u32 1.1754944e-38, %v762_v6  ;;  %vm761_vm5 = vcmp.eq.f32.partialorder %v760_v12, 8.507059e+37 }
 0x277   :  { %1637 = vrot.lane.b32.xlu1 %v6521_v36, %s6372_s2 }
 0x279   :  { %1607 = vrot.lane.b32.xlu2 %v6517_v34, %s6373_s9 }
 0x27a   :  { %v6139_v49 = vpop.eup %6138 }
 0x27b   :  { %v752_v58 = vmul.f32 %v6139_v49, %v705_v51  ;;  %v708_v33 = vpop.xlane.xlu2 %707  ;;  %vm757_vm2 = vweird.f32 %v6139_v49 }
 0x27c   :  { %6140 = vrcp.f32 %v708_v33  ;;  %743 = vadd.xlane.f32.xlu0 %v742_v63  ;;  %vm758_vm4 = vmor %vm756_vm3, %vm757_vm2  ;;  %v774_v51 = vand.u32 2147483647, %v708_v33  ;;  %vm770_vm7 = vweird.f32 %v708_v33 }
 0x27d   :  { %v753_v3 = vsub.f32 1.0, %v752_v58 }
 0x27e   :  { %vm775_vm9 = vcmp.eq.f32.partialorder %v774_v51, 8.507059e+37 }
 0x27f   :  { %v754_v10 = vmul.f32 %v6139_v49, %v753_v3  ;;  %1747 = vrot.lane.b32.xlu1 %v6537_v44, %s6373_s9 }
 0x281   :  { %v755_v4 = vadd.f32 %v6139_v49, %v754_v10  ;;  %v776_v10 = vand.u32 2147483648, %v708_v33 }
 0x282   :  { %v6141_v21 = vpop.eup %6140 }
 0x283   :  { %v759_v59 = vsel %vm758_vm4, %v6139_v49, %v755_v4  ;;  %v766_v13 = vmul.f32 %v6141_v21, %v708_v33  ;;  %v711_v19 = vpop.xlane.xlu1 %710  ;;  %vm771_vm6 = vweird.f32 %v6141_v21 }
 0x284   :  { %6142 = vrcp.f32 %v711_v19  ;;  %v764_v63 = vsel %vm761_vm5, %v763_v20, %v759_v59  ;;  %vm772_vm8 = vmor %vm770_vm7, %vm771_vm6  ;;  %v777_v59 = vor.u32 1.1754944e-38, %v776_v10  ;;  %vm784_vm11 = vweird.f32 %v711_v19 }
 0x285   :  { %v767_v58 = vsub.f32 1.0, %v766_v13  ;;  %v975_v3 = vmul.f32 %v6753_v15, %v764_v63 }
 0x287   :  { %v768_v7 = vmul.f32 %v6141_v21, %v767_v58  ;;  %1719 = vrot.lane.b32.xlu1 %v6533_v42, %s6373_s9  ;;  %5759 = vmatmul.msk.f32.vlgmr.msra.gmra.mxu2 %vm161_vm1, %v975_v3  ;;  %v5976_v58 = vunpack.i.h.bf16 %v6655_v16  ;;  %v790_v3 = vand.u32 2147483648, %v711_v19 }
 0x288   :  { %1168 = vmatpush.msra.mxu2 %v5971_v9  ;;  %v788_v9 = vand.u32 2147483647, %v711_v19 }
 0x289   :  { %v769_v49 = vadd.f32 %v6141_v21, %v768_v7  ;;  %v666_v7 = vsub.f32 %v6703_v8, %v6827_v47 }
 0x28a   :  { %v6143_v6 = vpop.eup %6142  ;;  %vm789_vm13 = vcmp.eq.f32.partialorder %v788_v9, 8.507059e+37 }
 0x28b   :  { %v773_v13 = vsel %vm772_vm8, %v6141_v21, %v769_v49  ;;  %v780_v20 = vmul.f32 %v6143_v6, %v711_v19  ;;  %v714_v15 = vpop.xlane.xlu0 %713  ;;  %vm785_vm10 = vweird.f32 %v6143_v6  ;;  %v791_v21 = vor.u32 1.1754944e-38, %v790_v3 }
 0x28c   :  { %6144 = vrcp.f32 %v714_v15  ;;  %v778_v12 = vsel %vm775_vm9, %v777_v59, %v773_v13  ;;  %vm786_vm12 = vmor %vm784_vm11, %vm785_vm10  ;;  %v693_v49 = vmul.f32 1.442695, %v666_v7  ;;  %v804_v47 = vand.u32 2147483648, %v714_v15 }
 0x28d   :  { %v781_v27 = vsub.f32 1.0, %v780_v20  ;;  %v976_v4 = vmul.f32 %v6760_v37, %v778_v12  ;;  %v5981_v20 = vunpack.i.h.bf16 %v6691_v0  ;;  %v802_v19 = vand.u32 2147483647, %v714_v15 }
 0x28e   :  { %vm798_vm15 = vweird.f32 %v714_v15 }
 0x28f   :  { %v782_v63 = vmul.f32 %v6143_v6, %v781_v27  ;;  %1691 = vrot.lane.b32.xlu1 %v6529_v40, %s6373_s9  ;;  %5760 = vmatmul.msk.f32.vlgmr.msrb.gmra.mxu3 %vm161_vm1, %v976_v4  ;;  %v805_v4 = vor.u32 1.1754944e-38, %v804_v47  ;;  %vm803_vm3 = vcmp.eq.f32.partialorder %v802_v19, 8.507059e+37 }
 0x290   :  { %1663 = vrot.lane.b32.xlu0 %v6525_v38, %s6373_s9  ;;  %1194 = vmatpush.msrb.mxu3 %v5976_v58 }
 0x291   :  { %v783_v33 = vadd.f32 %v6143_v6, %v782_v63 }
 0x292   :  { %v6145_v37 = vpop.eup %6144 }
 0x293   :  { %v787_v16 = vsel %vm786_vm12, %v6143_v6, %v783_v33  ;;  %v794_v10 = vmul.f32 %v6145_v37, %v714_v15  ;;  %v723_v51 = vpop.xlane.xlu0 %722  ;;  %vm799_vm14 = vweird.f32 %v6145_v37  ;;  %v667_v6 = vsub.f32 %v6725_v31, %v6815_v55 }
 0x294   :  { %6146 = vrcp.f32 %v723_v51  ;;  %v792_v8 = vsel %vm789_vm13, %v791_v21, %v787_v16  ;;  %vm800_vm2 = vmor %vm798_vm15, %vm799_vm14  ;;  %v5980_v55 = vunpack.i.l.bf16 %v6691_v0  ;;  %v846_v16 = vand.u32 2147483648, %v723_v51 }
 0x295   :  { %v795_v13 = vsub.f32 1.0, %v794_v10  ;;  %v977_v59 = vmul.f32 %v6765_v62, %v792_v8  ;;  %6148 = vpow2.f32 %v693_v49  ;;  %v695_v3 = vmul.f32 1.442695, %v667_v6 }
 0x296   :  { %v844_v15 = vand.u32 2147483647, %v723_v51  ;;  %vm840_vm5 = vweird.f32 %v723_v51  ;;  %v847_v0 = vor.u32 1.1754944e-38, %v846_v16  ;;  %v6017_v16 = vpack.i.bf16 %v6509_v30, %v6529_v40 }
 0x297   :  { %v796_v27 = vmul.f32 %v6145_v37, %v795_v13  ;;  %1805 = vrot.lane.b32.xlu1 %v6545_v48, %s6372_s2  ;;  %5761 = vmatmul.msk.f32.vlgmr.msrb.gmra.mxu1 %vm161_vm1, %v977_v59  ;;  %6150 = vpow2.f32 %v695_v3  ;;  %v6871_v13 = vpack.i.bf16 %v6517_v34, %v6501_v26  ;;  %v5986_v59 = vunpack.i.h.bf16 %v6713_v14 }
 0x298   :  { %1635 = vrot.lane.b32.xlu0 %v6521_v36, %s6373_s9  ;;  %1220 = vmatpush.msrb.mxu1 %v5981_v20  ;;  %vm845_vm7 = vcmp.eq.f32.partialorder %v844_v15, 8.507059e+37  ;;  %v6888_v20 = vpop.permute.xlu2 %1609 }
 0x299   :  { %v797_v12 = vadd.f32 %v6145_v37, %v796_v27  ;;  %v6027_v27 = vpack.i.bf16 %v6537_v44, %v6525_v38 }
 0x29a   :  { %v6147_v62 = vpop.eup %6146 }
 0x29b   :  { %v801_v58 = vsel %vm800_vm2, %v6145_v37, %v797_v12  ;;  %v836_v63 = vmul.f32 %v6147_v62, %v723_v51  ;;  %v6859_v31 = vpop.eup %6148  ;;  %vm841_vm4 = vweird.f32 %v6147_v62 }
 0x29c   :  { %v806_v7 = vsel %vm803_vm3, %v805_v4, %v801_v58  ;;  %vm842_vm6 = vmor %vm840_vm5, %vm841_vm4  ;;  %v6903_v4 = vpop.permute.xlu1 %1553 }
 0x29d   :  { %v837_v9 = vsub.f32 1.0, %v836_v63  ;;  %v978_v33 = vmul.f32 %v6770_v11, %v806_v7  ;;  %v736_v11 = vsel %vm161_vm1, %v6859_v31, 0.0  ;;  %v6874_v47 = vpop.eup %6150 }
 0x29e   :  { %v739_v51 = vsel %vm161_vm1, %v6874_v47, 0.0 }
 0x29f   :  { %v838_v21 = vmul.f32 %v6147_v62, %v837_v9  ;;  %1859 = vrot.lane.b32.xlu1 %v6557_v54, %s6373_s9  ;;  %5762 = vmatmul.msk.f32.vlgmr.msrb.gmra.mxu2 %vm161_vm1, %v978_v33  ;;  %v6909_v9 = vpack.i.bf16 %v6557_v54, %v6541_v46 }
 0x2a0   :  { %1246 = vmatpush.msrb.mxu2 %v5980_v55  ;;  %1833 = vrot.lane.b32.xlu0 %v6549_v50, %s6372_s2 }
 0x2a1   :  { %v839_v37 = vadd.f32 %v6147_v62, %v838_v21 }
 0x2a2   :  { %737 = vadd.xlane.f32.xlu2 %v736_v11 }
 0x2a3   :  { %v843_v10 = vsel %vm842_vm6, %v6147_v62, %v839_v37  ;;  %v6897_v62 = vpack.i.bf16 %v6505_v28, %v6493_v22 }
 0x2a4   :  { %v848_v49 = vsel %vm845_vm7, %v847_v0, %v843_v10 }
 0x2a5   :  { %v981_v8 = vmul.f32 %v6774_v45, %v848_v49 }
 0x2a7   :  { %5998 = vrot.lane.b32.xlu1 %v6871_v13, %s6374_s10  ;;  %5765 = vmatmul.msk.f32.vlgmr.msra.gmra.mxu2 %vm161_vm1, %v981_v8 }
 0x2a8   :  { %1324 = vmatpush.msra.mxu2 %v5986_v59  ;;  %1693 = vrot.lane.b32.xlu0 %v6529_v40, %s6372_s2 }
 0x2aa   :  { %740 = vadd.xlane.f32.xlu2 %v739_v51 }
 0x2af   :  { %2856 = vrot.lane.b32.xlu1 %v6501_v26, %s6375_s11 }
 0x2b0   :  { %1775 = vrot.lane.b32.xlu0 %v6541_v46, %s6373_s9 }
 0x2b1   :  { %v726_v45 = vpop.xlane.xlu0 %725 }
 0x2b2   :  { %6152 = vrcp.f32 %v726_v45  ;;  %vm854_vm11 = vweird.f32 %v726_v45  ;;  %v860_v8 = vand.u32 2147483648, %v726_v45  ;;  %v858_v59 = vand.u32 2147483647, %v726_v45 }
 0x2b4   :  { %vm859_vm15 = vcmp.eq.f32.partialorder %v858_v59, 8.507059e+37 }
 0x2b7   :  { %6028 = vrot.lane.b32.xlu1 %v6027_v27, %s6374_s10 }
 0x2b8   :  { %1861 = vrot.lane.b32.xlu0 %v6557_v54, %s6372_s2  ;;  %v6153_v19 = vpop.eup %6152 }
 0x2b9   :  { %v850_v12 = vmul.f32 %v6153_v19, %v726_v45  ;;  %vm855_vm9 = vweird.f32 %v6153_v19  ;;  %v6022_v45 = vpack.i.bf16 %v6545_v48, %v6521_v36 }
 0x2ba   :  { %vm6922_vm13 = vmor %vm854_vm11, %vm855_vm9 }
 0x2bb   :  { %v851_v58 = vsub.f32 1.0, %v850_v12 }
 0x2bc   :  { %v717_v6 = vpop.xlane.xlu2 %716 }
 0x2bd   :  { %6154 = vrcp.f32 %v717_v6  ;;  %v852_v33 = vmul.f32 %v6153_v19, %v851_v58  ;;  %v818_v15 = vand.u32 2147483648, %v717_v6  ;;  %v816_v37 = vand.u32 2147483647, %v717_v6 }
 0x2be   :  { %vm812_vm10 = vweird.f32 %v717_v6 }
 0x2bf   :  { %3082 = vrot.lane.b32.xlu1 %v6533_v42, %s6376_s12  ;;  %v853_v0 = vadd.f32 %v6153_v19, %v852_v33  ;;  %v819_v27 = vor.u32 1.1754944e-38, %v818_v15  ;;  %vm817_vm14 = vcmp.eq.f32.partialorder %v816_v37, 8.507059e+37 }
 0x2c0   :  { %6013 = vrot.lane.b32.xlu0 %v6897_v62, %s6374_s10 }
 0x2c2   :  { %1749 = vrot.lane.b32.xlu2 %v6537_v44, %s6372_s2 }
 0x2c3   :  { %v6155_v63 = vpop.eup %6154 }
 0x2c4   :  { %v808_v3 = vmul.f32 %v6155_v63, %v717_v6  ;;  %v720_v7 = vpop.xlane.xlu2 %719  ;;  %vm813_vm8 = vweird.f32 %v6155_v63  ;;  %v857_v6 = vsel %vm6922_vm13, %v6153_v19, %v853_v0 }
 0x2c5   :  { %6156 = vrcp.f32 %v720_v7  ;;  %vm814_vm12 = vmor %vm812_vm10, %vm813_vm8  ;;  %v830_v19 = vand.u32 2147483647, %v720_v7  ;;  %vm826_vm3 = vweird.f32 %v720_v7 }
 0x2c6   :  { %v809_v55 = vsub.f32 1.0, %v808_v3 }
 0x2c7   :  { %6033 = vrot.lane.b32.xlu1 %v6909_v9, %s6374_s10  ;;  %vm831_vm5 = vcmp.eq.f32.partialorder %v830_v19, 8.507059e+37 }
 0x2c8   :  { %v810_v21 = vmul.f32 %v6155_v63, %v809_v55  ;;  %6018 = vrot.lane.b32.xlu0 %v6017_v16, %s6374_s10  ;;  %v5985_v55 = vunpack.i.l.bf16 %v6713_v14  ;;  %v861_v16 = vor.u32 1.1754944e-38, %v860_v8 }
 0x2c9   :  { %v6916_v11 = vpop.xlane.xlu1 %734 }
 0x2ca   :  { %v811_v10 = vadd.f32 %v6155_v63, %v810_v21  ;;  %6158 = vrcp.f32 %v6916_v11  ;;  %vm896_vm7 = vweird.f32 %v6916_v11 }
 0x2cb   :  { %v6157_v49 = vpop.eup %6156 }
 0x2cc   :  { %v815_v51 = vsel %vm814_vm12, %v6155_v63, %v811_v10  ;;  %v822_v12 = vmul.f32 %v6157_v49, %v720_v7  ;;  %v6919_v58 = vpop.xlane.xlu2 %728  ;;  %vm827_vm2 = vweird.f32 %v6157_v49  ;;  %v832_v10 = vand.u32 2147483648, %v720_v7 }
 0x2cd   :  { %6160 = vrcp.f32 %v6919_v58  ;;  %v820_v63 = vsel %vm817_vm14, %v819_v27, %v815_v51  ;;  %v862_v51 = vsel %vm859_vm15, %v861_v16, %v857_v6  ;;  %v5991_v27 = vunpack.i.h.bf16 %v6695_v2  ;;  %vm828_vm4 = vmor %vm826_vm3, %vm827_vm2 }
 0x2ce   :  { %v823_v33 = vsub.f32 1.0, %v822_v12  ;;  %v979_v21 = vmul.f32 %v6789_v18, %v820_v63  ;;  %v833_v12 = vor.u32 1.1754944e-38, %v832_v10  ;;  %v902_v7 = vand.u32 2147483648, %v6916_v11 }
 0x2cf   :  { %3194 = vrot.lane.b32.xlu1 %v6549_v50, %s6376_s12  ;;  %vm868_vm10 = vweird.f32 %v6919_v58 }
 0x2d0   :  { %v6159_v15 = vpop.eup %6158  ;;  %v824_v37 = vmul.f32 %v6157_v49, %v823_v33  ;;  %6023 = vrot.lane.b32.xlu0 %v6022_v45, %s6374_s10  ;;  %5763 = vmatmul.msk.f32.vlgmr.msra.gmra.mxu3 %vm161_vm1, %v979_v21  ;;  %v982_v45 = vmul.f32 %v6784_v1, %v862_v51  ;;  %v900_v21 = vand.u32 2147483647, %v6916_v11 }
 0x2d1   :  { %v892_v0 = vmul.f32 %v6159_v15, %v6916_v11  ;;  %1272 = vmatpush.msra.mxu3 %v5985_v55  ;;  %vm897_vm6 = vweird.f32 %v6159_v15  ;;  %v669_v11 = vsub.f32 %v6723_v25, %v6833_v56 }
 0x2d2   :  { %v825_v14 = vadd.f32 %v6157_v49, %v824_v37  ;;  %v5990_v37 = vunpack.i.l.bf16 %v6695_v2  ;;  %vm6949_vm8 = vmor %vm896_vm7, %vm897_vm6  ;;  %v903_v2 = vor.u32 1.1754944e-38, %v902_v7  ;;  %vm901_vm11 = vcmp.eq.f32.partialorder %v900_v21, 8.507059e+37 }
 0x2d3   :  { %v6161_v8 = vpop.eup %6160  ;;  %v893_v18 = vsub.f32 1.0, %v892_v0  ;;  %v872_v0 = vand.u32 2147483647, %v6919_v58 }
 0x2d4   :  { %v829_v59 = vsel %vm828_vm4, %v6157_v49, %v825_v14  ;;  %v864_v3 = vmul.f32 %v6161_v8, %v6919_v58  ;;  %v732_v33 = vpop.xlane.xlu2 %731  ;;  %v874_v49 = vand.u32 2147483648, %v6919_v58  ;;  %vm869_vm9 = vweird.f32 %v6161_v8 }
 0x2d5   :  { %v894_v63 = vmul.f32 %v6159_v15, %v893_v18  ;;  %6162 = vrcp.f32 %v732_v33  ;;  %v834_v55 = vsel %vm831_vm5, %v833_v12, %v829_v59  ;;  %vm870_vm12 = vmor %vm868_vm10, %vm869_vm9  ;;  %vm873_vm13 = vcmp.eq.f32.partialorder %v872_v0, 8.507059e+37 }
 0x2d6   :  { %v865_v6 = vsub.f32 1.0, %v864_v3  ;;  %v980_v1 = vmul.f32 %v6795_v53, %v834_v55  ;;  %v875_v18 = vor.u32 1.1754944e-38, %v874_v49  ;;  %v699_v12 = vmul.f32 1.442695, %v669_v11 }
 0x2d7   :  { %v895_v16 = vadd.f32 %v6159_v15, %v894_v63  ;;  %2886 = vrot.lane.b32.xlu1 %v6505_v28, %s6376_s12  ;;  %v5996_v58 = vunpack.i.h.bf16 %v6737_v52  ;;  %vm882_vm15 = vweird.f32 %v732_v33 }
 0x2d8   :  { %v866_v19 = vmul.f32 %v6161_v8, %v865_v6  ;;  %2970 = vrot.lane.b32.xlu0 %v6517_v34, %s6376_s12  ;;  %5764 = vmatmul.msk.f32.vlgmr.msra.gmra.mxu1 %vm161_vm1, %v980_v1  ;;  %6164 = vpow2.f32 %v699_v12 }
 0x2d9   :  { %v899_v51 = vsel %vm6949_vm8, %v6159_v15, %v895_v16  ;;  %5766 = vmatmul.msk.f32.vlgmr.msrb.gmra.mxu3 %vm161_vm1, %v982_v45  ;;  %1298 = vmatpush.msra.mxu1 %v5990_v37  ;;  %v888_v45 = vand.u32 2147483648, %v732_v33 }
 0x2da   :  { %v867_v53 = vadd.f32 %v6161_v8, %v866_v19  ;;  %1350 = vmatpush.msrb.mxu3 %v5991_v27  ;;  %v904_v25 = vsel %vm901_vm11, %v903_v2, %v899_v51  ;;  %v886_v27 = vand.u32 2147483647, %v732_v33 }
 0x2db   :  { %v6163_v14 = vpop.eup %6162  ;;  %v985_v7 = vmul.f32 %v6802_v61, %v904_v25  ;;  %v889_v61 = vor.u32 1.1754944e-38, %v888_v45 }
 0x2dc   :  { %v871_v59 = vsel %vm870_vm12, %v6161_v8, %v867_v53  ;;  %v878_v56 = vmul.f32 %v6163_v14, %v732_v33  ;;  %vm883_vm14 = vweird.f32 %v6163_v14  ;;  %v670_v8 = vsub.f32 %v6746_v5, %v6819_v29  ;;  %v6978_v29 = vpop.permute.xlu0 %1665 }
 0x2dd   :  { %v876_v15 = vsel %vm873_vm13, %v875_v18, %v871_v59  ;;  %vm884_vm2 = vmor %vm882_vm15, %vm883_vm14  ;;  %vm887_vm3 = vcmp.eq.f32.partialorder %v886_v27, 8.507059e+37  ;;  %v5995_v5 = vunpack.i.l.bf16 %v6737_v52 }
 0x2de   :  { %v879_v3 = vsub.f32 1.0, %v878_v56  ;;  %v983_v63 = vmul.f32 %v6804_v17, %v876_v15  ;;  %v701_v16 = vmul.f32 1.442695, %v670_v8  ;;  %v6975_v1 = vpop.eup %6164 }
 0x2e0   :  { %v880_v6 = vmul.f32 %v6163_v14, %v879_v3  ;;  %2968 = vrot.lane.b32.xlu0 %v6517_v34, %s6375_s11  ;;  %5767 = vmatmul.msk.f32.vlgmr.msrb.gmra.mxu1 %vm161_vm1, %v983_v63  ;;  %6166 = vpow2.f32 %v701_v16  ;;  %v1608_v63 = vpop.permute.xlu2 %1607 }
 0x2e1   :  { %5769 = vmatmul.msk.f32.vlgmr.msra.gmra.mxu3 %vm161_vm1, %v985_v7  ;;  %1376 = vmatpush.msrb.mxu1 %v5996_v58  ;;  %v6993_v19 = vpop.permute.xlu1 %1551 }
 0x2e2   :  { %v881_v17 = vadd.f32 %v6163_v14, %v880_v6  ;;  %5775 = vmatpush.xpose.msk.msra.mxu3 %vm161_vm1, %v6721_v23  ;;  %v745_v23 = vsel %vm161_vm1, %v6975_v1, 0.0 }
 0x2e4   :  { %v885_v55 = vsel %vm884_vm2, %v6163_v14, %v881_v17 }
 0x2e5   :  { %v890_v21 = vsel %vm887_vm3, %v889_v61, %v885_v55 }
 0x2e6   :  { %v984_v49 = vmul.f32 %v6810_v39, %v890_v21  ;;  %v6985_v33 = vpop.eup %6166 }
 0x2e7   :  { %v748_v52 = vsel %vm161_vm1, %v6985_v33, 0.0 }
 0x2e8   :  { %2830 = vrot.lane.b32.xlu0 %v6497_v24, %s6376_s12  ;;  %5768 = vmatmul.msk.f32.vlgmr.msrb.gmra.mxu2 %vm161_vm1, %v984_v49 }
 0x2e9   :  { %1402 = vmatpush.msrb.mxu2 %v5995_v5  ;;  %v7000_v12 = vpop.permute.xlu1 %1637 }
 0x2eb   :  { %746 = vadd.xlane.f32.xlu2 %v745_v23 }
 0x2ef   :  { %v744_v39 = vpop.xlane.xlu0 %743 }
 0x2f0   :  { %6168 = vrcp.f32 %v744_v39  ;;  %3080 = vrot.lane.b32.xlu0 %v6533_v42, %s6375_s11  ;;  %v944_v11 = vand.u32 2147483648, %v744_v39  ;;  %v942_v2 = vand.u32 2147483647, %v744_v39  ;;  %vm938_vm5 = vweird.f32 %v744_v39 }
 0x2f1   :  { %v7016_v45 = vpop.permute.xlu1 %1747 }
 0x2f2   :  { %v945_v14 = vor.u32 1.1754944e-38, %v944_v11  ;;  %vm943_vm7 = vcmp.eq.f32.partialorder %v942_v2, 8.507059e+37 }
 0x2f3   :  { %749 = vadd.xlane.f32.xlu2 %v748_v52 }
 0x2f6   :  { %v6169_v37 = vpop.eup %6168 }
 0x2f7   :  { %v934_v10 = vmul.f32 %v6169_v37, %v744_v39  ;;  %vm939_vm4 = vweird.f32 %v6169_v37 }
 0x2f8   :  { %2942 = vrot.lane.b32.xlu0 %v6513_v32, %s6376_s12  ;;  %vm940_vm6 = vmor %vm938_vm5, %vm939_vm4 }
 0x2f9   :  { %v935_v0 = vsub.f32 1.0, %v934_v10  ;;  %v7028_v27 = vpop.permute.xlu1 %1719 }
 0x2fb   :  { %v936_v51 = vmul.f32 %v6169_v37, %v935_v0 }
 0x2fd   :  { %v937_v53 = vadd.f32 %v6169_v37, %v936_v51 }
 0x2ff   :  { %v941_v18 = vsel %vm940_vm6, %v6169_v37, %v937_v53 }
 0x300   :  { %2802 = vrot.lane.b32.xlu0 %v6493_v22, %s6376_s12  ;;  %v946_v59 = vsel %vm943_vm7, %v945_v14, %v941_v18 }
 0x301   :  { %v988_v56 = vmul.f32 %v6823_v35, %v946_v59  ;;  %v1692_v21 = vpop.permute.xlu1 %1691 }
 0x302   :  { %v6998_v25 = vpop.permute.xlu0 %1663 }
 0x303   :  { %5772 = vmatmul.msk.f32.vlgmr.msrb.gmra.mxu3 %vm161_vm1, %v988_v56 }
 0x304   :  { %5781 = vmatpush.xpose.msk.msrb.mxu3 %vm161_vm1, %v6741_v57 }
 0x308   :  { %3192 = vrot.lane.b32.xlu0 %v6549_v50, %s6375_s11 }
 0x30a   :  { %v7007_v15 = vpop.permute.xlu0 %1635  ;;  %v1014_v3 = vpop.f32.mrf.mxu2 }
 0x30b   :  { %1721 = vrot.lane.b32.xlu2 %v6533_v42, %s6372_s2  ;;  %5776 = vmatmul.msk.f32.vlgmr.msra.gmra.mxu3 %vm161_vm1, %v6733_v43  ;;  %v1407_v35 = vadd.f32 %v1014_v3, %v6493_v22  ;;  %v7046_v3 = vpack.i.bf16 %v6533_v42, %v6497_v24 }
 0x30c   :  { %5787 = vmatpush.xpose.msk.msra.mxu3 %vm161_vm1, %v6888_v20 }
 0x30d   :  { %1423 = vst.msk [vmem:[#allocation2] sm:$0xff] %vm161_vm1, %v1407_v35 }
 0x312   :  { %v7019_v57 = vpop.permute.xlu0 %1833  ;;  %v1040_v7 = vpop.f32.mrf.mxu3 }
 0x313   :  { %1831 = vrot.lane.b32.xlu2 %v6549_v50, %s6373_s9  ;;  %5782 = vmatmul.msk.f32.vlgmr.msrb.gmra.mxu3 %vm161_vm1, %v6731_v41  ;;  %v1408_v43 = vadd.f32 %v1040_v7, %v6497_v24 }
 0x314   :  { %v1066_v58 = vpop.f32.mrf.mxu1 }
 0x315   :  { %v738_v6 = vpop.xlane.xlu2 %737  ;;  %1424 = vst.msk [vmem:[#allocation2 + $0x8] sm:$0xff] %vm161_vm1, %v1408_v43  ;;  %v1409_v20 = vadd.f32 %v1066_v58, %v6501_v26 }
 0x316   :  { %6170 = vrcp.f32 %v738_v6  ;;  %v916_v16 = vand.u32 2147483648, %v738_v6  ;;  %v914_v5 = vand.u32 2147483647, %v738_v6  ;;  %vm910_vm9 = vweird.f32 %v738_v6 }
 0x317   :  { %1425 = vst.msk [vmem:[#allocation2 + $0x10] sm:$0xff] %vm161_vm1, %v1409_v20 }
 0x318   :  { %v917_v0 = vor.u32 1.1754944e-38, %v916_v16  ;;  %vm915_vm11 = vcmp.eq.f32.partialorder %v914_v5, 8.507059e+37 }
 0x31a   :  { %v1694_v8 = vpop.permute.xlu0 %1693 }
 0x31b   :  { %1777 = vrot.lane.b32.xlu2 %v6541_v46, %s6372_s2  ;;  %5788 = vmatmul.msk.f32.vlgmr.msra.gmra.mxu3 %vm161_vm1, %v1608_v63 }
 0x31c   :  { %v6171_v41 = vpop.eup %6170  ;;  %5793 = vmatpush.xpose.msk.msrb.mxu3 %vm161_vm1, %v1694_v8  ;;  %v8896_v8 = vld [vmem:[#allocation17_spill] sm:$0xff] }
 0x31d   :  { %v906_v17 = vmul.f32 %v6171_v41, %v738_v6  ;;  %v741_v61 = vpop.xlane.xlu2 %740  ;;  %vm911_vm8 = vweird.f32 %v6171_v41 }
 0x31e   :  { %6172 = vrcp.f32 %v741_v61  ;;  %vm912_vm10 = vmor %vm910_vm9, %vm911_vm8  ;;  %v930_v18 = vand.u32 2147483648, %v741_v61  ;;  %v928_v56 = vand.u32 2147483647, %v741_v61  ;;  %vm924_vm13 = vweird.f32 %v741_v61 }
 0x31f   :  { %v907_v55 = vsub.f32 1.0, %v906_v17 }
 0x320   :  { %v931_v43 = vor.u32 1.1754944e-38, %v930_v18  ;;  %vm929_vm15 = vcmp.eq.f32.partialorder %v928_v56, 8.507059e+37 }
 0x321   :  { %v908_v49 = vmul.f32 %v6171_v41, %v907_v55 }
 0x322   :  { %v7035_v23 = vpop.permute.xlu0 %1775  ;;  %v1092_v39 = vpop.f32.mrf.mxu2 }
 0x323   :  { %v909_v52 = vadd.f32 %v6171_v41, %v908_v49  ;;  %v1410_v37 = vadd.f32 %v1092_v39, %v6505_v28  ;;  %1803 = vrot.lane.b32.xlu2 %v6545_v48, %s6373_s9  ;;  %5794 = vmatmul.msk.f32.vlgmr.msrb.gmra.mxu3 %vm161_vm1, %v1692_v21 }
 0x324   :  { %v6173_v10 = vpop.eup %6172 }
 0x325   :  { %v913_v11 = vsel %vm912_vm10, %v6171_v41, %v909_v52  ;;  %v920_v51 = vmul.f32 %v6173_v10, %v741_v61  ;;  %1426 = vst.msk [vmem:[#allocation2 + $0x18] sm:$0xff] %vm161_vm1, %v1410_v37  ;;  %vm925_vm12 = vweird.f32 %v6173_v10  ;;  %v7081_v49 = vpop.permute.xlu2 %1749 }
 0x326   :  { %v918_v2 = vsel %vm915_vm11, %v917_v0, %v913_v11  ;;  %vm926_vm14 = vmor %vm924_vm13, %vm925_vm12 }
 0x327   :  { %v921_v53 = vsub.f32 1.0, %v920_v51  ;;  %v986_v14 = vmul.f32 %v6859_v31, %v918_v2 }
 0x329   :  { %v922_v59 = vmul.f32 %v6173_v10, %v921_v53  ;;  %5770 = vmatmul.msk.f32.vlgmr.msra.gmra.mxu1 %vm161_vm1, %v986_v14 }
 0x32a   :  { %5777 = vmatpush.xpose.msk.msra.mxu1 %vm161_vm1, %v6743_v60  ;;  %v7050_v35 = vpop.permute.xlu0 %1861  ;;  %v1170_v63 = vpop.f32.mrf.mxu2  ;;  %v7060_v60 = vpack.i.bf16 %v6549_v50, %v6513_v32 }
 0x32b   :  { %v923_v7 = vadd.f32 %v6173_v10, %v922_v59  ;;  %v1413_v31 = vadd.f32 %v1170_v63, %v6517_v34  ;;  %6003 = vrot.lane.b32.xlu2 %v7046_v3, %s6374_s10 }
 0x32d   :  { %v927_v58 = vsel %vm926_vm14, %v6173_v10, %v923_v7  ;;  %1429 = vst.msk [vmem:[#allocation2 + $0x30] sm:$0xff] %vm161_vm1, %v1413_v31 }
 0x32e   :  { %v932_v6 = vsel %vm929_vm15, %v931_v43, %v927_v58  ;;  %v1806_v43 = vpop.permute.xlu1 %1805 }
 0x32f   :  { %v987_v20 = vmul.f32 %v6874_v47, %v932_v6 }
 0x331   :  { %5771 = vmatmul.msk.f32.vlgmr.msra.gmra.mxu2 %vm161_vm1, %v987_v20 }
 0x332   :  { %5779 = vmatpush.xpose.msk.msra.mxu2 %vm161_vm1, %v8896_v8  ;;  %v7064_v41 = vpop.permute.xlu0 %6013 }
 0x333   :  { %v6016_v17 = vunpack.i.h.bf16 %v7064_v41  ;;  %6008 = vrot.lane.b32.xlu2 %v7060_v60, %s6374_s10 }
 0x335   :  { %2386 = vmatpush.msrb.mxu0 %v6016_v17 }
 0x33a   :  { %v7069_v61 = vpop.permute.xlu0 %6018 }
 0x33b   :  { %2858 = vrot.lane.b32.xlu2 %v6501_v26, %s6376_s12 }
 0x342   :  { %v7073_v47 = vpop.permute.xlu0 %6023 }
 0x343   :  { %8897 = vst [vmem:[#allocation17_spill] sm:$0xff] %v7073_v47  ;;  %v6025_v55 = vunpack.i.l.bf16 %v7073_v47  ;;  %2828 = vrot.lane.b32.xlu2 %v6497_v24, %s6375_s11 }
 0x345   :  { %2490 = vmatpush.msra.mxu0 %v6025_v55 }
 0x34b   :  { %2940 = vrot.lane.b32.xlu2 %v6513_v32, %s6375_s11 }
 0x353   :  { %v1118_v16 = vpop.f32.mrf.mxu3 }
 0x354   :  { %v1411_v21 = vadd.f32 %v1118_v16, %v6509_v30 }
 0x355   :  { %v1144_v5 = vpop.f32.mrf.mxu1 }
 0x356   :  { %1427 = vst.msk [vmem:[#allocation2 + $0x20] sm:$0xff] %vm161_vm1, %v1411_v21  ;;  %v1412_v39 = vadd.f32 %v1144_v5, %v6513_v32 }
 0x358   :  { %1428 = vst.msk [vmem:[#allocation2 + $0x28] sm:$0xff] %vm161_vm1, %v1412_v39 }
 0x35c   :  { %v1196_v52 = vpop.f32.mrf.mxu3 }
 0x35d   :  { %v1414_v37 = vadd.f32 %v1196_v52, %v6521_v36  ;;  %v1222_v10 = vpop.f32.mrf.mxu1 }
 0x35e   :  { %v747_v0 = vpop.xlane.xlu2 %746  ;;  %v1415_v11 = vadd.f32 %v1222_v10, %v6525_v38 }
 0x35f   :  { %1430 = vst.msk [vmem:[#allocation2 + $0x38] sm:$0xff] %vm161_vm1, %v1414_v37  ;;  %6174 = vrcp.f32 %v747_v0  ;;  %v958_v56 = vand.u32 2147483648, %v747_v0  ;;  %v956_v7 = vand.u32 2147483647, %v747_v0  ;;  %vm952_vm3 = vweird.f32 %v747_v0 }
 0x360   :  { %1431 = vst.msk [vmem:[#allocation2 + $0x40] sm:$0xff] %vm161_vm1, %v1415_v11 }
 0x361   :  { %v959_v8 = vor.u32 1.1754944e-38, %v958_v56  ;;  %vm957_vm5 = vcmp.eq.f32.partialorder %v956_v7, 8.507059e+37  ;;  %v8899_v56 = vld [vmem:[#allocation19_spill] sm:$0xff] }
 0x364   :  { %v1274_v51 = vpop.f32.mrf.mxu3 }
 0x365   :  { %v6175_v2 = vpop.eup %6174  ;;  %v1417_v53 = vadd.f32 %v1274_v51, %v6533_v42  ;;  %v1860_v51 = vpop.permute.xlu1 %1859 }
 0x366   :  { %v948_v14 = vmul.f32 %v6175_v2, %v747_v0  ;;  %v750_v18 = vpop.xlane.xlu2 %749  ;;  %vm953_vm2 = vweird.f32 %v6175_v2 }
 0x367   :  { %1433 = vst.msk [vmem:[#allocation2 + $0x50] sm:$0xff] %vm161_vm1, %v1417_v53  ;;  %6176 = vrcp.f32 %v750_v18  ;;  %vm954_vm4 = vmor %vm952_vm3, %vm953_vm2  ;;  %v972_v52 = vand.u32 2147483648, %v750_v18  ;;  %v970_v10 = vand.u32 2147483647, %v750_v18  ;;  %vm966_vm7 = vweird.f32 %v750_v18 }
 0x368   :  { %v949_v59 = vsub.f32 1.0, %v948_v14 }
 0x369   :  { %v973_v11 = vor.u32 1.1754944e-38, %v972_v52  ;;  %vm971_vm9 = vcmp.eq.f32.partialorder %v970_v10, 8.507059e+37 }
 0x36a   :  { %v950_v63 = vmul.f32 %v6175_v2, %v949_v59  ;;  %v8898_v59 = vld [vmem:[#allocation20_spill] sm:$0xff] }
 0x36b   :  { %v1248_v31 = vpop.f32.mrf.mxu2 }
 0x36c   :  { %v951_v58 = vadd.f32 %v6175_v2, %v950_v63  ;;  %v1416_v6 = vadd.f32 %v1248_v31, %v6529_v40  ;;  %v8900_v63 = vld [vmem:[#allocation18_spill] sm:$0xff]  ;;  %v8901_v31 = vld [vmem:[#allocation21_spill] sm:$0xff] }
 0x36d   :  { %v6177_v20 = vpop.eup %6176 }
 0x36e   :  { %v955_v17 = vsel %vm954_vm4, %v6175_v2, %v951_v58  ;;  %v962_v55 = vmul.f32 %v6177_v20, %v750_v18  ;;  %1432 = vst.msk [vmem:[#allocation2 + $0x48] sm:$0xff] %vm161_vm1, %v1416_v6  ;;  %v1722_v16 = vpop.permute.xlu2 %1721  ;;  %vm967_vm6 = vweird.f32 %v6177_v20  ;;  %v5999_v18 = vpop.permute.xlu1 %5998  ;;  %v6015_v6 = vunpack.i.l.bf16 %v7064_v41 }
 0x36f   :  { %v960_v21 = vsel %vm957_vm5, %v959_v8, %v955_v17  ;;  %vm968_vm8 = vmor %vm966_vm7, %vm967_vm6  ;;  %v6021_v8 = vunpack.i.h.bf16 %v7069_v61 }
 0x370   :  { %v963_v5 = vsub.f32 1.0, %v962_v55  ;;  %v989_v39 = vmul.f32 %v6975_v1, %v960_v21 }
 0x372   :  { %v964_v37 = vmul.f32 %v6177_v20, %v963_v5  ;;  %5773 = vmatmul.msk.f32.vlgmr.msrb.gmra.mxu1 %vm161_vm1, %v989_v39  ;;  %v7162_v39 = vpop.permute.xlu0 %2970 }
 0x373   :  { %5783 = vmatpush.xpose.msk.msrb.mxu1 %vm161_vm1, %v6903_v4  ;;  %8902 = vst [vmem:[#allocation20_spill] sm:$0xff] %v7162_v39 }
 0x374   :  { %v965_v0 = vadd.f32 %v6177_v20, %v964_v37 }
 0x376   :  { %v969_v2 = vsel %vm968_vm8, %v6177_v20, %v965_v0  ;;  %v1832_v53 = vpop.permute.xlu2 %1831 }
 0x377   :  { %v974_v14 = vsel %vm971_vm9, %v973_v11, %v969_v2 }
 0x378   :  { %v990_v1 = vmul.f32 %v6985_v33, %v974_v14  ;;  %v6000_v33 = vunpack.i.l.bf16 %v5999_v18 }
 0x37a   :  { %5774 = vmatmul.msk.f32.vlgmr.msrb.gmra.mxu2 %vm161_vm1, %v990_v1  ;;  %5778 = vmatmul.msk.f32.vlgmr.msra.gmra.mxu1 %vm161_vm1, %v8898_v59  ;;  %v7164_v52 = vpop.permute.xlu0 %2968 }
 0x37b   :  { %5785 = vmatpush.xpose.msk.msrb.mxu2 %vm161_vm1, %v8899_v56  ;;  %5789 = vmatpush.xpose.msk.msra.mxu1 %vm161_vm1, %v7000_v12  ;;  %8903 = vst [vmem:[#allocation19_spill] sm:$0xff] %v7164_v52 }
 0x37e   :  { %v1778_v4 = vpop.permute.xlu2 %1777 }
 0x37f   :  { %5799 = vmatpush.xpose.msk.msra.mxu3 %vm161_vm1, %v1778_v4 }
 0x382   :  { %5780 = vmatmul.msk.f32.vlgmr.msra.gmra.mxu2 %vm161_vm1, %v8900_v63  ;;  %5784 = vmatmul.msk.f32.vlgmr.msrb.gmra.mxu1 %vm161_vm1, %v6993_v19  ;;  %v6001_v19 = vunpack.i.h.bf16 %v5999_v18  ;;  %v7166_v37 = vpop.permute.xlu0 %2830 }
 0x383   :  { %5805 = vmatpush.xpose.msk.msrb.mxu3 %vm161_vm1, %v7050_v35  ;;  %5791 = vmatpush.xpose.msk.msra.mxu2 %vm161_vm1, %v6978_v29  ;;  %8904 = vst [vmem:[#allocation18_spill] sm:$0xff] %v7166_v37 }
 0x384   :  { %5795 = vmatpush.xpose.msk.msrb.mxu1 %vm161_vm1, %v1722_v16  ;;  %5800 = vmatmul.msk.f32.vlgmr.msra.gmra.mxu3 %vm161_vm1, %v7035_v23 }
 0x386   :  { %v1352_v12 = vpop.f32.mrf.mxu3  ;;  %v1804_v35 = vpop.permute.xlu2 %1803 }
 0x387   :  { %2360 = vmatpush.msra.mxu3 %v6000_v33  ;;  %v1420_v7 = vadd.f32 %v1352_v12, %v6545_v48 }
 0x389   :  { %1436 = vst.msk [vmem:[#allocation2 + $0x68] sm:$0xff] %vm161_vm1, %v1420_v7 }
 0x38a   :  { %5786 = vmatmul.msk.f32.vlgmr.msrb.gmra.mxu2 %vm161_vm1, %v8901_v31  ;;  %5790 = vmatmul.msk.f32.vlgmr.msra.gmra.mxu1 %vm161_vm1, %v7007_v15  ;;  %v7168_v10 = vpop.permute.xlu0 %3080 }
 0x38b   :  { %5797 = vmatpush.xpose.msk.msrb.mxu2 %vm161_vm1, %v7081_v49  ;;  %5801 = vmatpush.xpose.msk.msra.mxu1 %vm161_vm1, %v1806_v43  ;;  %8905 = vst [vmem:[#allocation21_spill] sm:$0xff] %v7168_v10 }
 0x38c   :  { %5806 = vmatmul.msk.f32.vlgmr.msrb.gmra.mxu3 %vm161_vm1, %v1860_v51 }
 0x38d   :  { %2464 = vmatpush.msrb.mxu3 %v6001_v19 }
 0x38e   :  { %v1464_v29 = vpop.f32.mrf.mxu3  ;;  %v7139_v15 = vpop.permute.xlu2 %6003 }
 0x38f   :  { %v7128_v23 = vmul.f32 0.17677669, %v1464_v29  ;;  %v6005_v20 = vunpack.i.l.bf16 %v7139_v15 }
 0x391   :  { %v1903_v58 = vsel %vm161_vm1, %v7128_v23, -inf }
 0x392   :  { %1904 = vmax.xlane.f32.xlu2 %v1903_v58  ;;  %5792 = vmatmul.msk.f32.vlgmr.msra.gmra.mxu2 %vm161_vm1, %v6998_v25  ;;  %v7172_v51 = vpop.permute.xlu0 %2942 }
 0x393   :  { %5796 = vmatmul.msk.f32.vlgmr.msrb.gmra.mxu1 %vm161_vm1, %v7028_v27  ;;  %5803 = vmatpush.xpose.msk.msra.mxu2 %vm161_vm1, %v7019_v57  ;;  %8906 = vst [vmem:[#allocation22_spill] sm:$0xff] %v7172_v51 }
 0x394   :  { %2308 = vmatpush.msrb.mxu1 %v6015_v6 }
 0x396   :  { %v1548_v49 = vpop.f32.mrf.mxu3  ;;  %v7150_v25 = vpop.permute.xlu2 %6008 }
 0x397   :  { %v7141_v43 = vmul.f32 0.17677669, %v1548_v49  ;;  %v6010_v17 = vunpack.i.l.bf16 %v7150_v25 }
 0x399   :  { %v1912_v41 = vsel %vm161_vm1, %v7141_v43, -inf }
 0x39a   :  { %1913 = vmax.xlane.f32.xlu0 %v1912_v41  ;;  %5798 = vmatmul.msk.f32.vlgmr.msrb.gmra.mxu2 %vm161_vm1, %v7016_v45  ;;  %v7181_v63 = vpop.permute.xlu0 %2802 }
 0x39b   :  { %5802 = vmatmul.msk.f32.vlgmr.msra.gmra.mxu1 %vm161_vm1, %v1804_v35  ;;  %2334 = vmatpush.msrb.mxu2 %v6005_v20 }
 0x39c   :  { %2412 = vmatpush.msra.mxu1 %v6021_v8 }
 0x39e   :  { %v1632_v57 = vpop.f32.mrf.mxu3  ;;  %v7184_v33 = vpop.permute.xlu2 %2858 }
 0x39f   :  { %v7152_v27 = vmul.f32 0.17677669, %v1632_v57 }
 0x3a1   :  { %v1921_v55 = vsel %vm161_vm1, %v7152_v27, -inf }
 0x3a2   :  { %1922 = vmax.xlane.f32.xlu0 %v1921_v55  ;;  %5804 = vmatmul.msk.f32.vlgmr.msra.gmra.mxu2 %vm161_vm1, %v1832_v53  ;;  %v7194_v6 = vpop.permute.xlu0 %3192 }
 0x3a3   :  { %2438 = vmatpush.msra.mxu2 %v6010_v17  ;;  %8907 = vst [vmem:[#allocation23_spill] sm:$0xff] %v7194_v6 }
 0x3a6   :  { %v1300_v16 = vpop.f32.mrf.mxu1  ;;  %v1716_v1 = vpop.f32.mrf.mxu3 }
 0x3a7   :  { %v1418_v45 = vadd.f32 %v1300_v16, %v6537_v44  ;;  %v7178_v56 = vmul.f32 0.17677669, %v1716_v1  ;;  %v7198_v20 = vpop.permute.xlu2 %2828 }
 0x3a8   :  { %8908 = vst [vmem:[#allocation24_spill] sm:$0xff] %v7198_v20 }
 0x3a9   :  { %1434 = vst.msk [vmem:[#allocation2 + $0x58] sm:$0xff] %vm161_vm1, %v1418_v45  ;;  %v1930_v12 = vsel %vm161_vm1, %v7178_v56, -inf }
 0x3b4   :  { %v1326_v21 = vpop.f32.mrf.mxu2 }
 0x3b5   :  { %v1419_v5 = vadd.f32 %v1326_v21, %v6541_v46 }
 0x3b7   :  { %1435 = vst.msk [vmem:[#allocation2 + $0x60] sm:$0xff] %vm161_vm1, %v1419_v5  ;;  %v7210_v5 = vpop.permute.xlu2 %2940 }
 0x3b8   :  { %8909 = vst [vmem:[#allocation25_spill] sm:$0xff] %v7210_v5 }
 0x3ef   :  { %v1378_v0 = vpop.f32.mrf.mxu1 }
 0x3f0   :  { %v1421_v11 = vadd.f32 %v1378_v0, %v6549_v50 }
 0x3f2   :  { %1437 = vst.msk [vmem:[#allocation2 + $0x70] sm:$0xff] %vm161_vm1, %v1421_v11 }
 0x3f7   :  { %v1492_v2 = vpop.f32.mrf.mxu1 }
 0x3f8   :  { %v7174_v53 = vmul.f32 0.17677669, %v1492_v2 }
 0x3fa   :  { %v1906_v14 = vsel %vm161_vm1, %v7174_v53, -inf }
 0x3fb   :  { %1907 = vmax.xlane.f32.xlu1 %v1906_v14 }
 0x3fd   :  { %v1404_v59 = vpop.f32.mrf.mxu2 }
 0x3fe   :  { %v1422_v4 = vadd.f32 %v1404_v59, %v6557_v54 }
 0x3ff   :  { %v1576_v18 = vpop.f32.mrf.mxu1 }
 0x400   :  { %1438 = vst.msk [vmem:[#allocation2 + $0x78] sm:$0xff] %vm161_vm1, %v1422_v4  ;;  %v7200_v41 = vmul.f32 0.17677669, %v1576_v18 }
 0x402   :  { %v1915_v16 = vsel %vm161_vm1, %v7200_v41, -inf }
 0x403   :  { %1931 = vmax.xlane.f32.xlu1 %v1930_v12 }
 0x405   :  { %v1520_v7 = vpop.f32.mrf.mxu2 }
 0x406   :  { %v7188_v35 = vmul.f32 0.17677669, %v1520_v7 }
 0x407   :  { %v1800_v31 = vpop.f32.mrf.mxu3  ;;  %v1660_v19 = vpop.f32.mrf.mxu1 }
 0x408   :  { %v7190_v29 = vmul.f32 0.17677669, %v1800_v31  ;;  %v1909_v58 = vsel %vm161_vm1, %v7188_v35, -inf  ;;  %v7208_v21 = vmul.f32 0.17677669, %v1660_v19  ;;  %v1905_v31 = vpop.xlane.xlu2 %1904 }
 0x409   :  { %1910 = vmax.xlane.f32.xlu2 %v1909_v58 }
 0x40a   :  { %v1939_v49 = vsel %vm161_vm1, %v7190_v29, -inf  ;;  %v1924_v1 = vsel %vm161_vm1, %v7208_v21, -inf }
 0x40b   :  { %1940 = vmax.xlane.f32.xlu1 %v1939_v49 }
 0x40d   :  { %v1604_v8 = vpop.f32.mrf.mxu2  ;;  %v1914_v45 = vpop.xlane.xlu0 %1913 }
 0x40e   :  { %v7202_v57 = vmul.f32 0.17677669, %v1604_v8  ;;  %v1954_v2 = vsub.f32 %v7141_v43, %v1914_v45  ;;  %v1951_v8 = vsub.f32 %v7128_v23, %v1905_v31 }
 0x410   :  { %v1744_v17 = vpop.f32.mrf.mxu1  ;;  %v1918_v55 = vsel %vm161_vm1, %v7202_v57, -inf  ;;  %v1973_v18 = vmul.f32 1.442695, %v1954_v2 }
 0x411   :  { %1919 = vmax.xlane.f32.xlu0 %v1918_v55  ;;  %1916 = vmax.xlane.f32.xlu2 %v1915_v16  ;;  %v7212_v0 = vmul.f32 0.17677669, %v1744_v17  ;;  %v1884_v16 = vpop.f32.mrf.mxu3 }
 0x412   :  { %6178 = vpow2.f32 %v1973_v18 }
 0x413   :  { %v1933_v4 = vsel %vm161_vm1, %v7212_v0, -inf }
 0x415   :  { %v1688_v11 = vpop.f32.mrf.mxu2  ;;  %v1923_v7 = vpop.xlane.xlu0 %1922 }
 0x416   :  { %v7223_v19 = vmul.f32 0.17677669, %v1688_v11  ;;  %v1957_v49 = vsub.f32 %v7152_v27, %v1923_v7  ;;  %v1967_v11 = vmul.f32 1.442695, %v1951_v8 }
 0x418   :  { %v1828_v14 = vpop.f32.mrf.mxu1  ;;  %v1927_v55 = vsel %vm161_vm1, %v7223_v19, -inf  ;;  %v1979_v45 = vmul.f32 1.442695, %v1957_v49  ;;  %v7233_v2 = vpop.eup %6178 }
 0x419   :  { %v7217_v59 = vmul.f32 0.17677669, %v1828_v14  ;;  %1925 = vmax.xlane.f32.xlu0 %v1924_v1  ;;  %1934 = vmax.xlane.f32.xlu2 %v1933_v4  ;;  %v7235_v14 = vmul.f32 0.17677669, %v1884_v16  ;;  %v2008_v23 = vsel %vm161_vm1, %v7233_v2, 0.0  ;;  %v7253_v49 = vpop.permute.xlu1 %2856 }
 0x41a   :  { %6180 = vpow2.f32 %v1979_v45  ;;  %8910 = vst [vmem:[#allocation26_spill] sm:$0xff] %v7253_v49 }
 0x41b   :  { %v1942_v12 = vsel %vm161_vm1, %v7217_v59, -inf  ;;  %6182 = vpow2.f32 %v1967_v11  ;;  %v1948_v18 = vsel %vm161_vm1, %v7235_v14, -inf }
 0x41c   :  { %1943 = vmax.xlane.f32.xlu1 %v1942_v12 }
 0x41d   :  { %v1772_v43 = vpop.f32.mrf.mxu2 }
 0x41e   :  { %v7225_v58 = vmul.f32 0.17677669, %v1772_v43 }
 0x420   :  { %v1936_v17 = vsel %vm161_vm1, %v7225_v58, -inf  ;;  %v7245_v12 = vpop.eup %6180 }
 0x421   :  { %1937 = vmax.xlane.f32.xlu0 %v1936_v17  ;;  %1928 = vmax.xlane.f32.xlu2 %v1927_v55  ;;  %v7247_v7 = vpop.eup %6182  ;;  %v2017_v31 = vsel %vm161_vm1, %v7245_v12, 0.0  ;;  %v7255_v8 = vpop.permute.xlu1 %6028 }
 0x422   :  { %v1999_v43 = vsel %vm161_vm1, %v7247_v7, 0.0 }
 0x425   :  { %v1856_v1 = vpop.f32.mrf.mxu2 }
 0x426   :  { %v7237_v4 = vmul.f32 0.17677669, %v1856_v1 }
 0x428   :  { %v1945_v27 = vsel %vm161_vm1, %v7237_v4, -inf }
 0x429   :  { %2009 = vadd.xlane.f32.xlu0 %v2008_v23  ;;  %1946 = vmax.xlane.f32.xlu1 %v1945_v27  ;;  %v7257_v17 = vpop.permute.xlu1 %3082 }
 0x42a   :  { %1949 = vmax.xlane.f32.xlu2 %v1948_v18  ;;  %8911 = vst [vmem:[#allocation27_spill] sm:$0xff] %v7257_v17 }
 0x431   :  { %2018 = vadd.xlane.f32.xlu1 %v2017_v31  ;;  %v7261_v55 = vpop.permute.xlu1 %6033 }
 0x432   :  { %2000 = vadd.xlane.f32.xlu2 %v1999_v43 }
 0x439   :  { %v7263_v16 = vpop.permute.xlu1 %3194 }
 0x43a   :  { %8912 = vst [vmem:[#allocation28_spill] sm:$0xff] %v7263_v16 }
 0x441   :  { %v7265_v45 = vpop.permute.xlu1 %2886 }
 0x442   :  { %8913 = vst [vmem:[#allocation29_spill] sm:$0xff] %v7265_v45 }
 0x44a   :  { %2800 = vrot.lane.b32.xlu1 %v6493_v22, %s6375_s11 }
 0x46e   :  { %v1908_v11 = vpop.xlane.xlu1 %1907 }
 0x46f   :  { %v1952_v1 = vsub.f32 %v7174_v53, %v1908_v11 }
 0x471   :  { %v1969_v23 = vmul.f32 1.442695, %v1952_v1 }
 0x473   :  { %6184 = vpow2.f32 %v1969_v23 }
 0x476   :  { %v7273_v5 = vpop.xlane.xlu1 %1931 }
 0x479   :  { %v7268_v27 = vpop.eup %6184 }
 0x47a   :  { %v2002_v18 = vsel %vm161_vm1, %v7268_v27, 0.0 }
 0x47b   :  { %2003 = vadd.xlane.f32.xlu2 %v2002_v18 }
 0x47c   :  { %v1911_v31 = vpop.xlane.xlu2 %1910 }
 0x47d   :  { %v1953_v43 = vsub.f32 %v7188_v35, %v1911_v31 }
 0x47e   :  { %v1941_v18 = vpop.xlane.xlu1 %1940 }
 0x47f   :  { %v1971_v50 = vmul.f32 1.442695, %v1953_v43  ;;  %v1963_v43 = vsub.f32 %v7190_v29, %v1941_v18 }
 0x481   :  { %6186 = vpow2.f32 %v1971_v50 }
 0x484   :  { %v7275_v6 = vpop.xlane.xlu0 %1919  ;;  %v1917_v20 = vpop.xlane.xlu2 %1916 }
 0x485   :  { %v1955_v53 = vsub.f32 %v7200_v41, %v1917_v20 }
 0x487   :  { %v7278_v11 = vpop.eup %6186  ;;  %v1975_v1 = vmul.f32 1.442695, %v1955_v53  ;;  %v1991_v53 = vmul.f32 1.442695, %v1963_v43 }
 0x488   :  { %v2005_v23 = vsel %vm161_vm1, %v7278_v11, 0.0 }
 0x489   :  { %6188 = vpow2.f32 %v1975_v1  ;;  %2006 = vadd.xlane.f32.xlu0 %v2005_v23 }
 0x48c   :  { %v1926_v10 = vpop.xlane.xlu0 %1925  ;;  %v1935_v35 = vpop.xlane.xlu2 %1934 }
 0x48d   :  { %v1958_v31 = vsub.f32 %v7208_v21, %v1926_v10  ;;  %v1961_v50 = vsub.f32 %v7212_v0, %v1935_v35 }
 0x48f   :  { %v1981_v51 = vmul.f32 1.442695, %v1958_v31  ;;  %v7285_v16 = vpop.eup %6188  ;;  %v1987_v20 = vmul.f32 1.442695, %v1961_v50  ;;  %v1944_v10 = vpop.xlane.xlu1 %1943 }
 0x490   :  { %v2011_v41 = vsel %vm161_vm1, %v7285_v16, 0.0 }
 0x491   :  { %6190 = vpow2.f32 %v1981_v51  ;;  %2012 = vadd.xlane.f32.xlu0 %v2011_v41  ;;  %v1964_v51 = vsub.f32 %v7217_v59, %v1944_v10 }
 0x492   :  { %6192 = vpow2.f32 %v1987_v20 }
 0x493   :  { %2884 = vrot.lane.b32.xlu2 %v6505_v28, %s6375_s11  ;;  %6194 = vpow2.f32 %v1991_v53  ;;  %v1993_v50 = vmul.f32 1.442695, %v1964_v51 }
 0x494   :  { %v1938_v1 = vpop.xlane.xlu0 %1937  ;;  %v1929_v21 = vpop.xlane.xlu2 %1928 }
 0x495   :  { %v1959_v0 = vsub.f32 %v7223_v19, %v1929_v21  ;;  %v1962_v41 = vsub.f32 %v7225_v58, %v1938_v1 }
 0x497   :  { %v7292_v29 = vpop.eup %6190  ;;  %v1983_v18 = vmul.f32 1.442695, %v1959_v0  ;;  %v1989_v0 = vmul.f32 1.442695, %v1962_v41  ;;  %v1956_v41 = vsub.f32 %v7202_v57, %v7275_v6 }
 0x498   :  { %v7294_v23 = vpop.eup %6192  ;;  %v2020_v35 = vsel %vm161_vm1, %v7292_v29, 0.0 }
 0x499   :  { %v2029_v31 = vsel %vm161_vm1, %v7294_v23, 0.0  ;;  %2021 = vadd.xlane.f32.xlu1 %v2020_v35  ;;  %6196 = vpow2.f32 %v1983_v18  ;;  %v7301_v19 = vpop.eup %6194 }
 0x49a   :  { %2030 = vadd.xlane.f32.xlu0 %v2029_v31  ;;  %v2035_v53 = vsel %vm161_vm1, %v7301_v19, 0.0 }
 0x49c   :  { %v2010_v43 = vpop.xlane.xlu0 %2009  ;;  %v1947_v18 = vpop.xlane.xlu1 %1946 }
 0x49d   :  { %v7303_v20 = vpop.xlane.xlu2 %1949  ;;  %6198 = vrcp.f32 %v2010_v43  ;;  %v2100_v58 = vand.u32 2147483648, %v2010_v43  ;;  %v1965_v37 = vsub.f32 %v7237_v4, %v1947_v18  ;;  %vm2094_vm11 = vweird.f32 %v2010_v43 }
 0x49e   :  { %6200 = vpow2.f32 %v1993_v50  ;;  %v2098_v50 = vand.u32 2147483647, %v2010_v43  ;;  %v1977_v4 = vmul.f32 1.442695, %v1956_v41 }
 0x49f   :  { %v7306_v59 = vpop.eup %6196  ;;  %v2101_v17 = vor.u32 1.1754944e-38, %v2100_v58 }
 0x4a0   :  { %v2023_v10 = vsel %vm161_vm1, %v7306_v59, 0.0  ;;  %vm2099_vm13 = vcmp.eq.f32.partialorder %v2098_v50, 8.507059e+37 }
 0x4a1   :  { %2036 = vadd.xlane.f32.xlu1 %v2035_v53 }
 0x4a2   :  { %2024 = vadd.xlane.f32.xlu0 %v2023_v10 }
 0x4a3   :  { %v6199_v21 = vpop.eup %6198 }
 0x4a4   :  { %v2090_v51 = vmul.f32 %v6199_v21, %v2010_v43  ;;  %v7312_v31 = vpop.eup %6200  ;;  %vm2095_vm10 = vweird.f32 %v6199_v21 }
 0x4a5   :  { %v2001_v35 = vpop.xlane.xlu2 %2000  ;;  %8914 = vst [vmem:[#allocation30_spill] sm:$0xff] %v7312_v31  ;;  %v2038_v53 = vsel %vm161_vm1, %v7312_v31, 0.0  ;;  %vm2096_vm12 = vmor %vm2094_vm11, %vm2095_vm10  ;;  %v6031_v31 = vunpack.i.h.bf16 %v7255_v8 }
 0x4a6   :  { %v2091_v52 = vsub.f32 1.0, %v2090_v51  ;;  %6202 = vrcp.f32 %v2001_v35  ;;  %v2058_v6 = vand.u32 2147483648, %v2001_v35  ;;  %v2056_v43 = vand.u32 2147483647, %v2001_v35 }
 0x4a7   :  { %6204 = vpow2.f32 %v1989_v0  ;;  %v1995_v0 = vmul.f32 1.442695, %v1965_v37  ;;  %vm2052_vm15 = vweird.f32 %v2001_v35 }
 0x4a8   :  { %v2092_v1 = vmul.f32 %v6199_v21, %v2091_v52  ;;  %vm2057_vm3 = vcmp.eq.f32.partialorder %v2056_v43, 8.507059e+37 }
 0x4a9   :  { %6206 = vpow2.f32 %v1995_v0 }
 0x4aa   :  { %v2093_v10 = vadd.f32 %v6199_v21, %v2092_v1  ;;  %2039 = vadd.xlane.f32.xlu0 %v2038_v53  ;;  %6208 = vpow2.f32 %v1977_v4  ;;  %v6030_v1 = vunpack.i.l.bf16 %v7255_v8 }
 0x4ac   :  { %v6203_v51 = vpop.eup %6202  ;;  %v2097_v49 = vsel %vm2096_vm12, %v6199_v21, %v2093_v10  ;;  %v7381_v10 = vpop.xlane.xlu1 %2018 }
 0x4ad   :  { %v7319_v52 = vpop.eup %6204  ;;  %v2048_v47 = vmul.f32 %v6203_v51, %v2001_v35  ;;  %v2102_v39 = vsel %vm2099_vm13, %v2101_v17, %v2097_v49  ;;  %vm2053_vm14 = vweird.f32 %v6203_v51  ;;  %v1960_v49 = vsub.f32 %v7178_v56, %v7273_v5 }
 0x4ae   :  { %v2274_v18 = vmul.f32 %v7233_v2, %v2102_v39  ;;  %v2032_v37 = vsel %vm161_vm1, %v7319_v52, 0.0  ;;  %vm2054_vm2 = vmor %vm2052_vm15, %vm2053_vm14  ;;  %v1966_v5 = vsub.f32 %v7235_v14, %v7303_v20  ;;  %vm2136_vm12 = vweird.f32 %v7381_v10 }
 0x4af   :  { %v2049_v45 = vsub.f32 1.0, %v2048_v47  ;;  %v2059_v47 = vor.u32 1.1754944e-38, %v2058_v6  ;;  %v7328_v17 = vpop.eup %6206 }
 0x4b0   :  { %5810 = vmatmul.msk.f32.vlgmr.msrb.gmra.mxu0 %vm161_vm1, %v2274_v18  ;;  %v7331_v58 = vpop.eup %6208  ;;  %v2041_v56 = vsel %vm161_vm1, %v7328_v17, 0.0  ;;  %v1997_v35 = vmul.f32 1.442695, %v1966_v5 }
 0x4b1   :  { %v2050_v57 = vmul.f32 %v6203_v51, %v2049_v45  ;;  %2594 = vmatpush.msrb.mxu0 %v6031_v31  ;;  %v1985_v45 = vmul.f32 1.442695, %v1960_v49 }
 0x4b2   :  { %2033 = vadd.xlane.f32.xlu0 %v2032_v37 }
 0x4b3   :  { %v2051_v39 = vadd.f32 %v6203_v51, %v2050_v57  ;;  %6210 = vpow2.f32 %v1985_v45  ;;  %v6020_v45 = vunpack.i.l.bf16 %v7069_v61 }
 0x4b4   :  { %6212 = vpow2.f32 %v1997_v35 }
 0x4b5   :  { %v2055_v2 = vsel %vm2054_vm2, %v6203_v51, %v2051_v39 }
 0x4b6   :  { %v2060_v21 = vsel %vm2057_vm3, %v2059_v47, %v2055_v2 }
 0x4b7   :  { %v2271_v31 = vmul.f32 %v7247_v7, %v2060_v21  ;;  %v2014_v7 = vsel %vm161_vm1, %v7331_v58, 0.0 }
 0x4b9   :  { %5807 = vmatmul.msk.f32.vlgmr.msrb.gmra.mxu1 %vm161_vm1, %v2271_v31  ;;  %v7343_v8 = vpop.eup %6210 }
 0x4ba   :  { %2516 = vmatpush.msrb.mxu1 %v6030_v1  ;;  %2042 = vadd.xlane.f32.xlu0 %v2041_v56  ;;  %v2026_v50 = vsel %vm161_vm1, %v7343_v8, 0.0  ;;  %v7349_v14 = vpop.eup %6212 }
 0x4bb   :  { %2914 = vrot.lane.b32.xlu1 %v6509_v30, %s6376_s12  ;;  %v2044_v20 = vsel %vm161_vm1, %v7349_v14, 0.0 }
 0x4bc   :  { %2015 = vadd.xlane.f32.xlu2 %v2014_v7  ;;  %v7401_v1 = vpop.permute.xlu1 %2800 }
 0x4c3   :  { %2912 = vrot.lane.b32.xlu1 %v6509_v30, %s6375_s11 }
 0x4c4   :  { %2027 = vadd.xlane.f32.xlu2 %v2026_v50 }
 0x4cb   :  { %3026 = vrot.lane.b32.xlu1 %v6525_v38, %s6376_s12 }
 0x4cc   :  { %2045 = vadd.xlane.f32.xlu2 %v2044_v20 }
 0x4ce   :  { %3054 = vrot.lane.b32.xlu0 %v6529_v40, %s6376_s12 }
 0x4d3   :  { %3024 = vrot.lane.b32.xlu1 %v6525_v38, %s6375_s11 }
 0x4d6   :  { %3052 = vrot.lane.b32.xlu0 %v6529_v40, %s6375_s11 }
 0x4db   :  { %3222 = vrot.lane.b32.xlu1 %v6557_v54, %s6376_s12 }
 0x4de   :  { %3166 = vrot.lane.b32.xlu0 %v6545_v48, %s6376_s12 }
 0x4e3   :  { %6048 = vrot.lane.b32.xlu1 %v6897_v62, %s6377_s13 }
 0x4e4   :  { %2998 = vrot.lane.b32.xlu2 %v6521_v36, %s6376_s12 }
 0x4e6   :  { %3164 = vrot.lane.b32.xlu0 %v6545_v48, %s6375_s11 }
 0x4eb   :  { %4219 = vrot.lane.b32.xlu1 %v6501_v26, %s6378_s14 }
 0x4ec   :  { %2996 = vrot.lane.b32.xlu2 %v6521_v36, %s6375_s11 }
 0x4ee   :  { %3138 = vrot.lane.b32.xlu0 %v6541_v46, %s6376_s12  ;;  %v2004_v53 = vpop.xlane.xlu2 %2003 }
 0x4ef   :  { %6214 = vrcp.f32 %v2004_v53  ;;  %v2072_v4 = vand.u32 2147483648, %v2004_v53  ;;  %v2070_v6 = vand.u32 2147483647, %v2004_v53  ;;  %vm2066_vm5 = vweird.f32 %v2004_v53 }
 0x4f0   :  { %6216 = vrcp.f32 %v7381_v10 }
 0x4f1   :  { %v2073_v43 = vor.u32 1.1754944e-38, %v2072_v4  ;;  %vm2071_vm7 = vcmp.eq.f32.partialorder %v2070_v6, 8.507059e+37 }
 0x4f3   :  { %4329 = vrot.lane.b32.xlu1 %v6517_v34, %s6379_s15 }
 0x4f4   :  { %3110 = vrot.lane.b32.xlu2 %v6537_v44, %s6376_s12 }
 0x4f5   :  { %v6215_v41 = vpop.eup %6214 }
 0x4f6   :  { %v2062_v51 = vmul.f32 %v6215_v41, %v2004_v53  ;;  %3220 = vrot.lane.b32.xlu0 %v6557_v54, %s6375_s11  ;;  %vm2067_vm4 = vweird.f32 %v6215_v41  ;;  %v7390_v49 = vpop.eup %6216 }
 0x4f7   :  { %vm2068_vm6 = vmor %vm2066_vm5, %vm2067_vm4  ;;  %v2132_v21 = vmul.f32 %v7390_v49, %v7381_v10  ;;  %vm2137_vm10 = vweird.f32 %v7390_v49 }
 0x4f8   :  { %v2063_v0 = vsub.f32 1.0, %v2062_v51  ;;  %vm7437_vm14 = vmor %vm2136_vm12, %vm2137_vm10 }
 0x4f9   :  { %v2133_v56 = vsub.f32 1.0, %v2132_v21 }
 0x4fa   :  { %v2064_v18 = vmul.f32 %v6215_v41, %v2063_v0 }
 0x4fb   :  { %4191 = vrot.lane.b32.xlu1 %v6497_v24, %s6378_s14  ;;  %v2134_v7 = vmul.f32 %v7390_v49, %v2133_v56 }
 0x4fc   :  { %v2065_v57 = vadd.f32 %v6215_v41, %v2064_v18  ;;  %3108 = vrot.lane.b32.xlu2 %v6537_v44, %s6375_s11  ;;  %v2007_v37 = vpop.xlane.xlu0 %2006 }
 0x4fd   :  { %6218 = vrcp.f32 %v2007_v37  ;;  %v2086_v50 = vand.u32 2147483648, %v2007_v37  ;;  %vm2080_vm9 = vweird.f32 %v2007_v37  ;;  %v2084_v53 = vand.u32 2147483647, %v2007_v37 }
 0x4fe   :  { %v2069_v39 = vsel %vm2068_vm6, %v6215_v41, %v2065_v57  ;;  %6038 = vrot.lane.b32.xlu0 %v6871_v13, %s6377_s13  ;;  %v2135_v0 = vadd.f32 %v7390_v49, %v2134_v7  ;;  %v2142_v57 = vand.u32 2147483648, %v7381_v10  ;;  %v7449_v7 = vpack.i.bf16 %v6521_v36, %v6509_v30 }
 0x4ff   :  { %v2074_v47 = vsel %vm2071_vm7, %v2073_v43, %v2069_v39  ;;  %v2087_v43 = vor.u32 1.1754944e-38, %v2086_v50  ;;  %v2140_v39 = vand.u32 2147483647, %v7381_v10  ;;  %vm2085_vm13 = vcmp.eq.f32.partialorder %v2084_v53, 8.507059e+37 }
 0x500   :  { %v2272_v2 = vmul.f32 %v7268_v27, %v2074_v47  ;;  %v2139_v21 = vsel %vm7437_vm14, %v7390_v49, %v2135_v0  ;;  %v2143_v10 = vor.u32 1.1754944e-38, %v2142_v57 }
 0x501   :  { %vm2141_vm2 = vcmp.eq.f32.partialorder %v2140_v39, 8.507059e+37 }
 0x502   :  { %5808 = vmatmul.msk.f32.vlgmr.msrb.gmra.mxu2 %vm161_vm1, %v2272_v2  ;;  %v2144_v51 = vsel %vm2141_vm2, %v2143_v10, %v2139_v21 }
 0x503   :  { %2542 = vmatpush.msrb.mxu2 %v6020_v45  ;;  %4441 = vrot.lane.b32.xlu1 %v6533_v42, %s6379_s15  ;;  %v6219_v31 = vpop.eup %6218 }
 0x504   :  { %3136 = vrot.lane.b32.xlu2 %v6541_v46, %s6375_s11  ;;  %v2076_v5 = vmul.f32 %v6219_v31, %v2007_v37  ;;  %v7405_v27 = vpop.xlane.xlu0 %2012  ;;  %vm2081_vm8 = vweird.f32 %v6219_v31  ;;  %v8917_v37 = vld [vmem:[#allocation16_spill] sm:$0xff] }
 0x505   :  { %6220 = vrcp.f32 %v7405_v27  ;;  %vm7414_vm11 = vmor %vm2080_vm9, %vm2081_vm8  ;;  %vm2108_vm3 = vweird.f32 %v7405_v27  ;;  %v2112_v49 = vand.u32 2147483647, %v7405_v27 }
 0x506   :  { %6053 = vrot.lane.b32.xlu0 %v7060_v60, %s6377_s13  ;;  %v2077_v61 = vsub.f32 1.0, %v2076_v5  ;;  %v6006_v5 = vunpack.i.h.bf16 %v7139_v15 }
 0x507   :  { %vm2113_vm5 = vcmp.eq.f32.partialorder %v2112_v49, 8.507059e+37 }
 0x508   :  { %v2078_v35 = vmul.f32 %v6219_v31, %v2077_v61  ;;  %v2114_v61 = vand.u32 2147483648, %v7405_v27 }
 0x50a   :  { %v2079_v20 = vadd.f32 %v6219_v31, %v2078_v35  ;;  %v2115_v57 = vor.u32 1.1754944e-38, %v2114_v61 }
 0x50b   :  { %4161 = vrot.lane.b32.xlu1 %v6493_v22, %s6379_s15  ;;  %v6221_v41 = vpop.eup %6220 }
 0x50c   :  { %6043 = vrot.lane.b32.xlu2 %v7046_v3, %s6377_s13  ;;  %v7420_v60 = vpop.xlane.xlu1 %2021  ;;  %v2083_v4 = vsel %vm7414_vm11, %v6219_v31, %v2079_v20  ;;  %v2104_v18 = vmul.f32 %v6221_v41, %v7405_v27  ;;  %vm2109_vm15 = vweird.f32 %v6221_v41 }
 0x50d   :  { %v7426_v6 = vpop.xlane.xlu0 %2030  ;;  %6222 = vrcp.f32 %v7420_v60  ;;  %v2088_v45 = vsel %vm2085_vm13, %v2087_v43, %v2083_v4  ;;  %vm7456_vm4 = vmor %vm2108_vm3, %vm2109_vm15  ;;  %v2156_v39 = vand.u32 2147483648, %v7420_v60  ;;  %v2154_v2 = vand.u32 2147483647, %v7420_v60 }
 0x50e   :  { %6224 = vrcp.f32 %v7426_v6  ;;  %6068 = vrot.lane.b32.xlu0 %v8917_v37, %s6377_s13  ;;  %v2105_v47 = vsub.f32 1.0, %v2104_v18  ;;  %v2273_v56 = vmul.f32 %v7278_v11, %v2088_v45  ;;  %v6035_v18 = vunpack.i.l.bf16 %v7261_v55 }
 0x50f   :  { %v2196_v10 = vand.u32 2147483647, %v7426_v6  ;;  %vm2150_vm8 = vweird.f32 %v7420_v60  ;;  %vm2192_vm9 = vweird.f32 %v7426_v6  ;;  %v2157_v11 = vor.u32 1.1754944e-38, %v2156_v39 }
 0x510   :  { %v2106_v31 = vmul.f32 %v6221_v41, %v2105_v47  ;;  %5809 = vmatmul.msk.f32.vlgmr.msra.gmra.mxu3 %vm161_vm1, %v2273_v56  ;;  %vm2155_vm12 = vcmp.eq.f32.partialorder %v2154_v2, 8.507059e+37 }
 0x511   :  { %2568 = vmatpush.msra.mxu3 %v6006_v5  ;;  %v6011_v5 = vunpack.i.h.bf16 %v7150_v25  ;;  %vm2197_vm13 = vcmp.eq.f32.partialorder %v2196_v10, 8.507059e+37 }
 0x512   :  { %v2107_v50 = vadd.f32 %v6221_v41, %v2106_v31  ;;  %v2198_v31 = vand.u32 2147483648, %v7426_v6 }
 0x513   :  { %v6223_v35 = vpop.eup %6222  ;;  %4301 = vrot.lane.b32.xlu1 %v6513_v32, %s6379_s15 }
 0x514   :  { %v6225_v15 = vpop.eup %6224  ;;  %v2146_v20 = vmul.f32 %v6223_v35, %v7420_v60  ;;  %6058 = vrot.lane.b32.xlu2 %v7449_v7, %s6377_s13  ;;  %v7463_v53 = vpop.xlane.xlu1 %2036  ;;  %v2111_v27 = vsel %vm7456_vm4, %v6221_v41, %v2107_v50  ;;  %v2277_v41 = vmul.f32 %v7245_v12, %v2144_v51  ;;  %vm2151_vm6 = vweird.f32 %v6223_v35 }
 0x515   :  { %v2188_v0 = vmul.f32 %v6225_v15, %v7426_v6  ;;  %v7468_v4 = vpop.xlane.xlu0 %2024  ;;  %6226 = vrcp.f32 %v7463_v53  ;;  %v2116_v45 = vsel %vm2113_vm5, %v2115_v57, %v2111_v27  ;;  %vm2193_vm7 = vweird.f32 %v6225_v15  ;;  %vm7486_vm10 = vmor %vm2150_vm8, %vm2151_vm6 }
 0x516   :  { %v2147_v43 = vsub.f32 1.0, %v2146_v20  ;;  %6228 = vrcp.f32 %v7468_v4  ;;  %4443 = vrot.lane.b32.xlu0 %v6533_v42, %s6378_s14  ;;  %v2275_v56 = vmul.f32 %v7285_v16, %v2116_v45  ;;  %vm7493_vm11 = vmor %vm2192_vm9, %vm2193_vm7  ;;  %v2199_v51 = vor.u32 1.1754944e-38, %v2198_v31 }
 0x517   :  { %v2189_v37 = vsub.f32 1.0, %v2188_v0  ;;  %v8926_v0 = vld [vmem:[#allocation15_spill] sm:$0xff]  ;;  %v2170_v2 = vand.u32 2147483648, %v7468_v4  ;;  %v2168_v45 = vand.u32 2147483647, %v7468_v4  ;;  %vm2164_vm15 = vweird.f32 %v7468_v4 }
 0x518   :  { %v2148_v47 = vmul.f32 %v6223_v35, %v2147_v43  ;;  %5811 = vmatmul.msk.f32.vlgmr.msra.gmra.mxu1 %vm161_vm1, %v2275_v56  ;;  %5813 = vmatmul.msk.f32.vlgmr.msrb.gmra.mxu3 %vm161_vm1, %v2277_v41  ;;  %vm2220_vm5 = vweird.f32 %v7463_v53  ;;  %v2224_v10 = vand.u32 2147483647, %v7463_v53 }
 0x519   :  { %v2190_v21 = vmul.f32 %v6225_v15, %v2189_v37  ;;  %2620 = vmatpush.msra.mxu1 %v6035_v18  ;;  %2672 = vmatpush.msrb.mxu3 %v6011_v5  ;;  %vm2169_vm3 = vcmp.eq.f32.partialorder %v2168_v45, 8.507059e+37  ;;  %v2226_v5 = vand.u32 2147483648, %v7463_v53 }
 0x51a   :  { %v2149_v61 = vadd.f32 %v6223_v35, %v2148_v47  ;;  %vm2225_vm7 = vcmp.eq.f32.partialorder %v2224_v10, 8.507059e+37 }
 0x51b   :  { %v7483_v50 = vpop.eup %6226  ;;  %v2191_v12 = vadd.f32 %v6225_v15, %v2190_v21  ;;  %v2227_v49 = vor.u32 1.1754944e-38, %v2226_v5 }
 0x51c   :  { %v6229_v25 = vpop.eup %6228  ;;  %v2153_v60 = vsel %vm7486_vm10, %v6223_v35, %v2149_v61  ;;  %v2216_v6 = vmul.f32 %v7483_v50, %v7463_v53  ;;  %6063 = vrot.lane.b32.xlu2 %v8926_v0, %s6377_s13  ;;  %vm2221_vm4 = vweird.f32 %v7483_v50 }
 0x51d   :  { %v2195_v20 = vsel %vm7493_vm11, %v6225_v15, %v2191_v12  ;;  %v2160_v27 = vmul.f32 %v6229_v25, %v7468_v4  ;;  %v7506_v57 = vpop.xlane.xlu0 %2039  ;;  %v2158_v43 = vsel %vm2155_vm12, %v2157_v11, %v2153_v60  ;;  %v6036_v15 = vunpack.i.h.bf16 %v7261_v55  ;;  %v7527_v4 = vpop.permute.xlu2 %2884  ;;  %vm2222_vm6 = vmor %vm2220_vm5, %vm2221_vm4 }
 0x51e   :  { %v2217_v35 = vsub.f32 1.0, %v2216_v6  ;;  %4163 = vrot.lane.b32.xlu0 %v6493_v22, %s6378_s14  ;;  %v2278_v18 = vmul.f32 %v7292_v29, %v2158_v43  ;;  %v2200_v39 = vsel %vm2197_vm13, %v2199_v51, %v2195_v20  ;;  %vm2165_vm14 = vweird.f32 %v6229_v25 }
 0x51f   :  { %v2161_v37 = vsub.f32 1.0, %v2160_v27  ;;  %v2281_v41 = vmul.f32 %v7294_v23, %v2200_v39  ;;  %vm2166_vm2 = vmor %vm2164_vm15, %vm2165_vm14  ;;  %v2171_v29 = vor.u32 1.1754944e-38, %v2170_v2 }
 0x520   :  { %5814 = vmatmul.msk.f32.vlgmr.msra.gmra.mxu0 %vm161_vm1, %v2278_v18  ;;  %v2218_v21 = vmul.f32 %v7483_v50, %v2217_v35 }
 0x521   :  { %v2162_v47 = vmul.f32 %v6229_v25, %v2161_v37  ;;  %2698 = vmatpush.msra.mxu0 %v6036_v15  ;;  %5817 = vmatmul.msk.f32.vlgmr.msra.gmra.mxu3 %vm161_vm1, %v2281_v41 }
 0x522   :  { %5827 = vmatpush.xpose.msk.msra.mxu3 %vm161_vm1, %v7184_v33  ;;  %v2219_v56 = vadd.f32 %v7483_v50, %v2218_v21 }
 0x523   :  { %v2163_v31 = vadd.f32 %v6229_v25, %v2162_v47 }
 0x524   :  { %4217 = vrot.lane.b32.xlu2 %v6501_v26, %s6379_s15  ;;  %v2223_v12 = vsel %vm2222_vm6, %v7483_v50, %v2219_v56 }
 0x525   :  { %v2167_v55 = vsel %vm2166_vm2, %v6229_v25, %v2163_v31  ;;  %v2034_v23 = vpop.xlane.xlu0 %2033  ;;  %v2228_v53 = vsel %vm2225_vm7, %v2227_v49, %v2223_v12 }
 0x526   :  { %6230 = vrcp.f32 %v2034_v23  ;;  %4245 = vrot.lane.b32.xlu0 %v6505_v28, %s6379_s15  ;;  %v2172_v33 = vsel %vm2169_vm3, %v2171_v29, %v2167_v55  ;;  %v2212_v20 = vand.u32 2147483648, %v2034_v23  ;;  %v2283_v50 = vmul.f32 %v7301_v19, %v2228_v53 }
 0x527   :  { %v2279_v61 = vmul.f32 %v7306_v59, %v2172_v33  ;;  %v2210_v27 = vand.u32 2147483647, %v2034_v23  ;;  %vm2206_vm9 = vweird.f32 %v2034_v23 }
 0x528   :  { %v2213_v43 = vor.u32 1.1754944e-38, %v2212_v20 }
 0x529   :  { %5815 = vmatmul.msk.f32.vlgmr.msrb.gmra.mxu1 %vm161_vm1, %v2279_v61  ;;  %vm2211_vm11 = vcmp.eq.f32.partialorder %v2210_v27, 8.507059e+37 }
 0x52a   :  { %5823 = vmatpush.xpose.msk.msrb.mxu1 %vm161_vm1, %v7181_v63 }
 0x52c   :  { %v6231_v11 = vpop.eup %6230  ;;  %4331 = vrot.lane.b32.xlu2 %v6517_v34, %s6378_s14 }
 0x52d   :  { %v2202_v25 = vmul.f32 %v6231_v11, %v2034_v23  ;;  %v2043_v16 = vpop.xlane.xlu0 %2042  ;;  %v2915_v60 = vpop.permute.xlu1 %2914  ;;  %vm2207_vm8 = vweird.f32 %v6231_v11 }
 0x52e   :  { %6232 = vrcp.f32 %v2043_v16  ;;  %vm2208_vm10 = vmor %vm2206_vm9, %vm2207_vm8  ;;  %v2254_v45 = vand.u32 2147483648, %v2043_v16  ;;  %v2252_v55 = vand.u32 2147483647, %v2043_v16  ;;  %vm2248_vm13 = vweird.f32 %v2043_v16 }
 0x52f   :  { %v2203_v59 = vsub.f32 1.0, %v2202_v25  ;;  %v2016_v6 = vpop.xlane.xlu2 %2015 }
 0x530   :  { %6234 = vrcp.f32 %v2016_v6  ;;  %v2255_v33 = vor.u32 1.1754944e-38, %v2254_v45  ;;  %v2126_v10 = vand.u32 2147483647, %v2016_v6  ;;  %vm2253_vm2 = vcmp.eq.f32.partialorder %v2252_v55, 8.507059e+37 }
 0x531   :  { %v2204_v51 = vmul.f32 %v6231_v11, %v2203_v59  ;;  %5819 = vmatmul.msk.f32.vlgmr.msra.gmra.mxu1 %vm161_vm1, %v2283_v50  ;;  %6236 = vrcp.f32 %v7506_v57  ;;  %vm2122_vm3 = vweird.f32 %v2016_v6 }
 0x532   :  { %5831 = vmatpush.xpose.msk.msra.mxu1 %vm161_vm1, %v2915_v60  ;;  %vm2127_vm5 = vcmp.eq.f32.partialorder %v2126_v10, 8.507059e+37 }
 0x533   :  { %v2205_v63 = vadd.f32 %v6231_v11, %v2204_v51 }
 0x534   :  { %v6233_v0 = vpop.eup %6232  ;;  %6073 = vrot.lane.b32.xlu2 %v6909_v9, %s6377_s13  ;;  %v8927_v9 = vld [vmem:[#allocation29_spill] sm:$0xff] }
 0x535   :  { %v2209_v35 = vsel %vm2208_vm10, %v6231_v11, %v2205_v63  ;;  %v2244_v37 = vmul.f32 %v6233_v0, %v2043_v16  ;;  %v2913_v19 = vpop.permute.xlu1 %2912  ;;  %vm2249_vm12 = vweird.f32 %v6233_v0  ;;  %v8928_v63 = vld [vmem:[#allocation20_spill] sm:$0xff] }
 0x536   :  { %v6235_v18 = vpop.eup %6234  ;;  %v2214_v39 = vsel %vm2211_vm11, %v2213_v43, %v2209_v35  ;;  %vm2250_vm15 = vmor %vm2248_vm13, %vm2249_vm12  ;;  %v8929_v43 = vld [vmem:[#allocation17_spill] sm:$0xff]  ;;  %vm2234_vm11 = vweird.f32 %v7506_v57 }
 0x537   :  { %v2245_v15 = vsub.f32 1.0, %v2244_v37  ;;  %v2118_v41 = vmul.f32 %v6235_v18, %v2016_v6  ;;  %v2028_v47 = vpop.xlane.xlu2 %2027  ;;  %v2282_v2 = vmul.f32 %v7319_v52, %v2214_v39  ;;  %v7546_v21 = vpop.eup %6236  ;;  %vm2123_vm14 = vweird.f32 %v6235_v18 }
 0x538   :  { %6238 = vrcp.f32 %v2028_v47  ;;  %v2128_v52 = vand.u32 2147483648, %v2016_v6  ;;  %v2230_v5 = vmul.f32 %v7546_v21, %v7506_v57  ;;  %vm2124_vm4 = vmor %vm2122_vm3, %vm2123_vm14  ;;  %v2184_v27 = vand.u32 2147483648, %v2028_v47 }
 0x539   :  { %v2246_v31 = vmul.f32 %v6233_v0, %v2245_v15  ;;  %v2119_v29 = vsub.f32 1.0, %v2118_v41  ;;  %5818 = vmatmul.msk.f32.vlgmr.msrb.gmra.mxu0 %vm161_vm1, %v2282_v2  ;;  %5824 = vmatmul.msk.f32.vlgmr.msrb.gmra.mxu1 %vm161_vm1, %v7401_v1  ;;  %v6026_v35 = vunpack.i.h.bf16 %v8929_v43  ;;  %v2182_v37 = vand.u32 2147483647, %v2028_v47 }
 0x53a   :  { %5829 = vmatpush.xpose.msk.msrb.mxu0 %vm161_vm1, %v8927_v9  ;;  %v2129_v16 = vor.u32 1.1754944e-38, %v2128_v52  ;;  %v2231_v20 = vsub.f32 1.0, %v2230_v5  ;;  %vm2178_vm7 = vweird.f32 %v2028_v47  ;;  %v2185_v15 = vor.u32 1.1754944e-38, %v2184_v27 }
 0x53b   :  { %v2247_v23 = vadd.f32 %v6233_v0, %v2246_v31  ;;  %v2120_v56 = vmul.f32 %v6235_v18, %v2119_v29  ;;  %vm2183_vm9 = vcmp.eq.f32.partialorder %v2182_v37, 8.507059e+37  ;;  %vm2235_vm10 = vweird.f32 %v7546_v21 }
 0x53c   :  { %4189 = vrot.lane.b32.xlu2 %v6497_v24, %s6379_s15  ;;  %v2238_v52 = vand.u32 2147483647, %v7506_v57  ;;  %vm7584_vm12 = vmor %vm2234_vm11, %vm2235_vm10 }
 0x53d   :  { %v2251_v61 = vsel %vm2250_vm15, %v6233_v0, %v2247_v23  ;;  %v2121_v12 = vadd.f32 %v6235_v18, %v2120_v56  ;;  %v3027_v1 = vpop.permute.xlu1 %3026  ;;  %v8930_v23 = vld [vmem:[#allocation26_spill] sm:$0xff] }
 0x53e   :  { %v6239_v49 = vpop.eup %6238  ;;  %5839 = vmatpush.xpose.msk.msrb.mxu1 %vm161_vm1, %v3027_v1  ;;  %v2256_v11 = vsel %vm2253_vm2, %v2255_v33, %v2251_v61  ;;  %v8931_v33 = vld [vmem:[#allocation27_spill] sm:$0xff]  ;;  %vm2239_vm15 = vcmp.eq.f32.partialorder %v2238_v52, 8.507059e+37 }
 0x53f   :  { %v2125_v25 = vsel %vm2124_vm4, %v6235_v18, %v2121_v12  ;;  %v2174_v60 = vmul.f32 %v6239_v49, %v2028_v47  ;;  %v2046_v53 = vpop.xlane.xlu2 %2045  ;;  %v2285_v59 = vmul.f32 %v7328_v17, %v2256_v11  ;;  %vm2179_vm6 = vweird.f32 %v6239_v49 }
 0x540   :  { %6240 = vrcp.f32 %v2046_v53  ;;  %v7559_v50 = vpop.permute.xlu0 %3054  ;;  %v2130_v51 = vsel %vm2127_vm5, %v2129_v16, %v2125_v25  ;;  %v2232_v18 = vmul.f32 %v7546_v21, %v2231_v20  ;;  %vm2180_vm8 = vmor %vm2178_vm7, %vm2179_vm6  ;;  %v2240_v47 = vand.u32 2147483648, %v7506_v57  ;;  %v8935_v20 = vld [vmem:[#allocation19_spill] sm:$0xff] }
 0x541   :  { %v2175_v6 = vsub.f32 1.0, %v2174_v60  ;;  %5821 = vmatmul.msk.f32.vlgmr.msrb.gmra.mxu3 %vm161_vm1, %v2285_v59  ;;  %5832 = vmatmul.msk.f32.vlgmr.msra.gmra.mxu1 %vm161_vm1, %v2913_v19  ;;  %v2276_v0 = vmul.f32 %v7331_v58, %v2130_v51  ;;  %v2268_v5 = vand.u32 2147483648, %v2046_v53  ;;  %v2266_v12 = vand.u32 2147483647, %v2046_v53  ;;  %v8937_v51 = vld [vmem:[#allocation30_spill] sm:$0xff] }
 0x542   :  { %5835 = vmatpush.xpose.msk.msrb.mxu3 %vm161_vm1, %v8928_v63  ;;  %v2233_v45 = vadd.f32 %v7546_v21, %v2232_v18  ;;  %v2241_v57 = vor.u32 1.1754944e-38, %v2240_v47  ;;  %vm2262_vm14 = vweird.f32 %v2046_v53 }
 0x543   :  { %v2176_v17 = vmul.f32 %v6239_v49, %v2175_v6  ;;  %5812 = vmatmul.msk.f32.vlgmr.msra.gmra.mxu2 %vm161_vm1, %v2276_v0  ;;  %v2269_v11 = vor.u32 1.1754944e-38, %v2268_v5  ;;  %vm2267_vm3 = vcmp.eq.f32.partialorder %v2266_v12, 8.507059e+37  ;;  %v8936_v6 = vld [vmem:[#allocation28_spill] sm:$0xff]  ;;  %v8938_v0 = vld [vmem:[#allocation22_spill] sm:$0xff]  ;;  %v7636_v5 = vpop.f32.mrf.mxu1 }
 0x544   :  { %2646 = vmatpush.msra.mxu2 %v6026_v35  ;;  %4247 = vrot.lane.b32.xlu2 %v6505_v28, %s6378_s14  ;;  %8943 = vst [vmem:[#allocation16_spill] sm:$0xff] %v7636_v5 }
 0x545   :  { %v2177_v39 = vadd.f32 %v6239_v49, %v2176_v17  ;;  %v3025_v9 = vpop.permute.xlu1 %3024  ;;  %v8939_v17 = vld [vmem:[#allocation21_spill] sm:$0xff] }
 0x546   :  { %v6241_v19 = vpop.eup %6240 }
 0x547   :  { %v2181_v41 = vsel %vm2180_vm8, %v6239_v49, %v2177_v39  ;;  %v2258_v58 = vmul.f32 %v6241_v19, %v2046_v53  ;;  %v2999_v2 = vpop.permute.xlu2 %2998  ;;  %vm2263_vm13 = vweird.f32 %v6241_v19  ;;  %v8934_v49 = vld [vmem:[#allocation18_spill] sm:$0xff] }
 0x548   :  { %v7573_v31 = vpop.permute.xlu0 %3052  ;;  %v2186_v55 = vsel %vm2183_vm9, %v2185_v15, %v2181_v41  ;;  %vm2264_vm2 = vmor %vm2262_vm14, %vm2263_vm13  ;;  %v8941_v15 = vld [vmem:[#allocation23_spill] sm:$0xff] }
 0x549   :  { %v2259_v29 = vsub.f32 1.0, %v2258_v58  ;;  %5828 = vmatmul.msk.f32.vlgmr.msra.gmra.mxu3 %vm161_vm1, %v8930_v23  ;;  %v2280_v56 = vmul.f32 %v7343_v8, %v2186_v55  ;;  %5840 = vmatmul.msk.f32.vlgmr.msrb.gmra.mxu1 %vm161_vm1, %v3025_v9  ;;  %v2237_v8 = vsel %vm7584_vm12, %v7546_v21, %v2233_v45 }
 0x54a   :  { %5843 = vmatpush.xpose.msk.msra.mxu3 %vm161_vm1, %v8931_v33  ;;  %v2242_v60 = vsel %vm2239_vm15, %v2241_v57, %v2237_v8 }
 0x54b   :  { %v2260_v61 = vmul.f32 %v6241_v19, %v2259_v29  ;;  %5816 = vmatmul.msk.f32.vlgmr.msrb.gmra.mxu2 %vm161_vm1, %v2280_v56  ;;  %v2284_v27 = vmul.f32 %v8937_v51, %v2242_v60 }
 0x54c   :  { %5825 = vmatpush.xpose.msk.msrb.mxu2 %vm161_vm1, %v8934_v49  ;;  %4303 = vrot.lane.b32.xlu2 %v6513_v32, %s6378_s14 }
 0x54d   :  { %v2261_v1 = vadd.f32 %v6241_v19, %v2260_v61  ;;  %v3223_v63 = vpop.permute.xlu1 %3222 }
 0x54f   :  { %v2265_v25 = vsel %vm2264_vm2, %v6241_v19, %v2261_v1  ;;  %v2997_v16 = vpop.permute.xlu2 %2996 }
 0x550   :  { %v3167_v59 = vpop.permute.xlu0 %3166  ;;  %v2270_v21 = vsel %vm2267_vm3, %v2269_v11, %v2265_v25  ;;  %v7654_v25 = vpop.f32.mrf.mxu0 }
 0x551   :  { %5836 = vmatmul.msk.f32.vlgmr.msrb.gmra.mxu3 %vm161_vm1, %v8935_v20  ;;  %v2286_v53 = vmul.f32 %v7349_v14, %v2270_v21  ;;  %v8940_v14 = vld [vmem:[#allocation24_spill] sm:$0xff]  ;;  %8950 = vst [vmem:[#allocation18_spill] sm:$0xff] %v7654_v25 }
 0x552   :  { %5851 = vmatpush.xpose.msk.msrb.mxu3 %vm161_vm1, %v8936_v6 }
 0x553   :  { %5822 = vmatmul.msk.f32.vlgmr.msra.gmra.mxu0 %vm161_vm1, %v2286_v53  ;;  %5820 = vmatmul.msk.f32.vlgmr.msra.gmra.mxu2 %vm161_vm1, %v2284_v27 }
 0x554   :  { %5837 = vmatpush.xpose.msk.msra.mxu0 %vm161_vm1, %v2999_v2  ;;  %5833 = vmatpush.xpose.msk.msra.mxu2 %vm161_vm1, %v8938_v0 }
 0x555   :  { %v6049_v37 = vpop.permute.xlu1 %6048 }
 0x556   :  { %v6050_v39 = vunpack.i.l.bf16 %v6049_v37  ;;  %v6051_v58 = vunpack.i.h.bf16 %v6049_v37 }
 0x557   :  { %v3111_v43 = vpop.permute.xlu2 %3110 }
 0x558   :  { %v3165_v35 = vpop.permute.xlu0 %3164 }
 0x559   :  { %5844 = vmatmul.msk.f32.vlgmr.msra.gmra.mxu3 %vm161_vm1, %v8939_v17 }
 0x55b   :  { %5830 = vmatmul.msk.f32.vlgmr.msrb.gmra.mxu0 %vm161_vm1, %v7527_v4  ;;  %5826 = vmatmul.msk.f32.vlgmr.msrb.gmra.mxu2 %vm161_vm1, %v8940_v14  ;;  %v8942_v4 = vld [vmem:[#allocation25_spill] sm:$0xff] }
 0x55c   :  { %5845 = vmatpush.xpose.msk.msrb.mxu0 %vm161_vm1, %v3111_v43  ;;  %5841 = vmatpush.xpose.msk.msrb.mxu2 %vm161_vm1, %v7559_v50 }
 0x55f   :  { %v3109_v18 = vpop.permute.xlu2 %3108 }
 0x560   :  { %v3139_v19 = vpop.permute.xlu0 %3138 }
 0x561   :  { %5847 = vmatpush.xpose.msk.msra.mxu1 %vm161_vm1, %v3139_v19  ;;  %5852 = vmatmul.msk.f32.vlgmr.msrb.gmra.mxu3 %vm161_vm1, %v8941_v15 }
 0x563   :  { %5838 = vmatmul.msk.f32.vlgmr.msra.gmra.mxu0 %vm161_vm1, %v2997_v16  ;;  %5834 = vmatmul.msk.f32.vlgmr.msra.gmra.mxu2 %vm161_vm1, %v8942_v4 }
 0x564   :  { %5853 = vmatpush.xpose.msk.msra.mxu0 %vm161_vm1, %v3223_v63  ;;  %5849 = vmatpush.xpose.msk.msra.mxu2 %vm161_vm1, %v3167_v59 }
 0x565   :  { %3669 = vmatpush.msrb.mxu1 %v6050_v39 }
 0x567   :  { %v3137_v41 = vpop.permute.xlu2 %3136 }
 0x568   :  { %v3221_v50 = vpop.permute.xlu0 %3220  ;;  %5848 = vmatmul.msk.f32.vlgmr.msra.gmra.mxu1 %vm161_vm1, %v3137_v41 }
 0x56b   :  { %5846 = vmatmul.msk.f32.vlgmr.msrb.gmra.mxu0 %vm161_vm1, %v3109_v18  ;;  %5842 = vmatmul.msk.f32.vlgmr.msrb.gmra.mxu2 %vm161_vm1, %v7573_v31 }
 0x56c   :  { %3747 = vmatpush.msrb.mxu0 %v6051_v58 }
 0x56f   :  { %v7628_v2 = vpop.permute.xlu2 %6043 }
 0x570   :  { %v6045_v45 = vunpack.i.l.bf16 %v7628_v2  ;;  %v6039_v55 = vpop.permute.xlu0 %6038 }
 0x571   :  { %v6041_v47 = vunpack.i.h.bf16 %v6039_v55  ;;  %v6040_v29 = vunpack.i.l.bf16 %v6039_v55 }
 0x572   :  { %3695 = vmatpush.msrb.mxu2 %v6045_v45 }
 0x573   :  { %3721 = vmatpush.msra.mxu3 %v6040_v29  ;;  %5854 = vmatmul.msk.f32.vlgmr.msra.gmra.mxu0 %vm161_vm1, %v3221_v50 }
 0x574   :  { %5850 = vmatmul.msk.f32.vlgmr.msra.gmra.mxu2 %vm161_vm1, %v3165_v35 }
 0x575   :  { %3825 = vmatpush.msrb.mxu3 %v6041_v47 }
 0x577   :  { %v6059_v9 = vpop.permute.xlu2 %6058 }
 0x578   :  { %v6061_v23 = vunpack.i.h.bf16 %v6059_v9  ;;  %v6060_v56 = vunpack.i.l.bf16 %v6059_v9  ;;  %v7633_v52 = vpop.permute.xlu0 %6053 }
 0x579   :  { %v6055_v31 = vunpack.i.l.bf16 %v7633_v52 }
 0x57a   :  { %3773 = vmatpush.msra.mxu1 %v6060_v56  ;;  %3851 = vmatpush.msra.mxu0 %v6061_v23 }
 0x57b   :  { %3799 = vmatpush.msra.mxu2 %v6055_v31  ;;  %v7700_v31 = vpop.permute.xlu1 %4219 }
 0x585   :  { %v7656_v16 = vpop.f32.mrf.mxu2 }
 0x586   :  { %8951 = vst [vmem:[#allocation19_spill] sm:$0xff] %v7656_v16 }
 0x593   :  { %v7642_v61 = vpop.f32.mrf.mxu3 }
 0x594   :  { %8946 = vst [vmem:[#allocation20_spill] sm:$0xff] %v7642_v61 }
 0x595   :  { %v7638_v33 = vpop.f32.mrf.mxu1 }
 0x596   :  { %8944 = vst [vmem:[#allocation15_spill] sm:$0xff] %v7638_v33 }
 0x59b   :  { %v7646_v8 = vpop.f32.mrf.mxu3 }
 0x59c   :  { %8948 = vst [vmem:[#allocation26_spill] sm:$0xff] %v7646_v8 }
 0x59d   :  { %v7660_v59 = vpop.f32.mrf.mxu0 }
 0x59e   :  { %8953 = vst [vmem:[#allocation30_spill] sm:$0xff] %v7660_v59 }
 0x5a4   :  { %v7652_v11 = vpop.f32.mrf.mxu3 }
 0x5a5   :  { %8949 = vst [vmem:[#allocation27_spill] sm:$0xff] %v7652_v11 }
 0x5a6   :  { %v7640_v10 = vpop.f32.mrf.mxu1 }
 0x5a7   :  { %8945 = vst [vmem:[#allocation29_spill] sm:$0xff] %v7640_v10 }
 0x5ae   :  { %v7644_v12 = vpop.f32.mrf.mxu1 }
 0x5af   :  { %8947 = vst [vmem:[#allocation17_spill] sm:$0xff] %v7644_v12 }
 0x5b6   :  { %v2825_v57 = vpop.f32.mrf.mxu1  ;;  %v7666_v6 = vpop.f32.mrf.mxu0 }
 0x5b7   :  { %v7648_v1 = vmul.f32 0.17677669, %v2825_v57  ;;  %8955 = vst [vmem:[#allocation21_spill] sm:$0xff] %v7666_v6 }
 0x5b9   :  { %v3264_v49 = vsel %vm161_vm1, %v7648_v1, -inf }
 0x5ba   :  { %3265 = vmax.xlane.f32.xlu1 %v3264_v49 }
 0x5be   :  { %v2937_v15 = vpop.f32.mrf.mxu1 }
 0x5bf   :  { %v7690_v45 = vmul.f32 0.17677669, %v2937_v15 }
 0x5c1   :  { %v3276_v56 = vsel %vm161_vm1, %v7690_v45, -inf }
 0x5c4   :  { %v7658_v60 = vpop.f32.mrf.mxu3 }
 0x5c5   :  { %8952 = vst [vmem:[#allocation28_spill] sm:$0xff] %v7658_v60 }
 0x5c6   :  { %v7662_v21 = vpop.f32.mrf.mxu2  ;;  %v3049_v57 = vpop.f32.mrf.mxu1 }
 0x5c7   :  { %8954 = vst [vmem:[#allocation22_spill] sm:$0xff] %v7662_v21 }
 0x5cc   :  { %v2881_v20 = vpop.f32.mrf.mxu3 }
 0x5cd   :  { %v7664_v53 = vmul.f32 0.17677669, %v2881_v20  ;;  %v7704_v20 = vmul.f32 0.17677669, %v3049_v57 }
 0x5ce   :  { %v7668_v51 = vpop.f32.mrf.mxu2 }
 0x5cf   :  { %8956 = vst [vmem:[#allocation24_spill] sm:$0xff] %v7668_v51  ;;  %v3270_v27 = vsel %vm161_vm1, %v7664_v53, -inf }
 0x5d0   :  { %3271 = vmax.xlane.f32.xlu1 %v3270_v27  ;;  %v7672_v63 = vpop.f32.mrf.mxu0 }
 0x5d1   :  { %8957 = vst [vmem:[#allocation23_spill] sm:$0xff] %v7672_v63 }
 0x5d4   :  { %v2993_v18 = vpop.f32.mrf.mxu3 }
 0x5d5   :  { %v7702_v49 = vmul.f32 0.17677669, %v2993_v18 }
 0x5d6   :  { %v7674_v0 = vpop.f32.mrf.mxu2 }
 0x5d7   :  { %8958 = vst [vmem:[#allocation25_spill] sm:$0xff] %v7674_v0 }
 0x5d8   :  { %v2909_v17 = vpop.f32.mrf.mxu0 }
 0x5d9   :  { %v7680_v37 = vmul.f32 0.17677669, %v2909_v17  ;;  %v3282_v17 = vsel %vm161_vm1, %v7702_v49, -inf }
 0x5db   :  { %v3273_v41 = vsel %vm161_vm1, %v7680_v37, -inf }
 0x5dc   :  { %v3105_v29 = vpop.f32.mrf.mxu3 }
 0x5de   :  { %v2853_v43 = vpop.f32.mrf.mxu2 }
 0x5df   :  { %v7676_v35 = vmul.f32 0.17677669, %v2853_v43 }
 0x5e0   :  { %v3021_v50 = vpop.f32.mrf.mxu0 }
 0x5e1   :  { %v3267_v14 = vsel %vm161_vm1, %v7676_v35, -inf  ;;  %v7688_v58 = vmul.f32 0.17677669, %v3021_v50 }
 0x5e2   :  { %3268 = vmax.xlane.f32.xlu0 %v3267_v14 }
 0x5e3   :  { %v3285_v9 = vsel %vm161_vm1, %v7688_v58, -inf }
 0x5e5   :  { %v3161_v18 = vpop.f32.mrf.mxu1 }
 0x5e6   :  { %v2965_v39 = vpop.f32.mrf.mxu2 }
 0x5e7   :  { %v7682_v19 = vmul.f32 0.17677669, %v2965_v39  ;;  %v3217_v39 = vpop.f32.mrf.mxu3 }
 0x5e8   :  { %v3133_v15 = vpop.f32.mrf.mxu0  ;;  %v7716_v50 = vmul.f32 0.17677669, %v3217_v39 }
 0x5e9   :  { %v3279_v4 = vsel %vm161_vm1, %v7682_v19, -inf }
 0x5ea   :  { %3280 = vmax.xlane.f32.xlu2 %v3279_v4  ;;  %3274 = vmax.xlane.f32.xlu0 %v3273_v41  ;;  %v3288_v4 = vsel %vm161_vm1, %v7704_v20, -inf  ;;  %v7714_v41 = vpop.permute.xlu1 %4329 }
 0x5ee   :  { %v3077_v55 = vpop.f32.mrf.mxu2 }
 0x5ef   :  { %v7692_v47 = vmul.f32 0.17677669, %v3077_v55  ;;  %v7718_v55 = vmul.f32 0.17677669, %v3133_v15 }
 0x5f0   :  { %v3245_v39 = vpop.f32.mrf.mxu0 }
 0x5f1   :  { %v3291_v23 = vsel %vm161_vm1, %v7692_v47, -inf  ;;  %v7734_v15 = vmul.f32 0.17677669, %v3245_v39  ;;  %v7751_v39 = vpop.permute.xlu0 %6068 }
 0x5f2   :  { %3286 = vmax.xlane.f32.xlu2 %v3285_v9  ;;  %3292 = vmax.xlane.f32.xlu1 %v3291_v23  ;;  %v7720_v9 = vmul.f32 0.17677669, %v3161_v18  ;;  %v3297_v23 = vsel %vm161_vm1, %v7718_v55, -inf }
 0x5f3   :  { %3277 = vmax.xlane.f32.xlu0 %v3276_v56  ;;  %v3306_v56 = vsel %vm161_vm1, %v7716_v50, -inf  ;;  %v3309_v18 = vsel %vm161_vm1, %v7734_v15, -inf }
 0x5f4   :  { %v3300_v57 = vsel %vm161_vm1, %v7720_v9, -inf }
 0x5f7   :  { %v3189_v27 = vpop.f32.mrf.mxu2 }
 0x5f8   :  { %v7706_v43 = vmul.f32 0.17677669, %v3189_v27  ;;  %v7728_v27 = vmul.f32 0.17677669, %v3105_v29 }
 0x5f9   :  { %v7757_v34 = vpop.permute.xlu0 %4443 }
 0x5fa   :  { %v3303_v14 = vsel %vm161_vm1, %v7706_v43, -inf  ;;  %3283 = vmax.xlane.f32.xlu2 %v3282_v17  ;;  %v7730_v17 = vpop.permute.xlu1 %4191 }
 0x5fb   :  { %3304 = vmax.xlane.f32.xlu1 %v3303_v14  ;;  %3289 = vmax.xlane.f32.xlu0 %v3288_v4  ;;  %v3294_v14 = vsel %vm161_vm1, %v7728_v27, -inf }
 0x601   :  { %v7763_v63 = vpop.permute.xlu0 %4163 }
 0x602   :  { %3298 = vmax.xlane.f32.xlu2 %v3297_v23  ;;  %v7736_v4 = vpop.permute.xlu1 %4441  ;;  %v7740_v23 = vpop.permute.xlu2 %6063 }
 0x603   :  { %3307 = vmax.xlane.f32.xlu1 %v3306_v56  ;;  %3301 = vmax.xlane.f32.xlu0 %v3300_v57 }
 0x60a   :  { %3295 = vmax.xlane.f32.xlu2 %v3294_v14  ;;  %v7742_v56 = vpop.permute.xlu1 %4161  ;;  %v7744_v29 = vpop.permute.xlu2 %4217 }
 0x612   :  { %3310 = vmax.xlane.f32.xlu2 %v3309_v18  ;;  %v7746_v57 = vpop.permute.xlu1 %4301  ;;  %v7748_v51 = vpop.permute.xlu2 %4331 }
 0x61a   :  { %v7753_v24 = vpop.permute.xlu2 %6073 }
 0x622   :  { %v7761_v33 = vpop.permute.xlu2 %4189 }
 0x62a   :  { %v7765_v25 = vpop.permute.xlu2 %4247 }
 0x62d   :  { %v3266_v28 = vpop.xlane.xlu1 %3265 }
 0x62e   :  { %v3312_v14 = vsub.f32 %v7648_v1, %v3266_v28  ;;  %v7767_v28 = vpop.permute.xlu0 %4245 }
 0x630   :  { %v3328_v26 = vmul.f32 1.442695, %v3312_v14 }
 0x632   :  { %6242 = vpow2.f32 %v3328_v26  ;;  %v7769_v1 = vpop.permute.xlu2 %4303 }
 0x638   :  { %v7755_v18 = vpop.eup %6242 }
 0x639   :  { %v3360_v22 = vsel %vm161_vm1, %v7755_v18, 0.0 }
 0x63a   :  { %3361 = vadd.xlane.f32.xlu2 %v3360_v22 }
 0x643   :  { %v3272_v0 = vpop.xlane.xlu1 %3271 }
 0x644   :  { %v3314_v12 = vsub.f32 %v7664_v53, %v3272_v0 }
 0x646   :  { %v3332_v5 = vmul.f32 1.442695, %v3314_v12 }
 0x655   :  { %v3269_v26 = vpop.xlane.xlu0 %3268 }
 0x656   :  { %v3313_v14 = vsub.f32 %v7676_v35, %v3269_v26 }
 0x658   :  { %v3330_v42 = vmul.f32 1.442695, %v3313_v14 }
 0x65a   :  { %6244 = vpow2.f32 %v3330_v42 }
 0x65d   :  { %v3281_v60 = vpop.xlane.xlu2 %3280  ;;  %v3275_v61 = vpop.xlane.xlu0 %3274 }
 0x65e   :  { %v3315_v22 = vsub.f32 %v7680_v37, %v3275_v61  ;;  %v3317_v26 = vsub.f32 %v7682_v19, %v3281_v60 }
 0x660   :  { %v7773_v16 = vpop.eup %6244  ;;  %v3334_v10 = vmul.f32 1.442695, %v3315_v22 }
 0x661   :  { %v3363_v59 = vsel %vm161_vm1, %v7773_v16, 0.0 }
 0x662   :  { %3364 = vadd.xlane.f32.xlu2 %v3363_v59  ;;  %6246 = vpow2.f32 %v3334_v10  ;;  %v3338_v59 = vmul.f32 1.442695, %v3317_v26 }
 0x663   :  { %6248 = vpow2.f32 %v3332_v5 }
 0x665   :  { %v3287_v8 = vpop.xlane.xlu2 %3286 }
 0x666   :  { %v3278_v35 = vpop.xlane.xlu0 %3277  ;;  %v3319_v61 = vsub.f32 %v7688_v58, %v3287_v8 }
 0x667   :  { %v3316_v42 = vsub.f32 %v7690_v45, %v3278_v35 }
 0x668   :  { %v7780_v14 = vpop.eup %6246  ;;  %v3342_v10 = vmul.f32 1.442695, %v3319_v61 }
 0x669   :  { %v3336_v37 = vmul.f32 1.442695, %v3316_v42  ;;  %v3369_v53 = vsel %vm161_vm1, %v7780_v14, 0.0  ;;  %v7786_v45 = vpop.eup %6248 }
 0x66a   :  { %3370 = vadd.xlane.f32.xlu1 %v3369_v53  ;;  %v3366_v58 = vsel %vm161_vm1, %v7786_v45, 0.0  ;;  %v3293_v53 = vpop.xlane.xlu1 %3292 }
 0x66b   :  { %6250 = vpow2.f32 %v3336_v37 }
 0x66c   :  { %6252 = vpow2.f32 %v3338_v59 }
 0x66d   :  { %v3284_v12 = vpop.xlane.xlu2 %3283  ;;  %6254 = vpow2.f32 %v3342_v10 }
 0x66e   :  { %v3318_v0 = vsub.f32 %v7702_v49, %v3284_v12  ;;  %v3290_v22 = vpop.xlane.xlu0 %3289 }
 0x66f   :  { %v3320_v5 = vsub.f32 %v7704_v20, %v3290_v22 }
 0x670   :  { %v3340_v60 = vmul.f32 1.442695, %v3318_v0 }
 0x671   :  { %v7788_v19 = vpop.eup %6250  ;;  %v3344_v49 = vmul.f32 1.442695, %v3320_v5 }
 0x672   :  { %6256 = vpow2.f32 %v3340_v60  ;;  %v3372_v8 = vsel %vm161_vm1, %v7788_v19, 0.0  ;;  %3367 = vadd.xlane.f32.xlu1 %v3366_v58  ;;  %v7795_v35 = vpop.eup %6252  ;;  %v3305_v5 = vpop.xlane.xlu1 %3304 }
 0x673   :  { %3373 = vadd.xlane.f32.xlu2 %v3372_v8  ;;  %v7797_v26 = vpop.eup %6254  ;;  %6258 = vpow2.f32 %v3344_v49  ;;  %v3375_v59 = vsel %vm161_vm1, %v7795_v35, 0.0 }
 0x674   :  { %v3381_v10 = vsel %vm161_vm1, %v7797_v26, 0.0 }
 0x675   :  { %v3299_v42 = vpop.xlane.xlu2 %3298 }
 0x676   :  { %v3323_v20 = vsub.f32 %v7718_v55, %v3299_v42  ;;  %v3302_v0 = vpop.xlane.xlu0 %3301 }
 0x677   :  { %v3324_v55 = vsub.f32 %v7720_v9, %v3302_v0 }
 0x678   :  { %v7799_v61 = vpop.eup %6256  ;;  %v3350_v12 = vmul.f32 1.442695, %v3323_v20 }
 0x679   :  { %v3378_v37 = vsel %vm161_vm1, %v7799_v61, 0.0  ;;  %v7808_v22 = vpop.eup %6258  ;;  %v3352_v8 = vmul.f32 1.442695, %v3324_v55 }
 0x67a   :  { %3379 = vadd.xlane.f32.xlu0 %v3378_v37  ;;  %3382 = vadd.xlane.f32.xlu1 %v3381_v10  ;;  %6260 = vpow2.f32 %v3350_v12  ;;  %v3384_v60 = vsel %vm161_vm1, %v7808_v22, 0.0 }
 0x67b   :  { %3376 = vadd.xlane.f32.xlu2 %v3375_v59  ;;  %6262 = vpow2.f32 %v3352_v8  ;;  %v3308_v59 = vpop.xlane.xlu1 %3307  ;;  %v3321_v8 = vsub.f32 %v7692_v47, %v3293_v53 }
 0x67c   :  { %v3326_v10 = vsub.f32 %v7716_v50, %v3308_v59 }
 0x67d   :  { %v3296_v58 = vpop.xlane.xlu2 %3295 }
 0x67e   :  { %v3322_v42 = vsub.f32 %v7728_v27, %v3296_v58  ;;  %v3356_v27 = vmul.f32 1.442695, %v3326_v10 }
 0x680   :  { %v7813_v49 = vpop.eup %6260  ;;  %v3348_v37 = vmul.f32 1.442695, %v3322_v42  ;;  %v3346_v42 = vmul.f32 1.442695, %v3321_v8 }
 0x681   :  { %v3393_v20 = vsel %vm161_vm1, %v7813_v49, 0.0  ;;  %v7820_v9 = vpop.eup %6262 }
 0x682   :  { %3385 = vadd.xlane.f32.xlu1 %v3384_v60  ;;  %6264 = vpow2.f32 %v3348_v37  ;;  %v3396_v12 = vsel %vm161_vm1, %v7820_v9, 0.0 }
 0x683   :  { %6266 = vpow2.f32 %v3356_v27 }
 0x684   :  { %6268 = vpow2.f32 %v3346_v42 }
 0x685   :  { %v3311_v58 = vpop.xlane.xlu2 %3310 }
 0x686   :  { %v3327_v10 = vsub.f32 %v7734_v15, %v3311_v58 }
 0x688   :  { %v7827_v0 = vpop.eup %6264 }
 0x689   :  { %v3390_v55 = vsel %vm161_vm1, %v7827_v0, 0.0  ;;  %v7831_v60 = vpop.eup %6266 }
 0x68a   :  { %3394 = vadd.xlane.f32.xlu1 %v3393_v20  ;;  %v3402_v50 = vsel %vm161_vm1, %v7831_v60, 0.0  ;;  %v3325_v20 = vsub.f32 %v7706_v43, %v3305_v5  ;;  %v7838_v27 = vpop.eup %6268 }
 0x68b   :  { %v3387_v47 = vsel %vm161_vm1, %v7838_v27, 0.0 }
 0x68c   :  { %v3354_v59 = vmul.f32 1.442695, %v3325_v20 }
 0x68e   :  { %4275 = vrot.lane.b32.xlu0 %v6509_v30, %s6378_s14 }
 0x692   :  { %3397 = vadd.xlane.f32.xlu1 %v3396_v12  ;;  %v3358_v12 = vmul.f32 1.442695, %v3327_v10 }
 0x693   :  { %4359 = vrot.lane.b32.xlu2 %v6521_v36, %s6378_s14 }
 0x69a   :  { %3391 = vadd.xlane.f32.xlu1 %v3390_v55 }
 0x6a2   :  { %3403 = vadd.xlane.f32.xlu1 %v3402_v50 }
 0x6ad   :  { %v3362_v37 = vpop.xlane.xlu2 %3361 }
 0x6ae   :  { %6270 = vrcp.f32 %v3362_v37  ;;  %v3419_v43 = vand.u32 2147483648, %v3362_v37  ;;  %v3417_v8 = vand.u32 2147483647, %v3362_v37  ;;  %vm3413_vm5 = vweird.f32 %v3362_v37 }
 0x6af   :  { %6272 = vpow2.f32 %v3354_v59 }
 0x6b0   :  { %6274 = vpow2.f32 %v3358_v12  ;;  %v3420_v20 = vor.u32 1.1754944e-38, %v3419_v43  ;;  %vm3418_vm7 = vcmp.eq.f32.partialorder %v3417_v8, 8.507059e+37 }
 0x6b4   :  { %v6271_v55 = vpop.eup %6270 }
 0x6b5   :  { %v3409_v6 = vmul.f32 %v6271_v55, %v3362_v37  ;;  %v7842_v53 = vpop.eup %6272  ;;  %vm3414_vm4 = vweird.f32 %v6271_v55  ;;  %v6066_v37 = vunpack.i.h.bf16 %v7740_v23 }
 0x6b6   :  { %v3399_v58 = vsel %vm161_vm1, %v7842_v53, 0.0  ;;  %v7846_v42 = vpop.eup %6274  ;;  %vm3415_vm6 = vmor %vm3413_vm5, %vm3414_vm4 }
 0x6b7   :  { %v3410_v50 = vsub.f32 1.0, %v3409_v6  ;;  %v3405_v10 = vsel %vm161_vm1, %v7846_v42, 0.0 }
 0x6b8   :  { %3388 = vadd.xlane.f32.xlu0 %v3387_v47 }
 0x6b9   :  { %v3411_v5 = vmul.f32 %v6271_v55, %v3410_v50  ;;  %v8959_v50 = vld [vmem:[#allocation13_spill] sm:$0xff] }
 0x6bb   :  { %v3412_v15 = vadd.f32 %v6271_v55, %v3411_v5  ;;  %4273 = vrot.lane.b32.xlu1 %v6509_v30, %s6379_s15  ;;  %v6065_v30 = vunpack.i.l.bf16 %v7740_v23 }
 0x6bc   :  { %3400 = vadd.xlane.f32.xlu2 %v3399_v58 }
 0x6bd   :  { %v3416_v6 = vsel %vm3415_vm6, %v6271_v55, %v3412_v15 }
 0x6be   :  { %v3421_v59 = vsel %vm3418_vm7, %v3420_v20, %v3416_v6 }
 0x6bf   :  { %v3632_v12 = vmul.f32 %v7755_v18, %v3421_v59 }
 0x6c0   :  { %3406 = vadd.xlane.f32.xlu0 %v3405_v10 }
 0x6c1   :  { %5855 = vmatmul.msk.f32.vlgmr.msrb.gmra.mxu1 %vm161_vm1, %v3632_v12 }
 0x6c2   :  { %3877 = vmatpush.msrb.mxu1 %v6066_v37 }
 0x6c3   :  { %4413 = vrot.lane.b32.xlu1 %v6529_v40, %s6379_s15 }
 0x6cb   :  { %4385 = vrot.lane.b32.xlu1 %v6525_v38, %s6379_s15 }
 0x6d3   :  { %4525 = vrot.lane.b32.xlu1 %v6545_v48, %s6379_s15 }
 0x6d4   :  { %4415 = vrot.lane.b32.xlu2 %v6529_v40, %s6378_s14  ;;  %4357 = vrot.lane.b32.xlu0 %v6521_v36, %s6379_s15 }
 0x6d5   :  { %v3365_v18 = vpop.xlane.xlu2 %3364 }
 0x6d6   :  { %6276 = vrcp.f32 %v3365_v18  ;;  %v3433_v8 = vand.u32 2147483648, %v3365_v18  ;;  %v3431_v58 = vand.u32 2147483647, %v3365_v18  ;;  %vm3427_vm9 = vweird.f32 %v3365_v18 }
 0x6d8   :  { %v3434_v6 = vor.u32 1.1754944e-38, %v3433_v8  ;;  %vm3432_vm11 = vcmp.eq.f32.partialorder %v3431_v58, 8.507059e+37 }
 0x6db   :  { %4555 = vrot.lane.b32.xlu1 %v8959_v50, %s6378_s14 }
 0x6dc   :  { %v6277_v55 = vpop.eup %6276  ;;  %4471 = vrot.lane.b32.xlu2 %v6537_v44, %s6378_s14  ;;  %4387 = vrot.lane.b32.xlu0 %v6525_v38, %s6378_s14 }
 0x6dd   :  { %v3423_v47 = vmul.f32 %v6277_v55, %v3365_v18  ;;  %v3371_v43 = vpop.xlane.xlu1 %3370  ;;  %vm3428_vm8 = vweird.f32 %v6277_v55 }
 0x6de   :  { %6278 = vrcp.f32 %v3371_v43  ;;  %vm3429_vm10 = vmor %vm3427_vm9, %vm3428_vm8  ;;  %v3461_v8 = vand.u32 2147483648, %v3371_v43  ;;  %v3459_v21 = vand.u32 2147483647, %v3371_v43  ;;  %vm3455_vm13 = vweird.f32 %v3371_v43 }
 0x6df   :  { %v3424_v5 = vsub.f32 1.0, %v3423_v47 }
 0x6e0   :  { %vm3460_vm15 = vcmp.eq.f32.partialorder %v3459_v21, 8.507059e+37 }
 0x6e1   :  { %v3425_v15 = vmul.f32 %v6277_v55, %v3424_v5 }
 0x6e3   :  { %v3426_v20 = vadd.f32 %v6277_v55, %v3425_v15  ;;  %4581 = vrot.lane.b32.xlu1 %v6557_v54, %s6379_s15 }
 0x6e4   :  { %4527 = vrot.lane.b32.xlu2 %v6545_v48, %s6378_s14  ;;  %v6279_v59 = vpop.eup %6278  ;;  %4469 = vrot.lane.b32.xlu0 %v6537_v44, %s6379_s15 }
 0x6e5   :  { %v3430_v10 = vsel %vm3429_vm10, %v6277_v55, %v3426_v20  ;;  %v3451_v37 = vmul.f32 %v6279_v59, %v3371_v43  ;;  %v3368_v5 = vpop.xlane.xlu1 %3367  ;;  %vm3456_vm12 = vweird.f32 %v6279_v59  ;;  %v3462_v20 = vor.u32 1.1754944e-38, %v3461_v8 }
 0x6e6   :  { %v3435_v12 = vsel %vm3432_vm11, %v3434_v6, %v3430_v10  ;;  %v3374_v47 = vpop.xlane.xlu2 %3373  ;;  %vm3457_vm14 = vmor %vm3455_vm13, %vm3456_vm12  ;;  %vm3441_vm5 = vweird.f32 %v3368_v5 }
 0x6e7   :  { %6280 = vrcp.f32 %v3374_v47  ;;  %v3452_v18 = vsub.f32 1.0, %v3451_v37  ;;  %v3633_v15 = vmul.f32 %v7773_v16, %v3435_v12  ;;  %v6070_v37 = vunpack.i.l.bf16 %v7751_v39 }
 0x6e8   :  { %6282 = vrcp.f32 %v3368_v5  ;;  %v3475_v11 = vand.u32 2147483648, %v3374_v47  ;;  %vm3469_vm4 = vweird.f32 %v3374_v47 }
 0x6e9   :  { %v3453_v36 = vmul.f32 %v6279_v59, %v3452_v18  ;;  %5856 = vmatmul.msk.f32.vlgmr.msrb.gmra.mxu2 %vm161_vm1, %v3633_v15  ;;  %v3473_v15 = vand.u32 2147483647, %v3374_v47 }
 0x6ea   :  { %3903 = vmatpush.msrb.mxu2 %v6065_v30 }
 0x6eb   :  { %v3454_v55 = vadd.f32 %v6279_v59, %v3453_v36  ;;  %vm3474_vm7 = vcmp.eq.f32.partialorder %v3473_v15, 8.507059e+37 }
 0x6ec   :  { %4497 = vrot.lane.b32.xlu2 %v6541_v46, %s6379_s15  ;;  %4499 = vrot.lane.b32.xlu0 %v6541_v46, %s6378_s14  ;;  %v6046_v46 = vunpack.i.h.bf16 %v7628_v2 }
 0x6ed   :  { %v6281_v58 = vpop.eup %6280  ;;  %v7884_v16 = vpop.xlane.xlu0 %3379  ;;  %v3458_v6 = vsel %vm3457_vm14, %v6279_v59, %v3454_v55  ;;  %v3445_v59 = vand.u32 2147483647, %v3368_v5  ;;  %v3447_v55 = vand.u32 2147483648, %v3368_v5 }
 0x6ee   :  { %v6283_v23 = vpop.eup %6282  ;;  %v3465_v10 = vmul.f32 %v6281_v58, %v3374_v47  ;;  %6284 = vrcp.f32 %v7884_v16  ;;  %v7887_v36 = vpop.xlane.xlu2 %3376  ;;  %v3463_v43 = vsel %vm3460_vm15, %v3462_v20, %v3458_v6  ;;  %vm3470_vm2 = vweird.f32 %v6281_v58 }
 0x6ef   :  { %v7889_v30 = vpop.xlane.xlu1 %3382  ;;  %v3437_v12 = vmul.f32 %v6283_v23, %v3368_v5  ;;  %v3635_v18 = vmul.f32 %v7780_v14, %v3463_v43  ;;  %6286 = vrcp.f32 %v7887_v36  ;;  %vm3442_vm3 = vweird.f32 %v6283_v23  ;;  %vm3471_vm6 = vmor %vm3469_vm4, %vm3470_vm2 }
 0x6f0   :  { %v3466_v8 = vsub.f32 1.0, %v3465_v10  ;;  %6288 = vrcp.f32 %v7889_v30  ;;  %v6075_v6 = vunpack.i.l.bf16 %v7753_v24  ;;  %v3476_v43 = vor.u32 1.1754944e-38, %v3475_v11  ;;  %vm3443_vm8 = vmor %vm3441_vm5, %vm3442_vm3 }
 0x6f1   :  { %v3438_v48 = vsub.f32 1.0, %v3437_v12  ;;  %5858 = vmatmul.msk.f32.vlgmr.msrb.gmra.mxu0 %vm161_vm1, %v3635_v18  ;;  %vm3446_vm9 = vcmp.eq.f32.partialorder %v3445_v59, 8.507059e+37  ;;  %v3503_v47 = vand.u32 2147483648, %v7884_v16  ;;  %vm3497_vm10 = vweird.f32 %v7884_v16 }
 0x6f2   :  { %v3467_v21 = vmul.f32 %v6281_v58, %v3466_v8  ;;  %3955 = vmatpush.msrb.mxu0 %v6070_v37  ;;  %v3448_v37 = vor.u32 1.1754944e-38, %v3447_v55  ;;  %v3501_v55 = vand.u32 2147483647, %v7884_v16  ;;  %vm3483_vm12 = vweird.f32 %v7887_v36 }
 0x6f3   :  { %v3439_v20 = vmul.f32 %v6283_v23, %v3438_v48  ;;  %vm3511_vm5 = vweird.f32 %v7889_v30 }
 0x6f4   :  { %v6285_v14 = vpop.eup %6284  ;;  %v3468_v10 = vadd.f32 %v6281_v58, %v3467_v21  ;;  %4583 = vrot.lane.b32.xlu2 %v6557_v54, %s6378_s14  ;;  %4553 = vrot.lane.b32.xlu0 %v8959_v50, %s6379_s15  ;;  %v3487_v54 = vand.u32 2147483647, %v7887_v36  ;;  %vm3502_vm15 = vcmp.eq.f32.partialorder %v3501_v55, 8.507059e+37 }
 0x6f5   :  { %v3440_v12 = vadd.f32 %v6283_v23, %v3439_v20  ;;  %v3493_v48 = vmul.f32 %v6285_v14, %v7884_v16  ;;  %v6287_v18 = vpop.eup %6286  ;;  %vm3498_vm11 = vweird.f32 %v6285_v14 }
 0x6f6   :  { %v3472_v2 = vsel %vm3471_vm6, %v6281_v58, %v3468_v10  ;;  %v3479_v58 = vmul.f32 %v6287_v18, %v7887_v36  ;;  %v6289_v10 = vpop.eup %6288  ;;  %vm3499_vm13 = vmor %vm3497_vm10, %vm3498_vm11  ;;  %vm3484_vm14 = vweird.f32 %v6287_v18  ;;  %vm7926_vm2 = vcmp.eq.f32.partialorder %v3487_v54, 8.507059e+37 }
 0x6f7   :  { %v7906_v5 = vpop.xlane.xlu1 %3385  ;;  %v3477_v8 = vsel %vm3474_vm7, %v3476_v43, %v3472_v2  ;;  %v3444_v21 = vsel %vm3443_vm8, %v6283_v23, %v3440_v12  ;;  %v3494_v15 = vsub.f32 1.0, %v3493_v48  ;;  %v3507_v23 = vmul.f32 %v6289_v10, %v7889_v30  ;;  %vm3485_vm4 = vmor %vm3483_vm12, %vm3484_vm14 }
 0x6f8   :  { %6290 = vrcp.f32 %v7906_v5  ;;  %v3636_v11 = vmul.f32 %v7788_v19, %v3477_v8  ;;  %v3449_v20 = vsel %vm3446_vm9, %v3448_v37, %v3444_v21  ;;  %v3480_v50 = vsub.f32 1.0, %v3479_v58 }
 0x6f9   :  { %v3495_v59 = vmul.f32 %v6285_v14, %v3494_v15  ;;  %v3634_v43 = vmul.f32 %v7786_v45, %v3449_v20  ;;  %v3504_v12 = vor.u32 1.1754944e-38, %v3503_v47  ;;  %v3489_v48 = vand.u32 2147483648, %v7887_v36 }
 0x6fa   :  { %5859 = vmatmul.msk.f32.vlgmr.msra.gmra.mxu1 %vm161_vm1, %v3636_v11  ;;  %v3515_v2 = vand.u32 2147483647, %v7889_v30  ;;  %v3481_v37 = vmul.f32 %v6287_v18, %v3480_v50  ;;  %v3508_v8 = vsub.f32 1.0, %v3507_v23  ;;  %v3517_v21 = vand.u32 2147483648, %v7889_v30 }
 0x6fb   :  { %v3496_v19 = vadd.f32 %v6285_v14, %v3495_v59  ;;  %3981 = vmatpush.msra.mxu1 %v6075_v6  ;;  %5857 = vmatmul.msk.f32.vlgmr.msra.gmra.mxu3 %vm161_vm1, %v3634_v43  ;;  %vm3512_vm3 = vweird.f32 %v6289_v10  ;;  %v3529_v36 = vand.u32 2147483647, %v7906_v5  ;;  %v3531_v23 = vand.u32 2147483648, %v7906_v5 }
 0x6fc   :  { %6078 = vrot.lane.b32.xlu2 %v6871_v13, %s6380_s16  ;;  %3929 = vmatpush.msra.mxu3 %v6046_v46  ;;  %v3482_v16 = vadd.f32 %v6287_v18, %v3481_v37  ;;  %v3509_v6 = vmul.f32 %v6289_v10, %v3508_v8  ;;  %v3490_v13 = vor.u32 1.1754944e-38, %v3489_v48  ;;  %vm7935_vm6 = vcmp.eq.f32.partialorder %v3515_v2, 8.507059e+37  ;;  %vm3513_vm7 = vmor %vm3511_vm5, %vm3512_vm3 }
 0x6fd   :  { %v3500_v47 = vsel %vm3499_vm13, %v6285_v14, %v3496_v19  ;;  %v3518_v58 = vor.u32 1.1754944e-38, %v3517_v21  ;;  %v6071_v48 = vunpack.i.h.bf16 %v7751_v39  ;;  %vm3525_vm9 = vweird.f32 %v7906_v5 }
 0x6fe   :  { %v6291_v45 = vpop.eup %6290  ;;  %v3505_v50 = vsel %vm3502_vm15, %v3504_v12, %v3500_v47  ;;  %v3486_v14 = vsel %vm3485_vm4, %v6287_v18, %v3482_v16  ;;  %v3510_v46 = vadd.f32 %v6289_v10, %v3509_v6  ;;  %v6056_v18 = vunpack.i.h.bf16 %v7633_v52 }
 0x6ff   :  { %v3521_v11 = vmul.f32 %v6291_v45, %v7906_v5  ;;  %v3395_v20 = vpop.xlane.xlu1 %3394  ;;  %v3491_v55 = vsel %vm7926_vm2, %v3490_v13, %v3486_v14  ;;  %v3638_v30 = vmul.f32 %v7799_v61, %v3505_v50  ;;  %vm3526_vm8 = vweird.f32 %v6291_v45 }
 0x700   :  { %6292 = vrcp.f32 %v3395_v20  ;;  %v3637_v43 = vmul.f32 %v7795_v35, %v3491_v55  ;;  %v3514_v19 = vsel %vm3513_vm7, %v6289_v10, %v3510_v46  ;;  %v6076_v61 = vunpack.i.h.bf16 %v7753_v24  ;;  %vm3527_vm10 = vmor %vm3525_vm9, %vm3526_vm8 }
 0x701   :  { %v3522_v59 = vsub.f32 1.0, %v3521_v11  ;;  %v3519_v2 = vsel %vm7935_vm6, %v3518_v58, %v3514_v19  ;;  %v3532_v10 = vor.u32 1.1754944e-38, %v3531_v23  ;;  %vm3530_vm11 = vcmp.eq.f32.partialorder %v3529_v36, 8.507059e+37 }
 0x702   :  { %v3639_v37 = vmul.f32 %v7797_v26, %v3519_v2  ;;  %5860 = vmatmul.msk.f32.vlgmr.msra.gmra.mxu2 %vm161_vm1, %v3637_v43  ;;  %v3573_v15 = vand.u32 2147483648, %v3395_v20  ;;  %v3571_v24 = vand.u32 2147483647, %v3395_v20  ;;  %vm3567_vm13 = vweird.f32 %v3395_v20 }
 0x703   :  { %v3523_v12 = vmul.f32 %v6291_v45, %v3522_v59  ;;  %5861 = vmatmul.msk.f32.vlgmr.msrb.gmra.mxu3 %vm161_vm1, %v3638_v30  ;;  %4007 = vmatpush.msra.mxu2 %v6071_v48  ;;  %v4276_v48 = vpop.permute.xlu0 %4275 }
 0x704   :  { %4033 = vmatpush.msrb.mxu3 %v6056_v18  ;;  %5862 = vmatmul.msk.f32.vlgmr.msra.gmra.mxu0 %vm161_vm1, %v3639_v37  ;;  %v3574_v6 = vor.u32 1.1754944e-38, %v3573_v15  ;;  %vm3572_vm15 = vcmp.eq.f32.partialorder %v3571_v24, 8.507059e+37 }
 0x705   :  { %v3524_v8 = vadd.f32 %v6291_v45, %v3523_v12  ;;  %4059 = vmatpush.msra.mxu0 %v6076_v61 }
 0x706   :  { %v6293_v35 = vpop.eup %6292 }
 0x707   :  { %v3528_v52 = vsel %vm3527_vm10, %v6291_v45, %v3524_v8  ;;  %v3563_v39 = vmul.f32 %v6293_v35, %v3395_v20  ;;  %v3398_v26 = vpop.xlane.xlu1 %3397  ;;  %vm3568_vm12 = vweird.f32 %v6293_v35 }
 0x708   :  { %v3533_v21 = vsel %vm3530_vm11, %v3532_v10, %v3528_v52  ;;  %6294 = vrcp.f32 %v3398_v26  ;;  %vm3569_vm14 = vmor %vm3567_vm13, %vm3568_vm12  ;;  %v3587_v58 = vand.u32 2147483648, %v3398_v26  ;;  %v3585_v55 = vand.u32 2147483647, %v3398_v26 }
 0x709   :  { %v3640_v5 = vmul.f32 %v7808_v22, %v3533_v21  ;;  %v3564_v47 = vsub.f32 1.0, %v3563_v39  ;;  %vm3581_vm3 = vweird.f32 %v3398_v26 }
 0x70a   :  { %v3588_v36 = vor.u32 1.1754944e-38, %v3587_v58  ;;  %vm3586_vm5 = vcmp.eq.f32.partialorder %v3585_v55, 8.507059e+37 }
 0x70b   :  { %v3565_v50 = vmul.f32 %v6293_v35, %v3564_v47  ;;  %5863 = vmatmul.msk.f32.vlgmr.msrb.gmra.mxu1 %vm161_vm1, %v3640_v5 }
 0x70c   :  { %5871 = vmatpush.xpose.msk.msrb.mxu1 %vm161_vm1, %v7763_v63 }
 0x70d   :  { %v3566_v45 = vadd.f32 %v6293_v35, %v3565_v50 }
 0x70e   :  { %v6295_v16 = vpop.eup %6294 }
 0x70f   :  { %v3570_v11 = vsel %vm3569_vm14, %v6293_v35, %v3566_v45  ;;  %v3577_v13 = vmul.f32 %v6295_v16, %v3398_v26  ;;  %v3392_v54 = vpop.xlane.xlu1 %3391  ;;  %vm3582_vm2 = vweird.f32 %v6295_v16 }
 0x710   :  { %v3575_v22 = vsel %vm3572_vm15, %v3574_v6, %v3570_v11  ;;  %6296 = vrcp.f32 %v3392_v54  ;;  %vm3583_vm4 = vmor %vm3581_vm3, %vm3582_vm2  ;;  %v3559_v18 = vand.u32 2147483648, %v3392_v54  ;;  %v3557_v37 = vand.u32 2147483647, %v3392_v54 }
 0x711   :  { %v3643_v14 = vmul.f32 %v7813_v49, %v3575_v22  ;;  %v3578_v46 = vsub.f32 1.0, %v3577_v13  ;;  %vm3553_vm7 = vweird.f32 %v3392_v54 }
 0x712   :  { %v3560_v35 = vor.u32 1.1754944e-38, %v3559_v18  ;;  %vm3558_vm9 = vcmp.eq.f32.partialorder %v3557_v37, 8.507059e+37 }
 0x713   :  { %v3579_v59 = vmul.f32 %v6295_v16, %v3578_v46  ;;  %5866 = vmatmul.msk.f32.vlgmr.msrb.gmra.mxu0 %vm161_vm1, %v3643_v14 }
 0x714   :  { %5877 = vmatpush.xpose.msk.msrb.mxu0 %vm161_vm1, %v7765_v25 }
 0x715   :  { %v3580_v63 = vadd.f32 %v6295_v16, %v3579_v59 }
 0x716   :  { %v6297_v20 = vpop.eup %6296 }
 0x717   :  { %v3584_v23 = vsel %vm3583_vm4, %v6295_v16, %v3580_v63  ;;  %v3549_v30 = vmul.f32 %v6297_v20, %v3392_v54  ;;  %v3404_v43 = vpop.xlane.xlu1 %3403  ;;  %vm3554_vm6 = vweird.f32 %v6297_v20 }
 0x718   :  { %v3589_v49 = vsel %vm3586_vm5, %v3588_v36, %v3584_v23  ;;  %6298 = vrcp.f32 %v3404_v43  ;;  %vm3555_vm8 = vmor %vm3553_vm7, %vm3554_vm6  ;;  %v3615_v26 = vand.u32 2147483648, %v3404_v43  ;;  %v3613_v5 = vand.u32 2147483647, %v3404_v43 }
 0x719   :  { %v3644_v19 = vmul.f32 %v7820_v9, %v3589_v49  ;;  %v3550_v12 = vsub.f32 1.0, %v3549_v30  ;;  %vm3609_vm11 = vweird.f32 %v3404_v43 }
 0x71a   :  { %v3616_v15 = vor.u32 1.1754944e-38, %v3615_v26  ;;  %vm3614_vm13 = vcmp.eq.f32.partialorder %v3613_v5, 8.507059e+37 }
 0x71b   :  { %v3551_v2 = vmul.f32 %v6297_v20, %v3550_v12  ;;  %5867 = vmatmul.msk.f32.vlgmr.msra.gmra.mxu1 %vm161_vm1, %v3644_v19 }
 0x71c   :  { %5879 = vmatpush.xpose.msk.msra.mxu1 %vm161_vm1, %v4276_v48 }
 0x71d   :  { %v3552_v25 = vadd.f32 %v6297_v20, %v3551_v2 }
 0x71e   :  { %v6299_v8 = vpop.eup %6298 }
 0x71f   :  { %v3556_v61 = vsel %vm3555_vm8, %v6297_v20, %v3552_v25  ;;  %v3605_v10 = vmul.f32 %v6299_v8, %v3404_v43  ;;  %vm3610_vm10 = vweird.f32 %v6299_v8 }
 0x720   :  { %v3561_v52 = vsel %vm3558_vm9, %v3560_v35, %v3556_v61  ;;  %vm3611_vm12 = vmor %vm3609_vm11, %vm3610_vm10 }
 0x721   :  { %v3642_v9 = vmul.f32 %v7827_v0, %v3561_v52  ;;  %v3606_v39 = vsub.f32 1.0, %v3605_v10  ;;  %v7973_v0 = vpop.permute.xlu2 %4359 }
 0x723   :  { %v3607_v21 = vmul.f32 %v6299_v8, %v3606_v39  ;;  %5865 = vmatmul.msk.f32.vlgmr.msra.gmra.mxu3 %vm161_vm1, %v3642_v9  ;;  %5872 = vmatmul.msk.f32.vlgmr.msrb.gmra.mxu1 %vm161_vm1, %v7742_v56 }
 0x724   :  { %5875 = vmatpush.xpose.msk.msra.mxu3 %vm161_vm1, %v7700_v31 }
 0x725   :  { %v3608_v47 = vadd.f32 %v6299_v8, %v3607_v21 }
 0x727   :  { %v3612_v50 = vsel %vm3611_vm12, %v6299_v8, %v3608_v47 }
 0x728   :  { %v3617_v24 = vsel %vm3614_vm13, %v3616_v15, %v3612_v50 }
 0x729   :  { %v3646_v45 = vmul.f32 %v7831_v60, %v3617_v24 }
 0x72b   :  { %5869 = vmatmul.msk.f32.vlgmr.msrb.gmra.mxu3 %vm161_vm1, %v3646_v45  ;;  %v3389_v56 = vpop.xlane.xlu0 %3388 }
 0x72c   :  { %5883 = vmatpush.xpose.msk.msrb.mxu3 %vm161_vm1, %v7748_v51  ;;  %6300 = vrcp.f32 %v3389_v56  ;;  %v3543_v51 = vand.u32 2147483647, %v3389_v56  ;;  %v3545_v22 = vand.u32 2147483648, %v3389_v56  ;;  %vm3539_vm15 = vweird.f32 %v3389_v56 }
 0x72d   :  { %v4274_v16 = vpop.permute.xlu1 %4273 }
 0x72e   :  { %5880 = vmatmul.msk.f32.vlgmr.msra.gmra.mxu1 %vm161_vm1, %v4274_v16  ;;  %vm3544_vm3 = vcmp.eq.f32.partialorder %v3543_v51, 8.507059e+37  ;;  %v3546_v20 = vor.u32 1.1754944e-38, %v3545_v22 }
 0x72f   :  { %v3401_v31 = vpop.xlane.xlu2 %3400 }
 0x730   :  { %6302 = vrcp.f32 %v3401_v31  ;;  %vm3595_vm5 = vweird.f32 %v3401_v31  ;;  %v3601_v43 = vand.u32 2147483648, %v3401_v31  ;;  %v3599_v12 = vand.u32 2147483647, %v3401_v31 }
 0x732   :  { %v6301_v6 = vpop.eup %6300  ;;  %v3602_v35 = vor.u32 1.1754944e-38, %v3601_v43  ;;  %vm3600_vm8 = vcmp.eq.f32.partialorder %v3599_v12, 8.507059e+37 }
 0x733   :  { %5876 = vmatmul.msk.f32.vlgmr.msra.gmra.mxu3 %vm161_vm1, %v7744_v29  ;;  %v3535_v11 = vmul.f32 %v6301_v6, %v3389_v56  ;;  %v3407_v60 = vpop.xlane.xlu0 %3406  ;;  %vm3540_vm14 = vweird.f32 %v6301_v6 }
 0x734   :  { %5891 = vmatpush.xpose.msk.msra.mxu3 %vm161_vm1, %v7757_v34  ;;  %6304 = vrcp.f32 %v3407_v60  ;;  %vm3541_vm2 = vmor %vm3539_vm15, %vm3540_vm14  ;;  %v3629_v48 = vand.u32 2147483648, %v3407_v60  ;;  %v3627_v8 = vand.u32 2147483647, %v3407_v60  ;;  %vm3623_vm9 = vweird.f32 %v3407_v60 }
 0x735   :  { %v3536_v13 = vsub.f32 1.0, %v3535_v11  ;;  %v7984_v14 = vpop.permute.xlu1 %4413 }
 0x736   :  { %v6303_v54 = vpop.eup %6302  ;;  %v3630_v10 = vor.u32 1.1754944e-38, %v3629_v48  ;;  %vm3628_vm11 = vcmp.eq.f32.partialorder %v3627_v8, 8.507059e+37 }
 0x737   :  { %v3537_v46 = vmul.f32 %v6301_v6, %v3536_v13  ;;  %v3591_v58 = vmul.f32 %v6303_v54, %v3401_v31  ;;  %v4416_v59 = vpop.permute.xlu2 %4415  ;;  %vm3596_vm4 = vweird.f32 %v6303_v54 }
 0x738   :  { %vm3597_vm6 = vmor %vm3595_vm5, %vm3596_vm4 }
 0x739   :  { %v3538_v55 = vadd.f32 %v6301_v6, %v3537_v46  ;;  %v3592_v63 = vsub.f32 1.0, %v3591_v58 }
 0x73a   :  { %v6305_v29 = vpop.eup %6304 }
 0x73b   :  { %5884 = vmatmul.msk.f32.vlgmr.msrb.gmra.mxu3 %vm161_vm1, %v7714_v41  ;;  %v3542_v34 = vsel %vm3541_vm2, %v6301_v6, %v3538_v55  ;;  %v3593_v36 = vmul.f32 %v6303_v54, %v3592_v63  ;;  %v3619_v23 = vmul.f32 %v6305_v29, %v3407_v60  ;;  %vm3624_vm7 = vweird.f32 %v6305_v29 }
 0x73c   :  { %v3547_v30 = vsel %vm3544_vm3, %v3546_v20, %v3542_v34  ;;  %vm3625_vm10 = vmor %vm3623_vm9, %vm3624_vm7 }
 0x73d   :  { %v3641_v49 = vmul.f32 %v7838_v27, %v3547_v30  ;;  %v3594_v19 = vadd.f32 %v6303_v54, %v3593_v36  ;;  %v3620_v18 = vsub.f32 1.0, %v3619_v23  ;;  %v4386_v2 = vpop.permute.xlu1 %4385 }
 0x73e   :  { %v8024_v24 = vpop.f32.mrf.mxu1 }
 0x73f   :  { %v3598_v37 = vsel %vm3597_vm6, %v6303_v54, %v3594_v19  ;;  %v3621_v25 = vmul.f32 %v6305_v29, %v3620_v18  ;;  %v4472_v41 = vpop.permute.xlu2 %4471  ;;  %5864 = vmatmul.msk.f32.vlgmr.msrb.gmra.mxu2 %vm161_vm1, %v3641_v49 }
 0x740   :  { %5873 = vmatpush.xpose.msk.msrb.mxu2 %vm161_vm1, %v7730_v17  ;;  %v3603_v27 = vsel %vm3600_vm8, %v3602_v35, %v3598_v37 }
 0x741   :  { %v3622_v61 = vadd.f32 %v6305_v29, %v3621_v25  ;;  %v3645_v39 = vmul.f32 %v7842_v53, %v3603_v27 }
 0x743   :  { %5892 = vmatmul.msk.f32.vlgmr.msra.gmra.mxu3 %vm161_vm1, %v7736_v4  ;;  %v3626_v52 = vsel %vm3625_vm10, %v6305_v29, %v3622_v61 }
 0x744   :  { %v3631_v9 = vsel %vm3628_vm11, %v3630_v10, %v3626_v52 }
 0x745   :  { %v3647_v26 = vmul.f32 %v7846_v42, %v3631_v9  ;;  %v4526_v21 = vpop.permute.xlu1 %4525 }
 0x746   :  { %v4358_v5 = vpop.permute.xlu0 %4357 }
 0x747   :  { %v4528_v47 = vpop.permute.xlu2 %4527  ;;  %5868 = vmatmul.msk.f32.vlgmr.msra.gmra.mxu2 %vm161_vm1, %v3645_v39  ;;  %5870 = vmatmul.msk.f32.vlgmr.msra.gmra.mxu0 %vm161_vm1, %v3647_v26 }
 0x748   :  { %5881 = vmatpush.xpose.msk.msra.mxu2 %vm161_vm1, %v7769_v1  ;;  %5885 = vmatpush.xpose.msk.msra.mxu0 %vm161_vm1, %v7973_v0 }
 0x74d   :  { %v4556_v17 = vpop.permute.xlu1 %4555 }
 0x74e   :  { %v4388_v4 = vpop.permute.xlu0 %4387  ;;  %5899 = vmatpush.xpose.msk.msrb.mxu3 %vm161_vm1, %v4556_v17 }
 0x74f   :  { %v4498_v15 = vpop.permute.xlu2 %4497  ;;  %5874 = vmatmul.msk.f32.vlgmr.msrb.gmra.mxu2 %vm161_vm1, %v7761_v33  ;;  %5878 = vmatmul.msk.f32.vlgmr.msrb.gmra.mxu0 %vm161_vm1, %v7767_v28 }
 0x750   :  { %5887 = vmatpush.xpose.msk.msrb.mxu1 %vm161_vm1, %v4388_v4  ;;  %5889 = vmatpush.xpose.msk.msrb.mxu2 %vm161_vm1, %v4416_v59 }
 0x751   :  { %5893 = vmatpush.xpose.msk.msrb.mxu0 %vm161_vm1, %v4472_v41 }
 0x753   :  { %5888 = vmatmul.msk.f32.vlgmr.msrb.gmra.mxu1 %vm161_vm1, %v4386_v2 }
 0x756   :  { %v4470_v1 = vpop.permute.xlu0 %4469 }
 0x757   :  { %v4584_v53 = vpop.permute.xlu2 %4583  ;;  %5882 = vmatmul.msk.f32.vlgmr.msra.gmra.mxu2 %vm161_vm1, %v7746_v57  ;;  %5886 = vmatmul.msk.f32.vlgmr.msra.gmra.mxu0 %vm161_vm1, %v4358_v5  ;;  %v4582_v57 = vpop.permute.xlu1 %4581 }
 0x758   :  { %5897 = vmatpush.xpose.msk.msra.mxu2 %vm161_vm1, %v4528_v47  ;;  %5901 = vmatpush.xpose.msk.msra.mxu0 %vm161_vm1, %v4584_v53 }
 0x75e   :  { %v4500_v33 = vpop.permute.xlu0 %4499 }
 0x75f   :  { %v6079_v28 = vpop.permute.xlu2 %6078  ;;  %5890 = vmatmul.msk.f32.vlgmr.msrb.gmra.mxu2 %vm161_vm1, %v7984_v14  ;;  %5894 = vmatmul.msk.f32.vlgmr.msrb.gmra.mxu0 %vm161_vm1, %v4470_v1 }
 0x760   :  { %v6080_v42 = vunpack.i.l.bf16 %v6079_v28  ;;  %5895 = vmatpush.xpose.msk.msra.mxu1 %vm161_vm1, %v4500_v33  ;;  %v6081_v50 = vunpack.i.h.bf16 %v6079_v28 }
 0x762   :  { %5082 = vmatpush.msra.mxu3 %v6080_v42 }
 0x763   :  { %5896 = vmatmul.msk.f32.vlgmr.msra.gmra.mxu1 %vm161_vm1, %v4498_v15 }
 0x766   :  { %v4554_v0 = vpop.permute.xlu0 %4553 }
 0x767   :  { %5898 = vmatmul.msk.f32.vlgmr.msra.gmra.mxu2 %vm161_vm1, %v4526_v21  ;;  %5900 = vmatmul.msk.f32.vlgmr.msrb.gmra.mxu3 %vm161_vm1, %v4554_v0 }
 0x768   :  { %5902 = vmatmul.msk.f32.vlgmr.msra.gmra.mxu0 %vm161_vm1, %v4582_v57  ;;  %5186 = vmatpush.msrb.mxu3 %v6081_v50 }
 0x76c   :  { %v8038_v13 = vpop.f32.mrf.mxu2 }
 0x76e   :  { %v8036_v60 = vpop.f32.mrf.mxu0 }
 0x777   :  { %v8026_v45 = vpop.f32.mrf.mxu1 }
 0x77e   :  { %v8040_v54 = vpop.f32.mrf.mxu3 }
 0x781   :  { %v8042_v51 = vpop.f32.mrf.mxu0 }
 0x785   :  { %v8044_v22 = vpop.f32.mrf.mxu2 }
 0x786   :  { %v8048_v46 = vpop.f32.mrf.mxu3 }
 0x788   :  { %v8028_v56 = vpop.f32.mrf.mxu1 }
 0x790   :  { %v8046_v14 = vpop.f32.mrf.mxu0 }
 0x798   :  { %v8030_v16 = vpop.f32.mrf.mxu1 }
 0x7a0   :  { %v4186_v31 = vpop.f32.mrf.mxu1 }
 0x7a1   :  { %v8032_v6 = vmul.f32 0.17677669, %v4186_v31 }
 0x7a3   :  { %v4625_v11 = vsel %vm161_vm1, %v8032_v6, -inf }
 0x7a4   :  { %4626 = vmax.xlane.f32.xlu1 %v4625_v11 }
 0x7a6   :  { %v8054_v55 = vpop.f32.mrf.mxu3 }
 0x7ab   :  { %v4298_v23 = vpop.f32.mrf.mxu1 }
 0x7ac   :  { %v8066_v49 = vmul.f32 0.17677669, %v4298_v23 }
 0x7ae   :  { %v8060_v34 = vpop.f32.mrf.mxu3  ;;  %v4637_v18 = vsel %vm161_vm1, %v8066_v49, -inf }
 0x7b6   :  { %v4242_v37 = vpop.f32.mrf.mxu3 }
 0x7b7   :  { %v8088_v26 = vmul.f32 0.17677669, %v4242_v37 }
 0x7b9   :  { %v4631_v4 = vsel %vm161_vm1, %v8088_v26, -inf }
 0x7be   :  { %v4354_v21 = vpop.f32.mrf.mxu3 }
 0x7bf   :  { %v8096_v15 = vmul.f32 0.17677669, %v4354_v21 }
 0x7c1   :  { %v4643_v28 = vsel %vm161_vm1, %v8096_v15, -inf }
 0x7c2   :  { %v8050_v58 = vpop.f32.mrf.mxu2 }
 0x7c4   :  { %v8052_v59 = vpop.f32.mrf.mxu0 }
 0x7c6   :  { %v4466_v57 = vpop.f32.mrf.mxu3 }
 0x7c7   :  { %v8108_v31 = vmul.f32 0.17677669, %v4466_v57 }
 0x7ca   :  { %v8056_v63 = vpop.f32.mrf.mxu2 }
 0x7cc   :  { %v4270_v29 = vpop.f32.mrf.mxu0 }
 0x7cd   :  { %v8058_v20 = vmul.f32 0.17677669, %v4270_v29 }
 0x7cf   :  { %v4634_v36 = vsel %vm161_vm1, %v8058_v20, -inf }
 0x7d0   :  { %4635 = vmax.xlane.f32.xlu0 %v4634_v36  ;;  %v4410_v48 = vpop.f32.mrf.mxu1  ;;  %v4655_v36 = vsel %vm161_vm1, %v8108_v31, -inf }
 0x7d1   :  { %v8076_v41 = vmul.f32 0.17677669, %v4410_v48 }
 0x7d2   :  { %v4214_v30 = vpop.f32.mrf.mxu2 }
 0x7d3   :  { %v8064_v43 = vmul.f32 0.17677669, %v4214_v30  ;;  %v4649_v10 = vsel %vm161_vm1, %v8076_v41, -inf }
 0x7d4   :  { %v4382_v19 = vpop.f32.mrf.mxu0 }
 0x7d5   :  { %v4628_v12 = vsel %vm161_vm1, %v8064_v43, -inf  ;;  %v8072_v2 = vmul.f32 0.17677669, %v4382_v19 }
 0x7d6   :  { %4629 = vmax.xlane.f32.xlu2 %v4628_v12 }
 0x7d7   :  { %v4646_v61 = vsel %vm161_vm1, %v8072_v2, -inf }
 0x7d8   :  { %4638 = vmax.xlane.f32.xlu0 %v4637_v18 }
 0x7da   :  { %v4326_v25 = vpop.f32.mrf.mxu2 }
 0x7db   :  { %v8074_v8 = vmul.f32 0.17677669, %v4326_v25 }
 0x7dc   :  { %v4494_v35 = vpop.f32.mrf.mxu0 }
 0x7dd   :  { %v4640_v27 = vsel %vm161_vm1, %v8074_v8, -inf  ;;  %v8084_v52 = vmul.f32 0.17677669, %v4494_v35 }
 0x7de   :  { %4647 = vmax.xlane.f32.xlu2 %v4646_v61  ;;  %4641 = vmax.xlane.f32.xlu1 %v4640_v27 }
 0x7df   :  { %v4658_v5 = vsel %vm161_vm1, %v8084_v52, -inf }
 0x7e0   :  { %4650 = vmax.xlane.f32.xlu0 %v4649_v10  ;;  %v4522_v1 = vpop.f32.mrf.mxu1 }
 0x7e1   :  { %v8100_v33 = vmul.f32 0.17677669, %v4522_v1 }
 0x7e2   :  { %v4438_v9 = vpop.f32.mrf.mxu2 }
 0x7e3   :  { %v8086_v39 = vmul.f32 0.17677669, %v4438_v9  ;;  %v4661_v0 = vsel %vm161_vm1, %v8100_v33, -inf }
 0x7e5   :  { %v4652_v47 = vsel %vm161_vm1, %v8086_v39, -inf  ;;  %v4606_v17 = vpop.f32.mrf.mxu0 }
 0x7e6   :  { %4659 = vmax.xlane.f32.xlu2 %v4658_v5  ;;  %4653 = vmax.xlane.f32.xlu1 %v4652_v47  ;;  %v8098_v53 = vmul.f32 0.17677669, %v4606_v17 }
 0x7e8   :  { %4632 = vmax.xlane.f32.xlu0 %v4631_v4  ;;  %v4670_v42 = vsel %vm161_vm1, %v8098_v53, -inf }
 0x7ea   :  { %v4550_v50 = vpop.f32.mrf.mxu2  ;;  %v4578_v23 = vpop.f32.mrf.mxu3 }
 0x7eb   :  { %v8110_v11 = vmul.f32 0.17677669, %v4550_v50  ;;  %v8116_v30 = vmul.f32 0.17677669, %v4578_v23 }
 0x7ed   :  { %v4664_v29 = vsel %vm161_vm1, %v8110_v11, -inf  ;;  %v4667_v19 = vsel %vm161_vm1, %v8116_v30, -inf }
 0x7ee   :  { %4644 = vmax.xlane.f32.xlu2 %v4643_v28  ;;  %4671 = vmax.xlane.f32.xlu1 %v4670_v42 }
 0x7f0   :  { %4662 = vmax.xlane.f32.xlu0 %v4661_v0 }
 0x7f6   :  { %4665 = vmax.xlane.f32.xlu2 %v4664_v29  ;;  %4656 = vmax.xlane.f32.xlu1 %v4655_v36 }
 0x7fe   :  { %4668 = vmax.xlane.f32.xlu1 %v4667_v19 }
 0x817   :  { %v4627_v12 = vpop.xlane.xlu1 %4626 }
 0x818   :  { %v4673_v18 = vsub.f32 %v8032_v6, %v4627_v12 }
 0x81a   :  { %v4689_v48 = vmul.f32 1.442695, %v4673_v18 }
 0x81c   :  { %6306 = vpow2.f32 %v4689_v48 }
 0x822   :  { %v8121_v37 = vpop.eup %6306 }
 0x823   :  { %v4721_v25 = vsel %vm161_vm1, %v8121_v37, 0.0 }
 0x824   :  { %4722 = vadd.xlane.f32.xlu0 %v4721_v25 }
 0x843   :  { %v4636_v35 = vpop.xlane.xlu0 %4635 }
 0x844   :  { %v4676_v61 = vsub.f32 %v8058_v20, %v4636_v35 }
 0x846   :  { %v4695_v27 = vmul.f32 1.442695, %v4676_v61 }
 0x848   :  { %6308 = vpow2.f32 %v4695_v27 }
 0x849   :  { %v4630_v10 = vpop.xlane.xlu2 %4629 }
 0x84a   :  { %v4674_v6 = vsub.f32 %v8064_v43, %v4630_v10 }
 0x84b   :  { %v4639_v9 = vpop.xlane.xlu0 %4638 }
 0x84c   :  { %v4677_v21 = vsub.f32 %v8066_v49, %v4639_v9  ;;  %v4691_v20 = vmul.f32 1.442695, %v4674_v6 }
 0x84e   :  { %v8127_v5 = vpop.eup %6308  ;;  %v4697_v47 = vmul.f32 1.442695, %v4677_v21 }
 0x84f   :  { %v4730_v17 = vsel %vm161_vm1, %v8127_v5, 0.0 }
 0x850   :  { %6310 = vpow2.f32 %v4697_v47  ;;  %4731 = vadd.xlane.f32.xlu2 %v4730_v17 }
 0x851   :  { %v4648_v4 = vpop.xlane.xlu2 %4647  ;;  %v4642_v28 = vpop.xlane.xlu1 %4641 }
 0x852   :  { %v4680_v1 = vsub.f32 %v8072_v2, %v4648_v4  ;;  %v4678_v43 = vsub.f32 %v8074_v8, %v4642_v28 }
 0x853   :  { %v4651_v57 = vpop.xlane.xlu0 %4650 }
 0x854   :  { %v4703_v42 = vmul.f32 1.442695, %v4680_v1  ;;  %v4681_v50 = vsub.f32 %v8076_v41, %v4651_v57  ;;  %v4699_v23 = vmul.f32 1.442695, %v4678_v43 }
 0x856   :  { %6312 = vpow2.f32 %v4703_v42  ;;  %v8134_v49 = vpop.eup %6310  ;;  %v4705_v0 = vmul.f32 1.442695, %v4681_v50 }
 0x857   :  { %6314 = vpow2.f32 %v4691_v20  ;;  %v4733_v29 = vsel %vm161_vm1, %v8134_v49, 0.0 }
 0x858   :  { %4734 = vadd.xlane.f32.xlu1 %v4733_v29  ;;  %6316 = vpow2.f32 %v4705_v0 }
 0x859   :  { %v4660_v36 = vpop.xlane.xlu2 %4659  ;;  %v4654_v41 = vpop.xlane.xlu1 %4653  ;;  %6318 = vpow2.f32 %v4699_v23 }
 0x85a   :  { %v4684_v8 = vsub.f32 %v8084_v52, %v4660_v36  ;;  %v4682_v28 = vsub.f32 %v8086_v39, %v4654_v41 }
 0x85b   :  { %v4633_v19 = vpop.xlane.xlu0 %4632 }
 0x85c   :  { %v8139_v2 = vpop.eup %6312  ;;  %v4675_v18 = vsub.f32 %v8088_v26, %v4633_v19  ;;  %v4711_v9 = vmul.f32 1.442695, %v4684_v8  ;;  %v4707_v50 = vmul.f32 1.442695, %v4682_v28  ;;  %v6102_v8 = vpack.i.bf16 %v6529_v40, %v6537_v44 }
 0x85d   :  { %v8141_v12 = vpop.eup %6314  ;;  %v4742_v48 = vsel %vm161_vm1, %v8139_v2, 0.0 }
 0x85e   :  { %4743 = vadd.xlane.f32.xlu0 %v4742_v48  ;;  %v4693_v25 = vmul.f32 1.442695, %v4675_v18  ;;  %v4724_v35 = vsel %vm161_vm1, %v8141_v12, 0.0  ;;  %v8149_v27 = vpop.eup %6316 }
 0x85f   :  { %v8152_v6 = vpop.eup %6318  ;;  %v4745_v52 = vsel %vm161_vm1, %v8149_v27, 0.0 }
 0x860   :  { %4725 = vadd.xlane.f32.xlu1 %v4724_v35  ;;  %6320 = vpow2.f32 %v4693_v25  ;;  %v4736_v1 = vsel %vm161_vm1, %v8152_v6, 0.0  ;;  %v8964_v35 = vld [vmem:[#allocation11_spill] sm:$0xff] }
 0x861   :  { %v4645_v61 = vpop.xlane.xlu2 %4644  ;;  %v4672_v17 = vpop.xlane.xlu1 %4671 }
 0x862   :  { %v4679_v10 = vsub.f32 %v8096_v15, %v4645_v61  ;;  %v8965_v61 = vld [vmem:[#allocation12_spill] sm:$0xff] }
 0x863   :  { %v4663_v21 = vpop.xlane.xlu0 %4662 }
 0x864   :  { %v4701_v26 = vmul.f32 1.442695, %v4679_v10  ;;  %v4685_v47 = vsub.f32 %v8100_v33, %v4663_v21  ;;  %v6107_v10 = vpack.i.bf16 %v8965_v61, %v8964_v35  ;;  %v8966_v21 = vld [vmem:[#allocation13_spill] sm:$0xff] }
 0x866   :  { %6322 = vpow2.f32 %v4701_v26  ;;  %4746 = vadd.xlane.f32.xlu0 %v4745_v52  ;;  %v4713_v4 = vmul.f32 1.442695, %v4685_v47  ;;  %v8159_v15 = vpop.eup %6320 }
 0x867   :  { %6324 = vpow2.f32 %v4711_v9  ;;  %v4727_v57 = vsel %vm161_vm1, %v8159_v15, 0.0  ;;  %v4688_v9 = vsub.f32 %v8098_v53, %v4672_v17 }
 0x868   :  { %4737 = vadd.xlane.f32.xlu1 %v4736_v1  ;;  %6326 = vpow2.f32 %v4713_v4  ;;  %v8967_v4 = vld [vmem:[#allocation27_spill] sm:$0xff] }
 0x869   :  { %v4657_v0 = vpop.xlane.xlu1 %4656  ;;  %6328 = vpow2.f32 %v4707_v50  ;;  %v4666_v25 = vpop.xlane.xlu2 %4665  ;;  %v4719_v26 = vmul.f32 1.442695, %v4688_v9 }
 0x86a   :  { %v4683_v39 = vsub.f32 %v8108_v31, %v4657_v0  ;;  %v6097_v31 = vpack.i.bf16 %v6525_v38, %v6513_v32 }
 0x86c   :  { %v8161_v20 = vpop.eup %6322  ;;  %v4709_v23 = vmul.f32 1.442695, %v4683_v39 }
 0x86d   :  { %v8164_v33 = vpop.eup %6324  ;;  %v4739_v42 = vsel %vm161_vm1, %v8161_v20, 0.0 }
 0x86e   :  { %4740 = vadd.xlane.f32.xlu2 %v4739_v42  ;;  %4728 = vadd.xlane.f32.xlu0 %v4727_v57  ;;  %v4754_v43 = vsel %vm161_vm1, %v8164_v33, 0.0  ;;  %v8172_v29 = vpop.eup %6326  ;;  %6330 = vpow2.f32 %v4709_v23 }
 0x86f   :  { %v4757_v36 = vsel %vm161_vm1, %v8172_v29, 0.0  ;;  %v8177_v19 = vpop.eup %6328 }
 0x870   :  { %4755 = vadd.xlane.f32.xlu1 %v4754_v43  ;;  %v4748_v41 = vsel %vm161_vm1, %v8177_v19, 0.0  ;;  %v8969_v43 = vld [vmem:[#allocation14_spill] sm:$0xff] }
 0x874   :  { %v8181_v18 = vpop.eup %6330 }
 0x875   :  { %v4751_v48 = vsel %vm161_vm1, %v8181_v18, 0.0 }
 0x876   :  { %4758 = vadd.xlane.f32.xlu0 %v4757_v36 }
 0x87e   :  { %4749 = vadd.xlane.f32.xlu0 %v4748_v41 }
 0x886   :  { %6083 = vrot.lane.b32.xlu2 %v6897_v62, %s6380_s16  ;;  %4752 = vadd.xlane.f32.xlu0 %v4751_v48  ;;  %v4686_v62 = vsub.f32 %v8110_v11, %v4666_v25  ;;  %v4669_v11 = vpop.xlane.xlu1 %4668  ;;  %v8970_v48 = vld [vmem:[#allocation21_spill] sm:$0xff] }
 0x887   :  { %v4687_v52 = vsub.f32 %v8116_v30, %v4669_v11  ;;  %v8968_v30 = vld [vmem:[#allocation22_spill] sm:$0xff] }
 0x889   :  { %6088 = vrot.lane.b32.xlu1 %v7046_v3, %s6380_s16  ;;  %v4715_v3 = vmul.f32 1.442695, %v4686_v62  ;;  %v4717_v17 = vmul.f32 1.442695, %v4687_v52 }
 0x88b   :  { %6332 = vpow2.f32 %v4715_v3 }
 0x88c   :  { %6334 = vpow2.f32 %v4719_v26 }
 0x88d   :  { %6336 = vpow2.f32 %v4717_v17 }
 0x891   :  { %6098 = vrot.lane.b32.xlu1 %v6097_v31, %s6380_s16  ;;  %v8204_v47 = vpop.eup %6332 }
 0x892   :  { %v8211_v53 = vpop.eup %6334 }
 0x893   :  { %v4766_v1 = vsel %vm161_vm1, %v8211_v53, 0.0  ;;  %v8217_v28 = vpop.eup %6336 }
 0x894   :  { %v4763_v42 = vsel %vm161_vm1, %v8217_v28, 0.0 }
 0x897   :  { %v4723_v57 = vpop.xlane.xlu0 %4722 }
 0x898   :  { %6338 = vrcp.f32 %v4723_v57  ;;  %vm4774_vm13 = vweird.f32 %v4723_v57 }
 0x899   :  { %6103 = vrot.lane.b32.xlu1 %v6102_v8, %s6380_s16 }
 0x89a   :  { %6093 = vrot.lane.b32.xlu0 %v7449_v7, %s6380_s16  ;;  %v4760_v7 = vsel %vm161_vm1, %v8204_v47, 0.0 }
 0x89e   :  { %v6339_v39 = vpop.eup %6338 }
 0x89f   :  { %v4770_v23 = vmul.f32 %v6339_v39, %v4723_v57  ;;  %vm4775_vm12 = vweird.f32 %v6339_v39 }
 0x8a0   :  { %vm8255_vm15 = vmor %vm4774_vm13, %vm4775_vm12 }
 0x8a1   :  { %6108 = vrot.lane.b32.xlu1 %v6107_v10, %s6380_s16  ;;  %v4771_v31 = vsub.f32 1.0, %v4770_v23 }
 0x8a3   :  { %v4772_v10 = vmul.f32 %v6339_v39, %v4771_v31 }
 0x8a5   :  { %v4773_v3 = vadd.f32 %v6339_v39, %v4772_v10 }
 0x8a9   :  { %5373 = vrot.lane.b32.xlu1 %v8966_v21, %s6380_s16 }
 0x8af   :  { %4761 = vadd.xlane.f32.xlu2 %v4760_v7  ;;  %v4780_v7 = vand.u32 2147483648, %v4723_v57 }
 0x8b1   :  { %2739 = vrot.lane.b32.xlu1 %v8967_v4, %s6381_s17  ;;  %v4777_v4 = vsel %vm8255_vm15, %v6339_v39, %v4773_v3 }
 0x8b7   :  { %4767 = vadd.xlane.f32.xlu2 %v4766_v1 }
 0x8b9   :  { %4100 = vrot.lane.b32.xlu1 %v8054_v55, %s6382_s18 }
 0x8c1   :  { %2729 = vrot.lane.b32.xlu1 %v8968_v30, %s6381_s17 }
 0x8c3   :  { %v4732_v50 = vpop.xlane.xlu2 %4731 }
 0x8c4   :  { %4764 = vadd.xlane.f32.xlu0 %v4763_v42  ;;  %6340 = vrcp.f32 %v4732_v50  ;;  %vm4816_vm2 = vweird.f32 %v4732_v50  ;;  %v4820_v17 = vand.u32 2147483647, %v4732_v50 }
 0x8c6   :  { %vm4821_vm5 = vcmp.eq.f32.partialorder %v4820_v17, 8.507059e+37 }
 0x8c9   :  { %4090 = vrot.lane.b32.xlu1 %v8044_v22, %s6382_s18  ;;  %v8971_v22 = vld [vmem:[#allocation26_spill] sm:$0xff] }
 0x8ca   :  { %v6341_v36 = vpop.eup %6340 }
 0x8cb   :  { %v8227_v55 = vpop.xlane.xlu1 %4734  ;;  %v4812_v41 = vmul.f32 %v6341_v36, %v4732_v50  ;;  %vm4817_vm14 = vweird.f32 %v6341_v36 }
 0x8cc   :  { %vm8266_vm3 = vmor %vm4816_vm2, %vm4817_vm14 }
 0x8cd   :  { %v4813_v62 = vsub.f32 1.0, %v4812_v41  ;;  %v8977_v41 = vld [vmem:[#allocation30_spill] sm:$0xff] }
 0x8cf   :  { %5399 = vrot.lane.b32.xlu2 %v8969_v43, %s6380_s16 }
 0x8d1   :  { %v8229_v0 = vpop.xlane.xlu0 %4743  ;;  %4080 = vrot.lane.b32.xlu1 %v8024_v24, %s6382_s18  ;;  %v4814_v24 = vmul.f32 %v6341_v36, %v4813_v62 }
 0x8d3   :  { %v8239_v25 = vpop.xlane.xlu1 %4725 }
 0x8d4   :  { %6342 = vrcp.f32 %v8239_v25  ;;  %vm4788_vm14 = vweird.f32 %v8239_v25 }
 0x8d7   :  { %2741 = vrot.lane.b32.xlu2 %v8970_v48, %s6381_s17 }
 0x8d8   :  { %2731 = vrot.lane.b32.xlu0 %v8971_v22, %s6381_s17 }
 0x8d9   :  { %v8237_v8 = vpop.xlane.xlu0 %4746  ;;  %4082 = vrot.lane.b32.xlu1 %v8038_v13, %s6382_s18  ;;  %v4778_v13 = vand.u32 2147483647, %v4723_v57  ;;  %v8976_v57 = vld [vmem:[#allocation16_spill] sm:$0xff] }
 0x8da   :  { %v8264_v1 = vpop.eup %6342 }
 0x8db   :  { %v8259_v52 = vpop.xlane.xlu1 %4737  ;;  %vm4779_vm4 = vcmp.eq.f32.partialorder %v4778_v13, 8.507059e+37  ;;  %v4784_v48 = vmul.f32 %v8264_v1, %v8239_v25  ;;  %vm4789_vm11 = vweird.f32 %v8264_v1 }
 0x8dc   :  { %vm8344_vm15 = vmor %vm4788_vm14, %vm4789_vm11 }
 0x8df   :  { %4102 = vrot.lane.b32.xlu2 %v8046_v14, %s6382_s18  ;;  %v4815_v14 = vadd.f32 %v6341_v36, %v4814_v24 }
 0x8e0   :  { %4092 = vrot.lane.b32.xlu0 %v8048_v46, %s6382_s18  ;;  %v4822_v46 = vand.u32 2147483648, %v4732_v50 }
 0x8e1   :  { %v8248_v9 = vpop.xlane.xlu2 %4740  ;;  %v8250_v26 = vpop.xlane.xlu0 %4728  ;;  %4084 = vrot.lane.b32.xlu1 %v8040_v54, %s6382_s18  ;;  %v4781_v54 = vor.u32 1.1754944e-38, %v4780_v7  ;;  %v4819_v42 = vsel %vm8266_vm3, %v6341_v36, %v4815_v14 }
 0x8e2   :  { %6344 = vrcp.f32 %v8248_v9  ;;  %v4823_v50 = vor.u32 1.1754944e-38, %v4822_v46  ;;  %vm4802_vm7 = vweird.f32 %v8250_v26  ;;  %vm4858_vm12 = vweird.f32 %v8248_v9 }
 0x8e3   :  { %6346 = vrcp.f32 %v8250_v26  ;;  %v4782_v39 = vsel %vm4779_vm4, %v4781_v54, %v4777_v4  ;;  %v4785_v4 = vsub.f32 1.0, %v4784_v48  ;;  %v4808_v54 = vand.u32 2147483648, %v8250_v26 }
 0x8e4   :  { %6348 = vrcp.f32 %v8259_v52  ;;  %v4824_v10 = vsel %vm4821_vm5, %v4823_v50, %v4819_v42  ;;  %v4993_v7 = vmul.f32 %v8121_v37, %v4782_v39  ;;  %v4806_v37 = vand.u32 2147483647, %v8250_v26  ;;  %v8978_v39 = vld [vmem:[#allocation17_spill] sm:$0xff] }
 0x8e5   :  { %6350 = vrcp.f32 %v8227_v55  ;;  %v4996_v46 = vmul.f32 %v8127_v5, %v4824_v10  ;;  %v4786_v50 = vmul.f32 %v8264_v1, %v4785_v4  ;;  %vm4830_vm4 = vweird.f32 %v8227_v55 }
 0x8e6   :  { %6352 = vrcp.f32 %v8229_v0  ;;  %vm4807_vm10 = vcmp.eq.f32.partialorder %v4806_v37, 8.507059e+37 }
 0x8e7   :  { %2719 = vrot.lane.b32.xlu2 %v8976_v57, %s6381_s17 }
 0x8e8   :  { %v8275_v23 = vpop.eup %6344  ;;  %2733 = vrot.lane.b32.xlu0 %v8977_v41, %s6381_s17 }
 0x8e9   :  { %v4854_v36 = vmul.f32 %v8275_v23, %v8248_v9  ;;  %v6084_v22 = vpop.permute.xlu2 %6083  ;;  %v8284_v31 = vpop.xlane.xlu0 %4758  ;;  %vm4859_vm9 = vweird.f32 %v8275_v23 }
 0x8ea   :  { %v6347_v62 = vpop.eup %6346  ;;  %v6086_v13 = vunpack.i.h.bf16 %v6084_v22  ;;  %v6085_v14 = vunpack.i.l.bf16 %v6084_v22  ;;  %v4809_v22 = vor.u32 1.1754944e-38, %v4808_v54  ;;  %vm8330_vm13 = vmor %vm4858_vm12, %vm4859_vm9 }
 0x8eb   :  { %v4855_v24 = vsub.f32 1.0, %v4854_v36  ;;  %v4798_v3 = vmul.f32 %v6347_v62, %v8250_v26  ;;  %v8288_v11 = vpop.eup %6348  ;;  %vm4803_vm6 = vweird.f32 %v6347_v62 }
 0x8ec   :  { %5030 = vmatpush.msrb.mxu1 %v6085_v14  ;;  %5108 = vmatpush.msrb.mxu0 %v6086_v13  ;;  %v8293_v30 = vpop.eup %6350  ;;  %v4840_v5 = vmul.f32 %v8288_v11, %v8259_v52  ;;  %vm4804_vm8 = vmor %vm4802_vm7, %vm4803_vm6  ;;  %v8318_v13 = vpop.xlane.xlu1 %4755  ;;  %v4787_v14 = vadd.f32 %v8264_v1, %v4786_v50  ;;  %vm4845_vm5 = vweird.f32 %v8288_v11  ;;  %vm4844_vm6 = vweird.f32 %v8259_v52 }
 0x8ed   :  { %v4799_v17 = vsub.f32 1.0, %v4798_v3  ;;  %v4856_v42 = vmul.f32 %v8275_v23, %v4855_v24  ;;  %5903 = vmatmul.msk.f32.vlgmr.msrb.gmra.mxu1 %vm161_vm1, %v4993_v7  ;;  %5906 = vmatmul.msk.f32.vlgmr.msrb.gmra.mxu0 %vm161_vm1, %v4996_v46  ;;  %v4826_v36 = vmul.f32 %v8293_v30, %v8227_v55  ;;  %v8312_v10 = vpop.eup %6352  ;;  %v4864_v3 = vand.u32 2147483648, %v8248_v9 }
 0x8ee   :  { %v4841_v26 = vsub.f32 1.0, %v4840_v5  ;;  %v4862_v46 = vand.u32 2147483647, %v8248_v9  ;;  %vm4872_vm7 = vweird.f32 %v8229_v0  ;;  %vm4831_vm9 = vweird.f32 %v8293_v30 }
 0x8ef   :  { %v4800_v57 = vmul.f32 %v6347_v62, %v4799_v17  ;;  %2743 = vrot.lane.b32.xlu2 %v8978_v39, %s6381_s17  ;;  %v4857_v24 = vadd.f32 %v8275_v23, %v4856_v42  ;;  %v4794_v17 = vand.u32 2147483648, %v8239_v25  ;;  %v4792_v42 = vand.u32 2147483647, %v8239_v25  ;;  %v8983_v25 = vld [vmem:[#allocation29_spill] sm:$0xff]  ;;  %vm8419_vm14 = vmor %vm4830_vm4, %vm4831_vm9 }
 0x8f0   :  { %4094 = vrot.lane.b32.xlu0 %v8042_v51, %s6382_s18  ;;  %v4842_v5 = vmul.f32 %v8288_v11, %v4841_v26  ;;  %v4865_v39 = vor.u32 1.1754944e-38, %v4864_v3  ;;  %vm4863_vm2 = vcmp.eq.f32.partialorder %v4862_v46, 8.507059e+37  ;;  %vm4873_vm11 = vweird.f32 %v8312_v10 }
 0x8f1   :  { %v4801_v41 = vadd.f32 %v6347_v62, %v4800_v57  ;;  %v8307_v48 = vpop.xlane.xlu0 %4749  ;;  %v4827_v57 = vsub.f32 1.0, %v4826_v36  ;;  %vm4793_vm3 = vcmp.eq.f32.partialorder %v4792_v42, 8.507059e+37  ;;  %v4850_v42 = vand.u32 2147483648, %v8259_v52 }
 0x8f2   :  { %6354 = vrcp.f32 %v8307_v48  ;;  %v4843_v26 = vadd.f32 %v8288_v11, %v4842_v5 }
 0x8f3   :  { %v4805_v51 = vsel %vm4804_vm8, %v6347_v62, %v4801_v41  ;;  %v4868_v62 = vmul.f32 %v8312_v10, %v8229_v0  ;;  %6356 = vrcp.f32 %v8237_v8  ;;  %vm8385_vm8 = vmor %vm4844_vm6, %vm4845_vm5 }
 0x8f4   :  { %v4810_v7 = vsel %vm4807_vm10, %v4809_v22, %v4805_v51  ;;  %6358 = vrcp.f32 %v8318_v13  ;;  %v4795_v22 = vor.u32 1.1754944e-38, %v4794_v17  ;;  %v4834_v17 = vand.u32 2147483647, %v8227_v55 }
 0x8f5   :  { %v4995_v4 = vmul.f32 %v8159_v15, %v4810_v7  ;;  %v4861_v15 = vsel %vm8330_vm13, %v8275_v23, %v4857_v24  ;;  %v4791_v23 = vsel %vm8344_vm15, %v8264_v1, %v4787_v14  ;;  %v4869_v36 = vsub.f32 1.0, %v4868_v62 }
 0x8f6   :  { %v4866_v24 = vsel %vm4863_vm2, %v4865_v39, %v4861_v15  ;;  %v4836_v1 = vand.u32 2147483648, %v8227_v55  ;;  %v4796_v51 = vsel %vm4793_vm3, %v4795_v22, %v4791_v23  ;;  %v4828_v62 = vmul.f32 %v8293_v30, %v4827_v57  ;;  %vm8431_vm2 = vmor %vm4872_vm7, %vm4873_vm11 }
 0x8f7   :  { %5905 = vmatmul.msk.f32.vlgmr.msra.gmra.mxu3 %vm161_vm1, %v4995_v4  ;;  %4104 = vrot.lane.b32.xlu2 %v8030_v16, %s6382_s18  ;;  %v4999_v7 = vmul.f32 %v8161_v20, %v4866_v24  ;;  %v4870_v54 = vmul.f32 %v8312_v10, %v4869_v36  ;;  %v4994_v37 = vmul.f32 %v8141_v12, %v4796_v51  ;;  %v4848_v20 = vand.u32 2147483647, %v8259_v52  ;;  %v8986_v52 = vld [vmem:[#allocation19_spill] sm:$0xff] }
 0x8f8   :  { %v8340_v9 = vpop.eup %6354  ;;  %2735 = vrot.lane.b32.xlu0 %v8983_v25, %s6381_s17  ;;  %v4837_v39 = vor.u32 1.1754944e-38, %v4836_v1  ;;  %v4876_v25 = vand.u32 2147483647, %v8229_v0  ;;  %v4847_v23 = vsel %vm8385_vm8, %v8288_v11, %v4843_v26  ;;  %v4829_v22 = vadd.f32 %v8293_v30, %v4828_v62 }
 0x8f9   :  { %v4896_v50 = vmul.f32 %v8340_v9, %v8307_v48  ;;  %v8359_v41 = vpop.xlane.xlu0 %4752  ;;  %v8362_v16 = vpop.eup %6356  ;;  %vm8402_vm10 = vcmp.eq.f32.partialorder %v4834_v17, 8.507059e+37  ;;  %v4851_v1 = vor.u32 1.1754944e-38, %v4850_v42  ;;  %v4871_v51 = vadd.f32 %v8312_v10, %v4870_v54 }
 0x8fa   :  { %6360 = vrcp.f32 %v8359_v41  ;;  %v8373_v15 = vpop.eup %6358  ;;  %v4882_v5 = vmul.f32 %v8362_v16, %v8237_v8  ;;  %vm4849_vm12 = vcmp.eq.f32.partialorder %v4848_v20, 8.507059e+37  ;;  %vm4901_vm13 = vweird.f32 %v8340_v9 }
 0x8fb   :  { %v6089_v3 = vpop.permute.xlu1 %6088  ;;  %v4897_v14 = vsub.f32 1.0, %v4896_v50  ;;  %6362 = vrcp.f32 %v8284_v31  ;;  %v4924_v11 = vmul.f32 %v8373_v15, %v8318_v13  ;;  %v4878_v55 = vand.u32 2147483648, %v8229_v0 }
 0x8fc   :  { %v6091_v46 = vunpack.i.h.bf16 %v6089_v3  ;;  %v6090_v4 = vunpack.i.l.bf16 %v6089_v3  ;;  %v4883_v26 = vsub.f32 1.0, %v4882_v5  ;;  %vm4900_vm3 = vweird.f32 %v8307_v48 }
 0x8fd   :  { %v4898_v50 = vmul.f32 %v8340_v9, %v4897_v14  ;;  %v4920_v14 = vand.u32 2147483648, %v8359_v41  ;;  %v4925_v5 = vsub.f32 1.0, %v4924_v11  ;;  %v4906_v20 = vand.u32 2147483648, %v8307_v48  ;;  %vm8441_vm4 = vmor %vm4900_vm3, %vm4901_vm13  ;;  %v8995_v11 = vld [vmem:[#allocation25_spill] sm:$0xff] }
 0x8fe   :  { %5056 = vmatpush.msrb.mxu2 %v6090_v4  ;;  %5290 = vmatpush.msra.mxu3 %v6091_v46  ;;  %vm4914_vm5 = vweird.f32 %v8359_v41  ;;  %v4833_v0 = vsel %vm8419_vm14, %v8293_v30, %v4829_v22  ;;  %vm4877_vm8 = vcmp.eq.f32.partialorder %v4876_v25, 8.507059e+37  ;;  %vm4887_vm11 = vweird.f32 %v8362_v16 }
 0x8ff   :  { %5909 = vmatmul.msk.f32.vlgmr.msrb.gmra.mxu3 %vm161_vm1, %v4999_v7  ;;  %2721 = vrot.lane.b32.xlu2 %v8986_v52, %s6381_s17  ;;  %v4852_v7 = vsel %vm4849_vm12, %v4851_v1, %v4847_v23  ;;  %v4899_v62 = vadd.f32 %v8340_v9, %v4898_v50  ;;  %v4904_v23 = vand.u32 2147483647, %v8307_v48  ;;  %v4921_v1 = vor.u32 1.1754944e-38, %v4920_v14 }
 0x900   :  { %v6361_v57 = vpop.eup %6360  ;;  %5904 = vmatmul.msk.f32.vlgmr.msrb.gmra.mxu2 %vm161_vm1, %v4994_v37  ;;  %4096 = vrot.lane.b32.xlu0 %v8028_v56, %s6382_s18  ;;  %v4918_v56 = vand.u32 2147483647, %v8359_v41  ;;  %v4998_v12 = vmul.f32 %v8152_v6, %v4852_v7  ;;  %v4875_v6 = vsel %vm8431_vm2, %v8312_v10, %v4871_v51  ;;  %v4879_v10 = vor.u32 1.1754944e-38, %v4878_v55 }
 0x901   :  { %v4910_v36 = vmul.f32 %v6361_v57, %v8359_v41  ;;  %vm4915_vm15 = vweird.f32 %v6361_v57  ;;  %v8425_v42 = vpop.eup %6362  ;;  %v4903_v41 = vsel %vm8441_vm4, %v8340_v9, %v4899_v62  ;;  %v4926_v22 = vmul.f32 %v8373_v15, %v4925_v5 }
 0x902   :  { %vm4916_vm6 = vmor %vm4914_vm5, %vm4915_vm15  ;;  %v4938_v48 = vmul.f32 %v8425_v42, %v8284_v31  ;;  %vm4919_vm7 = vcmp.eq.f32.partialorder %v4918_v56, 8.507059e+37  ;;  %v4907_v51 = vor.u32 1.1754944e-38, %v4906_v20  ;;  %vm4905_vm9 = vcmp.eq.f32.partialorder %v4904_v23, 8.507059e+37 }
 0x903   :  { %v4911_v3 = vsub.f32 1.0, %v4910_v36  ;;  %v8413_v46 = vpop.permute.xlu1 %6098  ;;  %v4884_v36 = vmul.f32 %v8362_v16, %v4883_v26  ;;  %v4880_v14 = vsel %vm4877_vm8, %v4879_v10, %v4875_v6  ;;  %vm4929_vm12 = vweird.f32 %v8373_v15 }
 0x904   :  { %v6100_v54 = vunpack.i.l.bf16 %v8413_v46  ;;  %v4908_v9 = vsel %vm4905_vm9, %v4907_v51, %v4903_v41  ;;  %v4939_v62 = vsub.f32 1.0, %v4938_v48  ;;  %v4890_v24 = vand.u32 2147483647, %v8237_v8 }
 0x905   :  { %v4912_v17 = vmul.f32 %v6361_v57, %v4911_v3  ;;  %v4838_v3 = vsel %vm8402_vm10, %v4837_v39, %v4833_v0  ;;  %v4885_v4 = vadd.f32 %v8362_v16, %v4884_v36  ;;  %vm4886_vm10 = vweird.f32 %v8237_v8 }
 0x906   :  { %5160 = vmatpush.msra.mxu2 %v6100_v54  ;;  %v4892_v39 = vand.u32 2147483648, %v8237_v8  ;;  %v4997_v25 = vmul.f32 %v8134_v49, %v4838_v3  ;;  %v4934_v55 = vand.u32 2147483648, %v8318_v13  ;;  %v5002_v5 = vmul.f32 %v8177_v19, %v4908_v9  ;;  %vm8481_vm13 = vmor %vm4886_vm10, %vm4887_vm11  ;;  %v9002_v3 = vld [vmem:[#allocation10_spill] sm:$0xff] }
 0x907   :  { %v4913_v50 = vadd.f32 %v6361_v57, %v4912_v17  ;;  %2745 = vrot.lane.b32.xlu2 %v8995_v11, %s6381_s17  ;;  %v5000_v20 = vmul.f32 %v8139_v2, %v4880_v14  ;;  %vm4928_vm14 = vweird.f32 %v8318_v13  ;;  %v4932_v49 = vand.u32 2147483647, %v8318_v13 }
 0x908   :  { %5908 = vmatmul.msk.f32.vlgmr.msra.gmra.mxu2 %vm161_vm1, %v4998_v12  ;;  %v6101_v8 = vunpack.i.h.bf16 %v8413_v46  ;;  %v4889_v2 = vsel %vm8481_vm13, %v8362_v16, %v4885_v4  ;;  %vm8495_vm15 = vmor %vm4928_vm14, %vm4929_vm12  ;;  %v4940_v52 = vmul.f32 %v8425_v42, %v4939_v62  ;;  %v4893_v13 = vor.u32 1.1754944e-38, %v4892_v39  ;;  %v9003_v39 = vld [vmem:[#allocation18_spill] sm:$0xff] }
 0x909   :  { %v4917_v30 = vsel %vm4916_vm6, %v6361_v57, %v4913_v50  ;;  %vm4891_vm2 = vcmp.eq.f32.partialorder %v4890_v24, 8.507059e+37  ;;  %v4935_v16 = vor.u32 1.1754944e-38, %v4934_v55  ;;  %vm4933_vm3 = vcmp.eq.f32.partialorder %v4932_v49, 8.507059e+37 }
 0x90a   :  { %v4922_v26 = vsel %vm4919_vm7, %v4921_v1, %v4917_v30  ;;  %v4894_v46 = vsel %vm4891_vm2, %v4893_v13, %v4889_v2  ;;  %vm4943_vm4 = vweird.f32 %v8425_v42  ;;  %v4941_v6 = vadd.f32 %v8425_v42, %v4940_v52  ;;  %v9000_v30 = vld [vmem:[#allocation20_spill] sm:$0xff] }
 0x90b   :  { %v5003_v7 = vmul.f32 %v8181_v18, %v4922_v26  ;;  %v6104_v57 = vpop.permute.xlu1 %6103  ;;  %v4927_v18 = vadd.f32 %v8373_v15, %v4926_v22  ;;  %v4948_v11 = vand.u32 2147483648, %v8284_v31  ;;  %vm4942_vm5 = vweird.f32 %v8284_v31  ;;  %v9001_v26 = vld [vmem:[#allocation28_spill] sm:$0xff] }
 0x90c   :  { %v6094_v56 = vpop.permute.xlu0 %6093  ;;  %v6106_v17 = vunpack.i.h.bf16 %v6104_v57  ;;  %v6105_v23 = vunpack.i.l.bf16 %v6104_v57  ;;  %v4946_v48 = vand.u32 2147483647, %v8284_v31  ;;  %vm4944_vm6 = vmor %vm4942_vm5, %vm4943_vm4  ;;  %vm2783_vm8 = vcmask 130112  }
 0x90d   :  { %v6096_v54 = vunpack.i.h.bf16 %v6094_v56  ;;  %v6095_v37 = vunpack.i.l.bf16 %v6094_v56  ;;  %5913 = vmatmul.msk.f32.vlgmr.msra.gmra.mxu3 %vm161_vm1, %v5003_v7  ;;  %v4945_v10 = vsel %vm4944_vm6, %v8425_v42, %v4941_v6  ;;  %v4949_v22 = vor.u32 1.1754944e-38, %v4948_v11 }
 0x90e   :  { %5264 = vmatpush.msrb.mxu2 %v6106_v17  ;;  %vm4947_vm7 = vcmp.eq.f32.partialorder %v4946_v48, 8.507059e+37  ;;  %vm4144_vm9 = vcmask 195712  }
 0x90f   :  { %5134 = vmatpush.msra.mxu1 %v6095_v37  ;;  %4106 = vrot.lane.b32.xlu2 %v8056_v63, %s6382_s18  ;;  %v4931_v63 = vsel %vm8495_vm15, %v8373_v15, %v4927_v18  ;;  %v5001_v15 = vmul.f32 %v8149_v27, %v4894_v46  ;;  %v4950_v27 = vsel %vm4947_vm7, %v4949_v22, %v4945_v10 }
 0x910   :  { %5212 = vmatpush.msra.mxu0 %v6096_v54  ;;  %5912 = vmatmul.msk.f32.vlgmr.msrb.gmra.mxu2 %vm161_vm1, %v5002_v5  ;;  %v4936_v0 = vsel %vm4933_vm3, %v4935_v16, %v4931_v63  ;;  %v5005_v31 = vmul.f32 %v8172_v29, %v4950_v27  ;;  %v9004_v63 = vld [vmem:[#allocation23_spill] sm:$0xff] }
 0x911   :  { %5907 = vmatmul.msk.f32.vlgmr.msra.gmra.mxu1 %vm161_vm1, %v4997_v25  ;;  %5910 = vmatmul.msk.f32.vlgmr.msra.gmra.mxu0 %vm161_vm1, %v5000_v20  ;;  %v5004_v41 = vmul.f32 %v8164_v33, %v4936_v0 }
 0x912   :  { %5238 = vmatpush.msrb.mxu1 %v6101_v8  ;;  %5316 = vmatpush.msrb.mxu0 %v6105_v23 }
 0x913   :  { %v6109_v50 = vpop.permute.xlu1 %6108 }
 0x914   :  { %v6111_v36 = vunpack.i.h.bf16 %v6109_v50  ;;  %v6110_v1 = vunpack.i.l.bf16 %v6109_v50 }
 0x916   :  { %5342 = vmatpush.msra.mxu1 %v6110_v1  ;;  %5368 = vmatpush.msra.mxu2 %v6111_v36 }
 0x917   :  { %2723 = vrot.lane.b32.xlu2 %v9000_v30, %s6381_s17 }
 0x919   :  { %5911 = vmatmul.msk.f32.vlgmr.msrb.gmra.mxu1 %vm161_vm1, %v5001_v15  ;;  %5914 = vmatmul.msk.f32.vlgmr.msrb.gmra.mxu0 %vm161_vm1, %v5004_v41 }
 0x91b   :  { %v5374_v51 = vpop.permute.xlu1 %5373 }
 0x91c   :  { %5394 = vmatpush.msrb.mxu3 %v5374_v51 }
 0x91f   :  { %2747 = vrot.lane.b32.xlu2 %v9001_v26, %s6381_s17 }
 0x921   :  { %5915 = vmatmul.msk.f32.vlgmr.msra.gmra.mxu1 %vm161_vm1, %v5005_v31 }
 0x922   :  { %v4762_v33 = vpop.xlane.xlu2 %4761 }
 0x923   :  { %6364 = vrcp.f32 %v4762_v33  ;;  %v2740_v42 = vpop.permute.xlu1 %2739  ;;  %v4962_v56 = vand.u32 2147483648, %v4762_v33  ;;  %v4960_v54 = vand.u32 2147483647, %v4762_v33  ;;  %vm4956_vm10 = vweird.f32 %v4762_v33 }
 0x924   :  { %v2777_v7 = vadd.f32 %v2740_v42, %v9002_v3 }
 0x925   :  { %v4963_v18 = vor.u32 1.1754944e-38, %v4962_v56  ;;  %vm4961_vm13 = vcmp.eq.f32.partialorder %v4960_v54, 8.507059e+37 }
 0x926   :  { %2794 = vst.msk [vmem:[#allocation2 + $0x50] sm:$0xff] %vm2783_vm8, %v2777_v7 }
 0x927   :  { %4108 = vrot.lane.b32.xlu2 %v8060_v34, %s6382_s18 }
 0x929   :  { %v6365_v14 = vpop.eup %6364 }
 0x92a   :  { %v4952_v4 = vmul.f32 %v6365_v14, %v4762_v33  ;;  %v4768_v9 = vpop.xlane.xlu2 %4767  ;;  %vm4957_vm11 = vweird.f32 %v6365_v14  ;;  %v9005_v33 = vld [vmem:[#allocation15_spill] sm:$0xff] }
 0x92b   :  { %6366 = vrcp.f32 %v4768_v9  ;;  %v4101_v57 = vpop.permute.xlu1 %4100  ;;  %vm4958_vm12 = vmor %vm4956_vm10, %vm4957_vm11  ;;  %v4990_v8 = vand.u32 2147483648, %v4768_v9  ;;  %v4988_v52 = vand.u32 2147483647, %v4768_v9  ;;  %vm4984_vm15 = vweird.f32 %v4768_v9 }
 0x92c   :  { %v4953_v29 = vsub.f32 1.0, %v4952_v4  ;;  %v4138_v62 = vadd.f32 %v4101_v57, %v9002_v3  ;;  %v9006_v4 = vld [vmem:[#allocation3_spill] sm:$0xff] }
 0x92d   :  { %vm4989_vm3 = vcmp.eq.f32.partialorder %v4988_v52, 8.507059e+37 }
 0x92e   :  { %v4954_v17 = vmul.f32 %v6365_v14, %v4953_v29  ;;  %4155 = vst.msk [vmem:[#allocation2 + $0x50] sm:$0xff] %vm4144_vm9, %v4138_v62  ;;  %v9007_v29 = vld [vmem:[#allocation8_spill] sm:$0xff] }
 0x92f   :  { %2725 = vrot.lane.b32.xlu2 %v9003_v39, %s6381_s17 }
 0x930   :  { %v4955_v37 = vadd.f32 %v6365_v14, %v4954_v17 }
 0x931   :  { %v6367_v34 = vpop.eup %6366 }
 0x932   :  { %v4959_v25 = vsel %vm4958_vm12, %v6365_v14, %v4955_v37  ;;  %v4980_v24 = vmul.f32 %v6367_v34, %v4768_v9  ;;  %v5400_v55 = vpop.permute.xlu2 %5399  ;;  %vm4985_vm14 = vweird.f32 %v6367_v34 }
 0x933   :  { %v4964_v5 = vsel %vm4961_vm13, %v4963_v18, %v4959_v25  ;;  %5420 = vmatpush.msra.mxu0 %v5400_v55  ;;  %v2730_v49 = vpop.permute.xlu1 %2729  ;;  %vm4986_vm2 = vmor %vm4984_vm15, %vm4985_vm14  ;;  %v9008_v18 = vld [vmem:[#allocation9_spill] sm:$0xff] }
 0x934   :  { %v5006_v20 = vmul.f32 %v8204_v47, %v4964_v5  ;;  %v4981_v12 = vsub.f32 1.0, %v4980_v24  ;;  %v2772_v2 = vadd.f32 %v2730_v49, %v6513_v32  ;;  %v4991_v47 = vor.u32 1.1754944e-38, %v4990_v8 }
 0x936   :  { %v4982_v19 = vmul.f32 %v6367_v34, %v4981_v12  ;;  %5916 = vmatmul.msk.f32.vlgmr.msra.gmra.mxu2 %vm161_vm1, %v5006_v20  ;;  %2789 = vst.msk [vmem:[#allocation2 + $0x28] sm:$0xff] %vm2783_vm8, %v2772_v2  ;;  %v9009_v20 = vld [vmem:[#allocation4_spill] sm:$0xff] }
 0x937   :  { %v4765_v23 = vpop.xlane.xlu0 %4764  ;;  %2749 = vrot.lane.b32.xlu2 %v9004_v63, %s6381_s17 }
 0x938   :  { %v4983_v13 = vadd.f32 %v6367_v34, %v4982_v19  ;;  %6368 = vrcp.f32 %v4765_v23  ;;  %v4976_v41 = vand.u32 2147483648, %v4765_v23  ;;  %vm4970_vm5 = vweird.f32 %v4765_v23 }
 0x93a   :  { %v4987_v16 = vsel %vm4986_vm2, %v6367_v34, %v4983_v13  ;;  %v2742_v46 = vpop.permute.xlu2 %2741  ;;  %v4977_v51 = vor.u32 1.1754944e-38, %v4976_v41 }
 0x93b   :  { %v4992_v50 = vsel %vm4989_vm3, %v4991_v47, %v4987_v16  ;;  %v2778_v0 = vadd.f32 %v2742_v46, %v6537_v44  ;;  %v4091_v36 = vpop.permute.xlu1 %4090 }
 0x93c   :  { %v5008_v6 = vmul.f32 %v8211_v53, %v4992_v50  ;;  %v4133_v1 = vadd.f32 %v4091_v36, %v6513_v32  ;;  %v4974_v53 = vand.u32 2147483647, %v4765_v23 }
 0x93d   :  { %2795 = vst.msk [vmem:[#allocation2 + $0x58] sm:$0xff] %vm2783_vm8, %v2778_v0 }
 0x93e   :  { %v6369_v11 = vpop.eup %6368  ;;  %5918 = vmatmul.msk.f32.vlgmr.msra.gmra.mxu0 %vm161_vm1, %v5008_v6  ;;  %4150 = vst.msk [vmem:[#allocation2 + $0x28] sm:$0xff] %vm4144_vm9, %v4133_v1  ;;  %vm4975_vm7 = vcmp.eq.f32.partialorder %v4974_v53, 8.507059e+37  ;;  %v9010_v6 = vld [vmem:[#allocation5_spill] sm:$0xff] }
 0x93f   :  { %v4966_v15 = vmul.f32 %v6369_v11, %v4765_v23  ;;  %4110 = vrot.lane.b32.xlu2 %v8052_v59, %s6382_s18  ;;  %vm4971_vm4 = vweird.f32 %v6369_v11 }
 0x940   :  { %vm4972_vm6 = vmor %vm4970_vm5, %vm4971_vm4 }
 0x941   :  { %v4967_v48 = vsub.f32 1.0, %v4966_v15 }
 0x942   :  { %v4103_v30 = vpop.permute.xlu2 %4102 }
 0x943   :  { %v4968_v10 = vmul.f32 %v6369_v11, %v4967_v48  ;;  %v4139_v22 = vadd.f32 %v4103_v30, %v6537_v44  ;;  %v4081_v42 = vpop.permute.xlu1 %4080 }
 0x944   :  { %v4128_v56 = vadd.f32 %v4081_v42, %v9006_v4 }
 0x945   :  { %v4969_v27 = vadd.f32 %v6369_v11, %v4968_v10  ;;  %4156 = vst.msk [vmem:[#allocation2 + $0x58] sm:$0xff] %vm4144_vm9, %v4139_v22 }
 0x947   :  { %v4973_v31 = vsel %vm4972_vm6, %v6369_v11, %v4969_v27  ;;  %2727 = vrot.lane.b32.xlu2 %v9005_v33, %s6381_s17  ;;  %v9011_v27 = vld [vmem:[#allocation6_spill] sm:$0xff] }
 0x948   :  { %v4978_v26 = vsel %vm4975_vm7, %v4977_v51, %v4973_v31 }
 0x949   :  { %v5007_v59 = vmul.f32 %v8217_v28, %v4978_v26 }
 0x94a   :  { %v2720_v7 = vpop.permute.xlu2 %2719  ;;  %v2732_v14 = vpop.permute.xlu0 %2731 }
 0x94b   :  { %v2767_v9 = vadd.f32 %v2720_v7, %v9006_v4  ;;  %v2773_v57 = vadd.f32 %v2732_v14, %v9007_v29  ;;  %5917 = vmatmul.msk.f32.vlgmr.msrb.gmra.mxu3 %vm161_vm1, %v5007_v59  ;;  %v4083_v24 = vpop.permute.xlu1 %4082  ;;  %vm5505_vm1 = vcmask 261312  }
 0x94c   :  { %v4129_v8 = vadd.f32 %v4083_v24, %v9009_v20  ;;  %v5541_v24 = vld [vmem:[%s8841_s3 + $0x18] sm:$0xff] }
 0x94d   :  { %2784 = vst.msk [vmem:[#allocation2] sm:$0xff] %vm2783_vm8, %v2767_v9  ;;  %5606 = vmatpush.msrb.mxu1 %v5541_v24  ;;  %5935 = vmatpush.msrb.mxu2 %v5541_v24 }
 0x94e   :  { %4145 = vst.msk [vmem:[#allocation2] sm:$0xff] %vm4144_vm9, %v4128_v56  ;;  %5936 = vmatpush.msra.mxu3 %v5541_v24 }
 0x94f   :  { %2790 = vst.msk [vmem:[#allocation2 + $0x30] sm:$0xff] %vm2783_vm8, %v2773_v57 }
 0x952   :  { %v2744_v62 = vpop.permute.xlu2 %2743  ;;  %v4093_v17 = vpop.permute.xlu0 %4092 }
 0x953   :  { %v2779_v28 = vadd.f32 %v2744_v62, %v8964_v35  ;;  %v4134_v54 = vadd.f32 %v4093_v17, %v9007_v29  ;;  %v4085_v50 = vpop.permute.xlu1 %4084 }
 0x954   :  { %v4130_v1 = vadd.f32 %v4085_v50, %v9010_v6 }
 0x955   :  { %2796 = vst.msk [vmem:[#allocation2 + $0x60] sm:$0xff] %vm2783_vm8, %v2779_v28 }
 0x956   :  { %4151 = vst.msk [vmem:[#allocation2 + $0x30] sm:$0xff] %vm4144_vm9, %v4134_v54  ;;  %v9012_v54 = vld [vmem:[#allocation7_spill] sm:$0xff] }
 0x95a   :  { %v4105_v37 = vpop.permute.xlu2 %4104  ;;  %v2734_v39 = vpop.permute.xlu0 %2733 }
 0x95b   :  { %v4140_v34 = vadd.f32 %v4105_v37, %v8964_v35  ;;  %v2774_v25 = vadd.f32 %v2734_v39, %v9008_v18  ;;  %v9013_v39 = vld [vmem:[#allocation24_spill] sm:$0xff] }
 0x95d   :  { %4157 = vst.msk [vmem:[#allocation2 + $0x60] sm:$0xff] %vm4144_vm9, %v4140_v34 }
 0x95e   :  { %2791 = vst.msk [vmem:[#allocation2 + $0x38] sm:$0xff] %vm2783_vm8, %v2774_v25 }
 0x962   :  { %v2722_v55 = vpop.permute.xlu2 %2721  ;;  %v4095_v5 = vpop.permute.xlu0 %4094 }
 0x963   :  { %v2768_v12 = vadd.f32 %v2722_v55, %v9009_v20  ;;  %v4135_v49 = vadd.f32 %v4095_v5, %v9008_v18  ;;  %v5540_v55 = vld [vmem:[%s8841_s3 + $0x10] sm:$0xff] }
 0x964   :  { %5607 = vmatpush.msrb.mxu1 %v5540_v55  ;;  %5937 = vmatpush.msrb.mxu2 %v5540_v55 }
 0x965   :  { %2785 = vst.msk [vmem:[#allocation2 + $0x8] sm:$0xff] %vm2783_vm8, %v2768_v12  ;;  %5938 = vmatpush.msra.mxu3 %v5540_v55 }
 0x966   :  { %4146 = vst.msk [vmem:[#allocation2 + $0x8] sm:$0xff] %vm4144_vm9, %v4129_v8 }
 0x967   :  { %4152 = vst.msk [vmem:[#allocation2 + $0x38] sm:$0xff] %vm4144_vm9, %v4135_v49 }
 0x96a   :  { %v2746_v2 = vpop.permute.xlu2 %2745  ;;  %v2736_v19 = vpop.permute.xlu0 %2735 }
 0x96b   :  { %v2780_v52 = vadd.f32 %v2746_v2, %v8965_v61  ;;  %v2775_v23 = vadd.f32 %v2736_v19, %v6525_v38  ;;  %v5032_v13 = vpop.f32.mrf.mxu1  ;;  %v5110_v48 = vpop.f32.mrf.mxu0 }
 0x96c   :  { %5441 = vrot.lane.b32.xlu1 %v5032_v13, %s6383_s19 }
 0x96d   :  { %2797 = vst.msk [vmem:[#allocation2 + $0x68] sm:$0xff] %vm2783_vm8, %v2780_v52 }
 0x96e   :  { %2792 = vst.msk [vmem:[#allocation2 + $0x40] sm:$0xff] %vm2783_vm8, %v2775_v23 }
 0x972   :  { %v4107_v63 = vpop.permute.xlu2 %4106  ;;  %v4097_v16 = vpop.permute.xlu0 %4096 }
 0x973   :  { %v4141_v47 = vadd.f32 %v4107_v63, %v8965_v61  ;;  %v4136_v46 = vadd.f32 %v4097_v16, %v6525_v38 }
 0x975   :  { %4158 = vst.msk [vmem:[#allocation2 + $0x68] sm:$0xff] %vm4144_vm9, %v4141_v47 }
 0x976   :  { %4153 = vst.msk [vmem:[#allocation2 + $0x40] sm:$0xff] %vm4144_vm9, %v4136_v46 }
 0x97a   :  { %v2724_v0 = vpop.permute.xlu2 %2723  ;;  %v5084_v31 = vpop.f32.mrf.mxu3 }
 0x97b   :  { %v2769_v36 = vadd.f32 %v2724_v0, %v9010_v6 }
 0x97d   :  { %2786 = vst.msk [vmem:[#allocation2 + $0x10] sm:$0xff] %vm2783_vm8, %v2769_v36 }
 0x97e   :  { %4147 = vst.msk [vmem:[#allocation2 + $0x10] sm:$0xff] %vm4144_vm9, %v4130_v1 }
 0x982   :  { %v2748_v11 = vpop.permute.xlu2 %2747  ;;  %v5188_v9 = vpop.f32.mrf.mxu3 }
 0x983   :  { %v2781_v15 = vadd.f32 %v2748_v11, %v8966_v21  ;;  %v5058_v7 = vpop.f32.mrf.mxu2 }
 0x985   :  { %2798 = vst.msk [vmem:[#allocation2 + $0x70] sm:$0xff] %vm2783_vm8, %v2781_v15 }
 0x98a   :  { %v4109_v41 = vpop.permute.xlu2 %4108 }
 0x98b   :  { %v4142_v30 = vadd.f32 %v4109_v41, %v8966_v21  ;;  %v5162_v62 = vpop.f32.mrf.mxu2 }
 0x98d   :  { %4159 = vst.msk [vmem:[#allocation2 + $0x70] sm:$0xff] %vm4144_vm9, %v4142_v30 }
 0x98e   :  { %v8587_v10 = vpop.f32.mrf.mxu1  ;;  %v5214_v53 = vpop.f32.mrf.mxu0 }
 0x98f   :  { %5455 = vrot.lane.b32.xlu1 %v5214_v53, %s6383_s19 }
 0x990   :  { %v5292_v17 = vpop.f32.mrf.mxu3 }
 0x992   :  { %v2726_v22 = vpop.permute.xlu2 %2725 }
 0x993   :  { %v2770_v51 = vadd.f32 %v2726_v22, %v9011_v27  ;;  %v5266_v34 = vpop.f32.mrf.mxu2 }
 0x995   :  { %2787 = vst.msk [vmem:[#allocation2 + $0x18] sm:$0xff] %vm2783_vm8, %v2770_v51 }
 0x996   :  { %v5240_v26 = vpop.f32.mrf.mxu1  ;;  %v5318_v33 = vpop.f32.mrf.mxu0 }
 0x997   :  { %5463 = vrot.lane.b32.xlu0 %v5318_v33, %s6383_s19  ;;  %5457 = vrot.lane.b32.xlu1 %v5240_v26, %s6383_s19 }
 0x99a   :  { %v2750_v59 = vpop.permute.xlu2 %2749 }
 0x99b   :  { %v2782_v42 = vadd.f32 %v2750_v59, %v8969_v43 }
 0x99d   :  { %2799 = vst.msk [vmem:[#allocation2 + $0x78] sm:$0xff] %vm2783_vm8, %v2782_v42 }
 0x99e   :  { %v5344_v14 = vpop.f32.mrf.mxu1 }
 0x99f   :  { %5443 = vrot.lane.b32.xlu1 %v5058_v7, %s6383_s19  ;;  %5465 = vrot.lane.b32.xlu0 %v5344_v14, %s6383_s19 }
 0x9a2   :  { %v4111_v57 = vpop.permute.xlu2 %4110 }
 0x9a3   :  { %v4143_v56 = vadd.f32 %v4111_v57, %v8969_v43 }
 0x9a5   :  { %4160 = vst.msk [vmem:[#allocation2 + $0x78] sm:$0xff] %vm4144_vm9, %v4143_v56 }
 0x9a7   :  { %5451 = vrot.lane.b32.xlu1 %v5162_v62, %s6383_s19  ;;  %5461 = vrot.lane.b32.xlu0 %v5292_v17, %s6383_s19 }
 0x9aa   :  { %v2728_v28 = vpop.permute.xlu2 %2727 }
 0x9ab   :  { %v2771_v37 = vadd.f32 %v2728_v28, %v9012_v54 }
 0x9ad   :  { %2788 = vst.msk [vmem:[#allocation2 + $0x20] sm:$0xff] %vm2783_vm8, %v2771_v37 }
 0x9af   :  { %5445 = vrot.lane.b32.xlu1 %v5084_v31, %s6383_s19  ;;  %2737 = vrot.lane.b32.xlu0 %v9013_v39, %s6381_s17 }
 0x9b7   :  { %5453 = vrot.lane.b32.xlu1 %v5188_v9, %s6383_s19  ;;  %4098 = vrot.lane.b32.xlu0 %v8050_v58, %s6382_s18  ;;  %v5539_v58 = vld [vmem:[%s8841_s3 + $0x8] sm:$0xff] }
 0x9b8   :  { %5608 = vmatpush.msrb.mxu1 %v5539_v58  ;;  %5939 = vmatpush.msrb.mxu2 %v5539_v58 }
 0x9b9   :  { %v5370_v25 = vpop.f32.mrf.mxu2  ;;  %5940 = vmatpush.msra.mxu3 %v5539_v58 }
 0x9bb   :  { %v5422_v12 = vpop.f32.mrf.mxu0 }
 0x9bf   :  { %4086 = vrot.lane.b32.xlu1 %v8036_v60, %s6382_s18  ;;  %5467 = vrot.lane.b32.xlu0 %v5370_v25, %s6383_s19  ;;  %v5538_v60 = vld [vmem:[%s8841_s3] sm:$0xff] }
 0x9c0   :  { %5609 = vmatpush.msrb.mxu1 %v5538_v60  ;;  %5941 = vmatpush.msrb.mxu2 %v5538_v60  ;;  %v8740_v25 = vld [vmem:[%s8842_s4] ss:$0 sm:$0xff] }
 0x9c1   :  { %5942 = vmatpush.msra.mxu3 %v5538_v60 }
 0x9c7   :  { %5447 = vrot.lane.b32.xlu1 %v5110_v48, %s6383_s19 }
 0x9ce   :  { %v5396_v5 = vpop.f32.mrf.mxu3 }
 0x9cf   :  { %5469 = vrot.lane.b32.xlu0 %v5396_v5, %s6383_s19  ;;  %5459 = vrot.lane.b32.xlu1 %v5266_v34, %s6383_s19 }
 0x9d7   :  { %5471 = vrot.lane.b32.xlu0 %v5422_v12, %s6383_s19  ;;  %4088 = vrot.lane.b32.xlu1 %v8026_v45, %s6382_s18 }
 0x9de   :  { %v5442_v49 = vpop.permute.xlu1 %5441 }
 0x9df   :  { %5449 = vrot.lane.b32.xlu0 %v8587_v10, %s6383_s19  ;;  %v5489_v8 = vadd.f32 %v5442_v49, %v9006_v4 }
 0x9e1   :  { %5506 = vst.msk [vmem:[#allocation2] sm:$0xff] %vm5505_vm1, %v5489_v8 }
 0x9e8   :  { %v8635_v2 = vld [vmem:[#allocation2] sm:$0xff] }
 0x9e9   :  { %5919 = vmatmul.msk.f32.vlgmr.msrb.gmra.mxu1 %vm44_vm0, %v8635_v2 }
 0xa01   :  { %v5456_v19 = vpop.permute.xlu1 %5455 }
 0xa02   :  { %v5496_v52 = vadd.f32 %v5456_v19, %v9008_v18 }
 0xa04   :  { %5513 = vst.msk [vmem:[#allocation2 + $0x38] sm:$0xff] %vm5505_vm1, %v5496_v52 }
 0xa09   :  { %v5464_v45 = vpop.permute.xlu0 %5463  ;;  %v5458_v23 = vpop.permute.xlu1 %5457 }
 0xa0a   :  { %v5500_v13 = vadd.f32 %v5464_v45, %v6537_v44  ;;  %v5497_v63 = vadd.f32 %v5458_v23, %v6525_v38 }
 0xa0b   :  { %v8694_v59 = vld [vmem:[#allocation2 + $0x38] sm:$0xff] }
 0xa0c   :  { %5517 = vst.msk [vmem:[#allocation2 + $0x58] sm:$0xff] %vm5505_vm1, %v5500_v13 }
 0xa0d   :  { %5514 = vst.msk [vmem:[#allocation2 + $0x40] sm:$0xff] %vm5505_vm1, %v5497_v63 }
 0xa11   :  { %v5444_v4 = vpop.permute.xlu1 %5443  ;;  %v5466_v47 = vpop.permute.xlu0 %5465 }
 0xa12   :  { %v5490_v16 = vadd.f32 %v5444_v4, %v9009_v20  ;;  %v5501_v46 = vadd.f32 %v5466_v47, %v8964_v35 }
 0xa13   :  { %v8676_v30 = vld [vmem:[#allocation2 + $0x58] sm:$0xff] }
 0xa14   :  { %5507 = vst.msk [vmem:[#allocation2 + $0x8] sm:$0xff] %vm5505_vm1, %v5490_v16  ;;  %v8708_v57 = vld [vmem:[#allocation2 + $0x40] sm:$0xff] }
 0xa15   :  { %5518 = vst.msk [vmem:[#allocation2 + $0x60] sm:$0xff] %vm5505_vm1, %v5501_v46 }
 0xa19   :  { %v5452_v18 = vpop.permute.xlu1 %5451  ;;  %v5462_v50 = vpop.permute.xlu0 %5461 }
 0xa1a   :  { %v5494_v44 = vadd.f32 %v5452_v18, %v6513_v32  ;;  %v5499_v38 = vadd.f32 %v5462_v50, %v9002_v3 }
 0xa1b   :  { %v8651_v0 = vld [vmem:[#allocation2 + $0x8] sm:$0xff] }
 0xa1c   :  { %5511 = vst.msk [vmem:[#allocation2 + $0x28] sm:$0xff] %vm5505_vm1, %v5494_v44  ;;  %5920 = vmatmul.msk.f32.gmra.mxu1 %vm44_vm0, %v8651_v0  ;;  %v8688_v31 = vld [vmem:[#allocation2 + $0x60] sm:$0xff] }
 0xa1d   :  { %5516 = vst.msk [vmem:[#allocation2 + $0x50] sm:$0xff] %vm5505_vm1, %v5499_v38 }
 0xa21   :  { %v5446_v35 = vpop.permute.xlu1 %5445  ;;  %v2738_v20 = vpop.permute.xlu0 %2737 }
 0xa22   :  { %v5491_v36 = vadd.f32 %v5446_v35, %v9010_v6  ;;  %v2776_v1 = vadd.f32 %v2738_v20, %v6529_v40 }
 0xa23   :  { %v8659_v11 = vld [vmem:[#allocation2 + $0x28] sm:$0xff] }
 0xa24   :  { %5508 = vst.msk [vmem:[#allocation2 + $0x10] sm:$0xff] %vm5505_vm1, %v5491_v36  ;;  %5924 = vmatmul.msk.f32.vlgmr.msrb.gmra.mxu2 %vm44_vm0, %v8659_v11  ;;  %v8664_v32 = vld [vmem:[#allocation2 + $0x50] sm:$0xff] }
 0xa25   :  { %2793 = vst.msk [vmem:[#allocation2 + $0x48] sm:$0xff] %vm2783_vm8, %v2776_v1  ;;  %5929 = vmatmul.msk.f32.vlgmr.msra.gmra.mxu3 %vm44_vm0, %v8664_v32 }
 0xa29   :  { %v5454_v3 = vpop.permute.xlu1 %5453  ;;  %v4099_v15 = vpop.permute.xlu0 %4098 }
 0xa2a   :  { %v5495_v6 = vadd.f32 %v5454_v3, %v9007_v29  ;;  %v4137_v48 = vadd.f32 %v4099_v15, %v6529_v40 }
 0xa2b   :  { %v8671_v41 = vld [vmem:[#allocation2 + $0x10] sm:$0xff] }
 0xa2c   :  { %5512 = vst.msk [vmem:[#allocation2 + $0x30] sm:$0xff] %vm5505_vm1, %v5495_v6  ;;  %5921 = vmatmul.msk.f32.gmra.mxu1 %vm44_vm0, %v8671_v41 }
 0xa2d   :  { %4154 = vst.msk [vmem:[#allocation2 + $0x48] sm:$0xff] %vm4144_vm9, %v4137_v48  ;;  %5930 = vmatmul.msk.f32.gmra.mxu3 %vm44_vm0, %v8676_v30 }
 0xa31   :  { %v4087_v10 = vpop.permute.xlu1 %4086  ;;  %v5468_v53 = vpop.permute.xlu0 %5467 }
 0xa32   :  { %v4131_v29 = vadd.f32 %v4087_v10, %v9011_v27  ;;  %v5502_v22 = vadd.f32 %v5468_v53, %v8965_v61 }
 0xa33   :  { %v8683_v51 = vld [vmem:[#allocation2 + $0x30] sm:$0xff] }
 0xa34   :  { %4148 = vst.msk [vmem:[#allocation2 + $0x18] sm:$0xff] %vm4144_vm9, %v4131_v29  ;;  %5925 = vmatmul.msk.f32.gmra.mxu2 %vm44_vm0, %v8683_v51 }
 0xa35   :  { %5519 = vst.msk [vmem:[#allocation2 + $0x68] sm:$0xff] %vm5505_vm1, %v5502_v22  ;;  %5931 = vmatmul.msk.f32.gmra.mxu3 %vm44_vm0, %v8688_v31 }
 0xa39   :  { %v5448_v26 = vpop.permute.xlu1 %5447 }
 0xa3a   :  { %v5492_v33 = vadd.f32 %v5448_v26, %v9011_v27 }
 0xa3c   :  { %5509 = vst.msk [vmem:[#allocation2 + $0x18] sm:$0xff] %vm5505_vm1, %v5492_v33  ;;  %5926 = vmatmul.msk.f32.gmra.mxu2 %vm44_vm0, %v8694_v59  ;;  %v8699_v61 = vld [vmem:[#allocation2 + $0x68] sm:$0xff] }
 0xa3d   :  { %5932 = vmatmul.msk.f32.gmra.mxu3 %vm44_vm0, %v8699_v61 }
 0xa41   :  { %v5470_v42 = vpop.permute.xlu0 %5469  ;;  %v5460_v7 = vpop.permute.xlu1 %5459 }
 0xa42   :  { %v5503_v14 = vadd.f32 %v5470_v42, %v8966_v21  ;;  %v5498_v9 = vadd.f32 %v5460_v7, %v6529_v40 }
 0xa43   :  { %v8706_v27 = vld [vmem:[#allocation2 + $0x18] sm:$0xff] }
 0xa44   :  { %5520 = vst.msk [vmem:[#allocation2 + $0x70] sm:$0xff] %vm5505_vm1, %v5503_v14  ;;  %5922 = vmatmul.msk.f32.gmra.mxu1 %vm44_vm0, %v8706_v27  ;;  %5927 = vmatmul.msk.f32.gmra.mxu2 %vm44_vm0, %v8708_v57 }
 0xa45   :  { %5515 = vst.msk [vmem:[#allocation2 + $0x48] sm:$0xff] %vm5505_vm1, %v5498_v9 }
 0xa49   :  { %v5472_v56 = vpop.permute.xlu0 %5471  ;;  %v4089_v62 = vpop.permute.xlu1 %4088 }
 0xa4a   :  { %v5504_v21 = vadd.f32 %v5472_v56, %v8969_v43  ;;  %v4132_v40 = vadd.f32 %v4089_v62, %v9012_v54 }
 0xa4b   :  { %v8717_v17 = vld [vmem:[#allocation2 + $0x70] sm:$0xff] }
 0xa4c   :  { %5521 = vst.msk [vmem:[#allocation2 + $0x78] sm:$0xff] %vm5505_vm1, %v5504_v21  ;;  %v8720_v28 = vld [vmem:[#allocation2 + $0x48] sm:$0xff]  ;;  %5933 = vmatmul.msk.f32.gmra.mxu3 %vm44_vm0, %v8717_v17 }
 0xa4d   :  { %4149 = vst.msk [vmem:[#allocation2 + $0x20] sm:$0xff] %vm4144_vm9, %v4132_v40  ;;  %5928 = vmatmul.msk.f32.gmra.mxu2 %vm44_vm0, %v8720_v28 }
 0xa51   :  { %v5450_v37 = vpop.permute.xlu0 %5449 }
 0xa52   :  { %v5493_v39 = vadd.f32 %v5450_v37, %v9012_v54 }
 0xa53   :  { %v8728_v43 = vld [vmem:[#allocation2 + $0x78] sm:$0xff] }
 0xa54   :  { %5510 = vst.msk [vmem:[#allocation2 + $0x20] sm:$0xff] %vm5505_vm1, %v5493_v39  ;;  %5934 = vmatmul.msk.f32.gmra.mxu3 %vm44_vm0, %v8728_v43 }
 0xa5b   :  { %v8733_v34 = vld [vmem:[#allocation2 + $0x20] sm:$0xff] }
 0xa5c   :  { %5923 = vmatmul.msk.f32.gmra.mxu1 %vm44_vm0, %v8733_v34 }
 0xa66   :  { %v5611_v24 = vpop.f32.mrf.mxu1 }
 0xa67   :  { %v5612_v54 = vadd.f32 %v8740_v25, %v5611_v24 }
 0xa69   :  { %v5659_v55 = vmax.f32 %v5612_v54, 0.0 }
 0xa6b   :  { %v5675_v58 = vadd.f32 %v5659_v55, %v8635_v2 }
 0xa6d   :  { %5691 = vst.msk [vmem:[%s8843_s5] sm:$0xff] %vm44_vm0, %v5675_v58 }
 0xa99   :  { %v5614_v60 = vpop.f32.mrf.mxu1 }
 0xa9a   :  { %v5615_v5 = vadd.f32 %v8740_v25, %v5614_v60 }
 0xa9c   :  { %v5660_v12 = vmax.f32 %v5615_v5, 0.0 }
 0xa9e   :  { %v5676_v49 = vadd.f32 %v5660_v12, %v8651_v0 }
 0xaa0   :  { %5692 = vst.msk [vmem:[%s8843_s5 + $0x8] sm:$0xff] %vm44_vm0, %v5676_v49 }
 0xaa7   :  { %v5626_v8 = vpop.f32.mrf.mxu2 }
 0xaa8   :  { %v5627_v19 = vadd.f32 %v8740_v25, %v5626_v8  ;;  %v5641_v2 = vpop.f32.mrf.mxu3 }
 0xaa9   :  { %v5642_v52 = vadd.f32 %v8740_v25, %v5641_v2  ;;  %v5617_v45 = vpop.f32.mrf.mxu1 }
 0xaaa   :  { %v5664_v23 = vmax.f32 %v5627_v19, 0.0  ;;  %v5618_v13 = vadd.f32 %v8740_v25, %v5617_v45 }
 0xaab   :  { %v5669_v63 = vmax.f32 %v5642_v52, 0.0 }
 0xaac   :  { %v5680_v4 = vadd.f32 %v5664_v23, %v8659_v11  ;;  %v5661_v47 = vmax.f32 %v5618_v13, 0.0 }
 0xaad   :  { %v5685_v16 = vadd.f32 %v5669_v63, %v8664_v32 }
 0xaae   :  { %5696 = vst.msk [vmem:[%s8843_s5 + $0x28] sm:$0xff] %vm44_vm0, %v5680_v4  ;;  %v5677_v46 = vadd.f32 %v5661_v47, %v8671_v41 }
 0xaaf   :  { %5701 = vst.msk [vmem:[%s8843_s5 + $0x50] sm:$0xff] %vm44_vm0, %v5685_v16 }
 0xab0   :  { %5693 = vst.msk [vmem:[%s8843_s5 + $0x10] sm:$0xff] %vm44_vm0, %v5677_v46  ;;  %v5644_v18 = vpop.f32.mrf.mxu3 }
 0xab1   :  { %v5645_v50 = vadd.f32 %v8740_v25, %v5644_v18 }
 0xab3   :  { %v5670_v44 = vmax.f32 %v5645_v50, 0.0 }
 0xab5   :  { %v5686_v38 = vadd.f32 %v5670_v44, %v8676_v30 }
 0xab7   :  { %5702 = vst.msk [vmem:[%s8843_s5 + $0x58] sm:$0xff] %vm44_vm0, %v5686_v38  ;;  %v5629_v0 = vpop.f32.mrf.mxu2 }
 0xab8   :  { %v5630_v35 = vadd.f32 %v8740_v25, %v5629_v0  ;;  %v5647_v20 = vpop.f32.mrf.mxu3 }
 0xab9   :  { %v5648_v36 = vadd.f32 %v8740_v25, %v5647_v20 }
 0xaba   :  { %v5665_v1 = vmax.f32 %v5630_v35, 0.0 }
 0xabb   :  { %v5671_v11 = vmax.f32 %v5648_v36, 0.0 }
 0xabc   :  { %v5681_v32 = vadd.f32 %v5665_v1, %v8683_v51 }
 0xabd   :  { %v5687_v3 = vadd.f32 %v5671_v11, %v8688_v31 }
 0xabe   :  { %5697 = vst.msk [vmem:[%s8843_s5 + $0x30] sm:$0xff] %vm44_vm0, %v5681_v32 }
 0xabf   :  { %5703 = vst.msk [vmem:[%s8843_s5 + $0x60] sm:$0xff] %vm44_vm0, %v5687_v3  ;;  %v5632_v15 = vpop.f32.mrf.mxu2 }
 0xac0   :  { %v5633_v6 = vadd.f32 %v8740_v25, %v5632_v15  ;;  %v5650_v48 = vpop.f32.mrf.mxu3 }
 0xac1   :  { %v5651_v41 = vadd.f32 %v8740_v25, %v5650_v48  ;;  %v5620_v30 = vpop.f32.mrf.mxu1 }
 0xac2   :  { %v5666_v10 = vmax.f32 %v5633_v6, 0.0  ;;  %v5621_v53 = vadd.f32 %v8740_v25, %v5620_v30 }
 0xac3   :  { %v5672_v29 = vmax.f32 %v5651_v41, 0.0 }
 0xac4   :  { %v5682_v22 = vadd.f32 %v5666_v10, %v8694_v59  ;;  %v5662_v51 = vmax.f32 %v5621_v53, 0.0 }
 0xac5   :  { %v5688_v31 = vadd.f32 %v5672_v29, %v8699_v61 }
 0xac6   :  { %5698 = vst.msk [vmem:[%s8843_s5 + $0x38] sm:$0xff] %vm44_vm0, %v5682_v22  ;;  %v5678_v26 = vadd.f32 %v5662_v51, %v8706_v27 }
 0xac7   :  { %5704 = vst.msk [vmem:[%s8843_s5 + $0x68] sm:$0xff] %vm44_vm0, %v5688_v31  ;;  %v5635_v33 = vpop.f32.mrf.mxu2 }
 0xac8   :  { %5694 = vst.msk [vmem:[%s8843_s5 + $0x18] sm:$0xff] %vm44_vm0, %v5678_v26  ;;  %v5636_v59 = vadd.f32 %v8740_v25, %v5635_v33 }
 0xaca   :  { %v5667_v61 = vmax.f32 %v5636_v59, 0.0 }
 0xacc   :  { %v5683_v42 = vadd.f32 %v5667_v61, %v8708_v57 }
 0xace   :  { %5699 = vst.msk [vmem:[%s8843_s5 + $0x40] sm:$0xff] %vm44_vm0, %v5683_v42 }
 0xacf   :  { %v5653_v7 = vpop.f32.mrf.mxu3 }
 0xad0   :  { %v5638_v14 = vpop.f32.mrf.mxu2  ;;  %v5654_v9 = vadd.f32 %v8740_v25, %v5653_v7 }
 0xad1   :  { %v5639_v27 = vadd.f32 %v8740_v25, %v5638_v14 }
 0xad2   :  { %v5673_v56 = vmax.f32 %v5654_v9, 0.0 }
 0xad3   :  { %v5668_v62 = vmax.f32 %v5639_v27, 0.0 }
 0xad4   :  { %v5689_v21 = vadd.f32 %v5673_v56, %v8717_v17 }
 0xad5   :  { %v5684_v40 = vadd.f32 %v5668_v62, %v8720_v28 }
 0xad6   :  { %5705 = vst.msk [vmem:[%s8843_s5 + $0x70] sm:$0xff] %vm44_vm0, %v5689_v21 }
 0xad7   :  { %5700 = vst.msk [vmem:[%s8843_s5 + $0x48] sm:$0xff] %vm44_vm0, %v5684_v40  ;;  %v5656_v57 = vpop.f32.mrf.mxu3 }
 0xad8   :  { %v5657_v37 = vadd.f32 %v8740_v25, %v5656_v57 }
 0xad9   :  { %v5623_v39 = vpop.f32.mrf.mxu1 }
 0xada   :  { %v5674_v24 = vmax.f32 %v5657_v37, 0.0  ;;  %v5624_v54 = vadd.f32 %v8740_v25, %v5623_v39 }
 0xadc   :  { %v5690_v17 = vadd.f32 %v5674_v24, %v8728_v43  ;;  %v5663_v28 = vmax.f32 %v5624_v54, 0.0 }
 0xade   :  { %5706 = vst.msk [vmem:[%s8843_s5 + $0x78] sm:$0xff] %vm44_vm0, %v5690_v17  ;;  %v5679_v55 = vadd.f32 %v5663_v28, %v8733_v34 }
 0xae0   :  { %5695 = vst.msk [vmem:[%s8843_s5 + $0x20] sm:$0xff] %vm44_vm0, %v5679_v55 }

</bundles_post_ra>
